<compile_context>
chip_gen: v7x
topology: tpu7x:2x2x1
jax: 0.10.0
libtpu: 0.0.40
codegen_flags: <defaults>
</compile_context>

<pallas_src>
import functools

import jax
import jax.numpy as jnp
from jax.experimental import pallas as pl
from jax.experimental.pallas import tpu as pltpu

_EPS = 1e-5
_MXU_DTYPE = jnp.bfloat16          # MXU operand dtype (accumulation stays f32)

# VMEM budgets.  v5e/v6e have 128 MiB VMEM and can raise both (bigger row tiles
# -> fewer grid steps, better HBM roofline); v7x has 64 MiB per TensorCore, so
# the defaults stay conservative.
_VMEM_LIMIT = 48 * 1024 * 1024
_TILE_BUDGET = 16 * 1024 * 1024


def _round_up(x, m):
    return (x + m - 1) // m * m


def _bn_affine(p, eps=_EPS):
    """Eval-mode BatchNorm (gamma, beta, mean, var) -> per-channel scale/shift."""
    gamma, beta, mean, var = p
    scale = gamma / jnp.sqrt(var + eps)
    return scale.astype(jnp.float32), (beta - mean * scale).astype(jnp.float32)


def _fold_params(params, stem_block):
    """Fold BN1 / BNs scales into the conv weight columns (review item)."""
    cin = params["w1"].shape[2]
    if stem_block:
        s0 = jnp.ones((cin,), jnp.float32)
        t0 = jnp.zeros((cin,), jnp.float32)
    else:
        s0, t0 = _bn_affine(params["bn0"])
    s1, t1 = _bn_affine(params["bn1"])
    ss, ts = _bn_affine(params["bns"])
    w1f = (params["w1"].astype(jnp.float32) * s1).astype(_MXU_DTYPE)
    wsf = (params["ws"].astype(jnp.float32) * ss).astype(_MXU_DTYPE)
    w2f = params["w2"].astype(_MXU_DTYPE)
    b2 = params["b2"].astype(jnp.float32)
    return w1f, wsf, w2f, s0, t0, t1, ts, b2


def _conv3x3_accum(src, w4, rows_out, cols_out, stride, off=0):
    """3x3 conv as 9 accumulating MXU matmuls on shifted views (no im2col
    concat).  For v6e/v7x with Cin >= 128 the taps could be grouped per-kh
    (3 matmuls with K = 3*Cin) to fill the 256-deep MXU."""
    cin = src.shape[-1]
    cout = w4.shape[-1]
    m = rows_out * cols_out
    rspan = (rows_out - 1) * stride + 1
    cspan = (cols_out - 1) * stride + 1
    acc = None
    for kh in range(3):
        for kw in range(3):
            win = src[off + kh: off + kh + rspan: stride,
                      off + kw: off + kw + cspan: stride, :]
            d = jnp.dot(win.reshape(m, cin), w4[kh, kw],
                        preferred_element_type=jnp.float32)
            acc = d if acc is None else acc + d
    return acc.reshape(rows_out, cols_out, cout)


# -----------------------------------------------------------------------------
# Fused kernel: input_block + conv1/BN1/ReLU (halo) + conv2+bias + skip conv/BNs
# -----------------------------------------------------------------------------
def _make_fused_kernel(*, tho, wo, woe, ho, h, w, stride, padding, stem):
    xrows = (tho + 1) * stride + 3          # input rows covering the b halo

    def kernel(x_ref, w1_ref, ws_ref, w2_ref, s0_ref, t0_ref,
               t1_ref, ts_ref, b2_ref, o_ref):
        t = pl.program_id(1)
        row0 = t * tho                       # first output row of this tile
        xstart = row0 * stride               # first padded-input row needed

        xt = x_ref[0, pl.ds(xstart, xrows), :, :]        # (xrows, wp2, cin) bf16
        wp2 = xt.shape[1]
        cin = xt.shape[2]
        cout = o_ref.shape[3]

        w1 = w1_ref[...]
        ws = ws_ref[...]
        w2 = w2_ref[...]

        # --- input_block: BN0 affine + ReLU (f32), then zero every padding
        #     position so it equals zero-padded relu(bn0(x)) (correctness fix).
        if stem:
            y = xt                                        # Identity input block
        else:
            xf = xt.astype(jnp.float32)
            yf = jnp.maximum(xf * s0_ref[...] + t0_ref[...], 0.0)
            ri = jax.lax.broadcasted_iota(jnp.int32, (xrows, wp2, cin), 0) + xstart
            ci = jax.lax.broadcasted_iota(jnp.int32, (xrows, wp2, cin), 1)
            inside = ((ri >= padding + stride) & (ri < padding + stride + h) &
                      (ci >= padding + stride) & (ci < padding + stride + w))
            y = jnp.where(inside, yf, 0.0).astype(_MXU_DTYPE)

        # --- conv1 (BN1 scale folded into w1) + shift + ReLU over the extended
        #     (halo) tile: b rows row0-1 .. row0+tho, cols -1 .. woe-2. --------
        acc1 = _conv3x3_accum(y, w1, tho + 2, woe, stride)
        bt = jnp.maximum(acc1 + t1_ref[...], 0.0)         # (tho+2, woe, cout) f32
        # Zero positions outside b: this realises conv2's zero padding and
        # discards the over-computed columns.
        bj = jax.lax.broadcasted_iota(jnp.int32, (tho + 2, woe, cout), 0) + (row0 - 1)
        bc = jax.lax.broadcasted_iota(jnp.int32, (tho + 2, woe, cout), 1) - 1
        bvalid = (bj >= 0) & (bj < ho) & (bc >= 0) & (bc < wo)
        bpad = jnp.where(bvalid, bt, 0.0).astype(_MXU_DTYPE)

        # --- conv2 (3x3, stride 1) + bias --------------------------------------
        acc2 = _conv3x3_accum(bpad, w2, tho, wo, 1)

        # --- convolution_skip: conv3x3(x) (BNs scale folded into ws) + shift ---
        accs = _conv3x3_accum(xt, ws, tho, wo, stride, off=stride)

        out = acc2 + b2_ref[...] + accs + ts_ref[...]
        o_ref[...] = out.reshape(1, tho, wo, cout).astype(o_ref.dtype)

    return kernel


# -----------------------------------------------------------------------------
# Row-tile selection (footprint counts *all* live buffers - v7x review item)
# -----------------------------------------------------------------------------
def _footprint_bytes(tho, *, hp2, wp2, cin, cout, wo, woe, stride):
    xrows = (tho + 1) * stride + 3
    m_ext = (tho + 2) * woe
    m_int = tho * wo
    return (
        2 * hp2 * wp2 * cin * 2              # resident padded input (x2 bufs, bf16)
        + 2 * 2 * 9 * cin * cout * 2         # w1 + ws (double-buffered, bf16)
        + 2 * 9 * cout * cout * 2            # w2 (double-buffered, bf16)
        + 2 * m_int * cout * 4               # output tile (double-buffered, f32)
        + xrows * wp2 * cin * (2 + 4 + 2)    # x window bf16 + f32 BN0 act + bf16 y
        + m_ext * cout * (4 + 2)             # conv1 f32 accumulator + bf16 halo tile
        + 2 * m_int * cout * 4               # conv2 + skip f32 accumulators
    )


def _pick_row_tile(n, ho, *, requested, budget, hp2, wp2, cin, cout, wo, woe,
                   stride):
    # TODO(synk): allow non-divisor tiles via a masked remainder step.
    if requested is not None and 1 <= requested <= ho and ho % requested == 0:
        return requested

    def fits(tho):
        return _footprint_bytes(tho, hp2=hp2, wp2=wp2, cin=cin, cout=cout,
                                wo=wo, woe=woe, stride=stride) <= budget

    divisors = [d for d in range(1, ho + 1) if ho % d == 0]
    best = 1
    for d in divisors:
        if fits(d):
            best = d
    # Keep >= 2 grid steps when possible so both TensorCores of a v7x chip /
    # megacore get work under dimension_semantics=("parallel", "parallel").
    if n * (ho // best) < 2:
        for d in reversed(divisors):
            if d < best and fits(d):
                best = d
                break
    return best


# -----------------------------------------------------------------------------
# ResidualConv2d forward (Pallas)
# -----------------------------------------------------------------------------
def residual_conv2d(x_nchw, params, *, stride=1, padding=1, stem_block=False,
                    row_tile=None, vmem_limit_bytes=_VMEM_LIMIT,
                    tile_budget_bytes=_TILE_BUDGET):
    x = jnp.transpose(x_nchw, (0, 2, 3, 1)).astype(jnp.float32)   # NCHW -> NHWC
    n, h, w, cin = x.shape
    cout = params["w1"].shape[-1]
    ho = (h + 2 * padding - 3) // stride + 1
    wo = (w + 2 * padding - 3) // stride + 1

    w1f, wsf, w2f, s0, t0, t1, ts, b2 = _fold_params(params, stem_block)

    # Extended b columns rounded up to a sublane multiple so every in-kernel
    # reshape stays tile-aligned; the extra columns are masked to zero.
    woe = _round_up(wo + 2, 8)

    # Single bf16 zero-pad of x covering conv1/skip padding AND conv2's halo,
    # so no intermediate ever has to be padded (or even written) in HBM.
    top = padding + stride
    left = padding + stride
    hp2 = h + 2 * padding + 2 * stride
    wp2 = (woe - 1) * stride + 3
    right = wp2 - left - w
    xp = jnp.pad(x.astype(_MXU_DTYPE),
                 ((0, 0), (top, top), (left, right), (0, 0)))

    tho = _pick_row_tile(n, ho, requested=row_tile, budget=tile_budget_bytes,
                         hp2=hp2, wp2=wp2, cin=cin, cout=cout,
                         wo=wo, woe=woe, stride=stride)
    assert ho % tho == 0
    ntile = ho // tho
    grid = (n, ntile)

    kernel = _make_fused_kernel(tho=tho, wo=wo, woe=woe, ho=ho, h=h, w=w,
                                stride=stride, padding=padding, stem=stem_block)

    const2 = lambda b, t: (0, 0)
    const4 = lambda b, t: (0, 0, 0, 0)

    flops = 2 * 9 * n * (ntile * (tho + 2) * woe * cin * cout     # conv1 (+halo)
                         + ho * wo * cin * cout                   # skip conv
                         + ho * wo * cout * cout)                 # conv2
    bytes_acc = (xp.size * 2 + n * ho * wo * cout * 4
                 + (w1f.size + wsf.size + w2f.size) * 2)

    out = pl.pallas_call(
        kernel,
        out_shape=jax.ShapeDtypeStruct((n, ho, wo, cout), jnp.float32),
        grid=grid,
        in_specs=[
            # Full padded image per batch element; only re-DMA'd when the batch
            # index changes.
            pl.BlockSpec((1, hp2, wp2, cin), lambda b, t: (b, 0, 0, 0)),
            pl.BlockSpec((3, 3, cin, cout), const4),    # w1 * s1   (bf16)
            pl.BlockSpec((3, 3, cin, cout), const4),    # ws * ss   (bf16)
            pl.BlockSpec((3, 3, cout, cout), const4),   # w2        (bf16)
            pl.BlockSpec((1, cin), const2),             # s0
            pl.BlockSpec((1, cin), const2),             # t0
            pl.BlockSpec((1, cout), const2),            # t1
            pl.BlockSpec((1, cout), const2),            # ts
            pl.BlockSpec((1, cout), const2),            # b2
        ],
        out_specs=pl.BlockSpec((1, tho, wo, cout), lambda b, t: (b, t, 0, 0)),
        compiler_params=pltpu.CompilerParams(
            dimension_semantics=("parallel", "parallel"),
            vmem_limit_bytes=vmem_limit_bytes),
        cost_estimate=pl.CostEstimate(flops=flops, transcendentals=0,
                                      bytes_accessed=bytes_acc),
    )(xp, w1f, wsf, w2f,
      s0.reshape(1, -1), t0.reshape(1, -1),
      t1.reshape(1, -1), ts.reshape(1, -1), b2.reshape(1, -1))

    return jnp.transpose(out, (0, 3, 1, 2))                       # NHWC -> NCHW


# -----------------------------------------------------------------------------
# References for the self-check
# -----------------------------------------------------------------------------
def residual_conv2d_ref(x_nchw, params, *, stride=1, padding=1, stem_block=False):
    """Exact f32 semantics of the PyTorch module (eval-mode BatchNorm)."""
    x = jnp.transpose(x_nchw, (0, 2, 3, 1)).astype(jnp.float32)

    def bn(z, p):
        g, b_, m, v = p
        return (z - m) / jnp.sqrt(v + _EPS) * g + b_

    def conv(z, wgt, s, p, bias=None):
        y = jax.lax.conv_general_dilated(
            z, wgt, (s, s), [(p, p), (p, p)],
            dimension_numbers=("NHWC", "HWIO", "NHWC"))
        return y if bias is None else y + bias

    y = x if stem_block else jnp.maximum(bn(x, params["bn0"]), 0.0)
    b = jnp.maximum(bn(conv(y, params["w1"], stride, padding), params["bn1"]), 0.0)
    c = conv(b, params["w2"], 1, 1, params["b2"])
    sk = bn(conv(x, params["ws"], stride, padding), params["bns"])
    return jnp.transpose(c + sk, (0, 3, 1, 2))


def residual_conv2d_ref_quantized(x_nchw, params, *, stride=1, padding=1,
                                  stem_block=False):
    """Mirrors the kernel's precision choices (bf16 inputs/weights/intermediates,
    f32 accumulation) so structural / halo / boundary bugs show up clearly."""
    x = jnp.transpose(x_nchw, (0, 2, 3, 1)).astype(_MXU_DTYPE).astype(jnp.float32)
    w1f, wsf, w2f, s0, t0, t1, ts, b2 = _fold_params(params, stem_block)

    def conv(z, wgt, s, p):
        return jax.lax.conv_general_dilated(
            z.astype(_MXU_DTYPE), wgt.astype(_MXU_DTYPE), (s, s), [(p, p), (p, p)],
            dimension_numbers=("NHWC", "HWIO", "NHWC"),
            preferred_element_type=jnp.float32)

    y = x if stem_block else jnp.maximum(x * s0 + t0, 0.0)
    y = y.astype(_MXU_DTYPE).astype(jnp.float32)
    b = jnp.maximum(conv(y, w1f, stride, padding) + t1, 0.0)
    b = b.astype(_MXU_DTYPE).astype(jnp.float32)
    c = conv(b, w2f, 1, 1) + b2
    sk = conv(x, wsf, stride, padding) + ts
    return jnp.transpose(c + sk, (0, 3, 1, 2))


# -----------------------------------------------------------------------------
if __name__ == "__main__":
    key = jax.random.PRNGKey(0)
    N, CIN, H, W, COUT = 2, 8, 16, 16, 16
    STRIDE, PADDING = 1, 1

    keys = jax.random.split(key, 8)
    x = jax.random.normal(keys[0], (N, CIN, H, W), jnp.float32)

    def bn_params(k, c):
        kg, kb, km, kv = jax.random.split(k, 4)
        gamma = 1.0 + 0.1 * jax.random.normal(kg, (c,), jnp.float32)
        beta = 0.2 * jax.random.normal(kb, (c,), jnp.float32)
        mean = 0.2 * jax.random.normal(km, (c,), jnp.float32)
        var = 1.0 + 0.1 * jax.random.uniform(kv, (c,), jnp.float32)
        return gamma, beta, mean, var

    params = {
        "bn0": bn_params(keys[1], CIN),
        "w1": 0.1 * jax.random.normal(keys[2], (3, 3, CIN, COUT), jnp.float32),
        "bn1": bn_params(keys[3], COUT),
        "w2": 0.1 * jax.random.normal(keys[4], (3, 3, COUT, COUT), jnp.float32),
        "b2": 0.05 * jax.random.normal(keys[5], (COUT,), jnp.float32),
        "ws": 0.1 * jax.random.normal(keys[6], (3, 3, CIN, COUT), jnp.float32),
        "bns": bn_params(keys[7], COUT),
    }

    # row_tile=8 -> 2 row tiles per image, so the halo / boundary logic and the
    # multi-tile grid (2 batches x 2 tiles) are actually exercised.
    for stem in (False, True):
        fwd = jax.jit(functools.partial(residual_conv2d, stride=STRIDE,
                                        padding=PADDING, stem_block=stem,
                                        row_tile=8))
        out = jax.block_until_ready(fwd(x, params))
        ref_q = residual_conv2d_ref_quantized(x, params, stride=STRIDE,
                                              padding=PADDING, stem_block=stem)
        ref_f = residual_conv2d_ref(x, params, stride=STRIDE,
                                    padding=PADDING, stem_block=stem)
        assert out.shape == ref_f.shape == (N, COUT, H, W)
        err_q = float(jnp.max(jnp.abs(out - ref_q)))
        err_f = float(jnp.max(jnp.abs(out - ref_f)))
        # Tight check vs the precision-matched reference (catches tiling /
        # halo / padding bugs); loose check vs the exact f32 module semantics
        # (bounds the intentional bf16 quantization error).
        assert err_q < 1e-2, f"stem={stem}: |out - quantized ref| = {err_q}"
        assert err_f < 1e-1, f"stem={stem}: |out - f32 ref| = {err_f}"
    print("KERNEL_OK")
</pallas_src>

<mosaic_0001>
module attributes {stable_mosaic.version = 11 : i64} {
  func.func @kernel(%arg0: i32, %arg1: i32, %arg2: memref<1x20x26x8xbf16, #tpu.memory_space<vmem>>, %arg3: memref<3x3x8x16xbf16, #tpu.memory_space<vmem>>, %arg4: memref<3x3x8x16xbf16, #tpu.memory_space<vmem>>, %arg5: memref<3x3x16x16xbf16, #tpu.memory_space<vmem>>, %arg6: memref<1x8xf32, #tpu.memory_space<vmem>>, %arg7: memref<1x8xf32, #tpu.memory_space<vmem>>, %arg8: memref<1x16xf32, #tpu.memory_space<vmem>>, %arg9: memref<1x16xf32, #tpu.memory_space<vmem>>, %arg10: memref<1x16xf32, #tpu.memory_space<vmem>>, %arg11: memref<1x8x16x16xf32, #tpu.memory_space<vmem>>) attributes {dimension_semantics = [#tpu.dimension_semantics<parallel>, #tpu.dimension_semantics<parallel>], iteration_bounds = array<i64: 2, 2>, scalar_prefetch = 0 : i64, scratch_operands = 0 : i64, tpu.core_type = #tpu.core_type<tc>, window_params = [{transform_indices = @transform_0, window_bounds = array<i64: 1, 20, 26, 8>}, {pipeline_mode = #tpu.pipeline_mode<synchronous>, transform_indices = @transform_1, window_bounds = array<i64: 3, 3, 8, 16>}, {pipeline_mode = #tpu.pipeline_mode<synchronous>, transform_indices = @transform_2, window_bounds = array<i64: 3, 3, 8, 16>}, {pipeline_mode = #tpu.pipeline_mode<synchronous>, transform_indices = @transform_3, window_bounds = array<i64: 3, 3, 16, 16>}, {pipeline_mode = #tpu.pipeline_mode<synchronous>, transform_indices = @transform_4, window_bounds = array<i64: 1, 8>}, {pipeline_mode = #tpu.pipeline_mode<synchronous>, transform_indices = @transform_5, window_bounds = array<i64: 1, 8>}, {pipeline_mode = #tpu.pipeline_mode<synchronous>, transform_indices = @transform_6, window_bounds = array<i64: 1, 16>}, {pipeline_mode = #tpu.pipeline_mode<synchronous>, transform_indices = @transform_7, window_bounds = array<i64: 1, 16>}, {pipeline_mode = #tpu.pipeline_mode<synchronous>, transform_indices = @transform_8, window_bounds = array<i64: 1, 16>}, {transform_indices = @transform_9, window_bounds = array<i64: 1, 8, 16, 16>}]} {
    %c8_i32 = arith.constant 8 : i32
    %0 = arith.muli %arg1, %c8_i32 : i32
    %c1_i32 = arith.constant 1 : i32
    %1 = arith.muli %0, %c1_i32 : i32
    %c0 = arith.constant 0 : index
    %2 = arith.index_cast %1 : i32 to index
    %c0_0 = arith.constant 0 : index
    %c0_1 = arith.constant 0 : index
    %3 = vector.load %arg2[%c0, %2, %c0_0, %c0_1] : memref<1x20x26x8xbf16, #tpu.memory_space<vmem>>, vector<1x12x26x8xbf16>
    %4 = vector.shape_cast %3 : vector<1x12x26x8xbf16> to vector<12x26x8xbf16>
    %c0_2 = arith.constant 0 : index
    %c0_3 = arith.constant 0 : index
    %c0_4 = arith.constant 0 : index
    %c0_5 = arith.constant 0 : index
    %5 = vector.load %arg3[%c0_2, %c0_3, %c0_4, %c0_5] : memref<3x3x8x16xbf16, #tpu.memory_space<vmem>>, vector<3x3x8x16xbf16>
    %c0_6 = arith.constant 0 : index
    %c0_7 = arith.constant 0 : index
    %c0_8 = arith.constant 0 : index
    %c0_9 = arith.constant 0 : index
    %6 = vector.load %arg4[%c0_6, %c0_7, %c0_8, %c0_9] : memref<3x3x8x16xbf16, #tpu.memory_space<vmem>>, vector<3x3x8x16xbf16>
    %c0_10 = arith.constant 0 : index
    %c0_11 = arith.constant 0 : index
    %c0_12 = arith.constant 0 : index
    %c0_13 = arith.constant 0 : index
    %7 = vector.load %arg5[%c0_10, %c0_11, %c0_12, %c0_13] : memref<3x3x16x16xbf16, #tpu.memory_space<vmem>>, vector<3x3x16x16xbf16>
    %8 = arith.extf %4 : vector<12x26x8xbf16> to vector<12x26x8xf32>
    %c0_14 = arith.constant 0 : index
    %c0_15 = arith.constant 0 : index
    %9 = vector.load %arg6[%c0_14, %c0_15] : memref<1x8xf32, #tpu.memory_space<vmem>>, vector<1x8xf32>
    %10 = vector.shape_cast %9 : vector<1x8xf32> to vector<1x1x8xf32>
    %11 = vector.broadcast %10 : vector<1x1x8xf32> to vector<12x26x8xf32>
    %12 = arith.mulf %8, %11 : vector<12x26x8xf32>
    %c0_16 = arith.constant 0 : index
    %c0_17 = arith.constant 0 : index
    %13 = vector.load %arg7[%c0_16, %c0_17] : memref<1x8xf32, #tpu.memory_space<vmem>>, vector<1x8xf32>
    %14 = vector.shape_cast %13 : vector<1x8xf32> to vector<1x1x8xf32>
    %15 = vector.broadcast %14 : vector<1x1x8xf32> to vector<12x26x8xf32>
    %16 = arith.addf %12, %15 : vector<12x26x8xf32>
    %cst = arith.constant 0.000000e+00 : f32
    %17 = vector.broadcast %cst : f32 to vector<12x26x8xf32>
    %18 = arith.maximumf %16, %17 : vector<12x26x8xf32>
    %19 = tpu.iota {dimensions = array<i32: 0>} : vector<12x26x8xi32>
    %20 = vector.broadcast %1 : i32 to vector<12x26x8xi32>
    %21 = arith.addi %19, %20 : vector<12x26x8xi32>
    %22 = tpu.iota {dimensions = array<i32: 1>} : vector<12x26x8xi32>
    %c2_i32 = arith.constant 2 : i32
    %23 = vector.broadcast %c2_i32 : i32 to vector<12x26x8xi32>
    %24 = arith.cmpi sge, %21, %23 : vector<12x26x8xi32>
    %c18_i32 = arith.constant 18 : i32
    %25 = vector.broadcast %c18_i32 : i32 to vector<12x26x8xi32>
    %26 = arith.cmpi slt, %21, %25 : vector<12x26x8xi32>
    %27 = arith.andi %24, %26 : vector<12x26x8xi1>
    %c2_i32_18 = arith.constant 2 : i32
    %28 = vector.broadcast %c2_i32_18 : i32 to vector<12x26x8xi32>
    %29 = arith.cmpi sge, %22, %28 : vector<12x26x8xi32>
    %30 = arith.andi %27, %29 : vector<12x26x8xi1>
    %c18_i32_19 = arith.constant 18 : i32
    %31 = vector.broadcast %c18_i32_19 : i32 to vector<12x26x8xi32>
    %32 = arith.cmpi slt, %22, %31 : vector<12x26x8xi32>
    %33 = arith.andi %30, %32 : vector<12x26x8xi1>
    %cst_20 = arith.constant 0.000000e+00 : f32
    %34 = vector.broadcast %cst_20 : f32 to vector<12x26x8xf32>
    %35 = arith.select %33, %18, %34 : vector<12x26x8xi1>, vector<12x26x8xf32>
    %36 = arith.truncf %35 : vector<12x26x8xf32> to vector<12x26x8xbf16>
    %37 = vector.extract_strided_slice %36 {offsets = [0, 0, 0], sizes = [10, 24, 8], strides = [1, 1, 1]} : vector<12x26x8xbf16> to vector<10x24x8xbf16>
    %38 = vector.shape_cast %37 : vector<10x24x8xbf16> to vector<240x8xbf16>
    %39 = vector.extract_strided_slice %5 {offsets = [0, 0, 0, 0], sizes = [1, 1, 8, 16], strides = [1, 1, 1, 1]} : vector<3x3x8x16xbf16> to vector<1x1x8x16xbf16>
    %40 = vector.shape_cast %39 : vector<1x1x8x16xbf16> to vector<8x16xbf16>
    %cst_21 = arith.constant dense<0.000000e+00> : vector<240x16xf32>
    %41 = tpu.matmul %38, %40, %cst_21 {dimension_numbers = #tpu.dot_dimension_numbers<[1], [0], [0], [1], [0, 0, 1, 1], [], []>} : vector<240x8xbf16>, vector<8x16xbf16>, vector<240x16xf32> -> vector<240x16xf32>
    %42 = vector.extract_strided_slice %36 {offsets = [0, 1, 0], sizes = [10, 24, 8], strides = [1, 1, 1]} : vector<12x26x8xbf16> to vector<10x24x8xbf16>
    %43 = vector.shape_cast %42 : vector<10x24x8xbf16> to vector<240x8xbf16>
    %44 = vector.extract_strided_slice %5 {offsets = [0, 1, 0, 0], sizes = [1, 1, 8, 16], strides = [1, 1, 1, 1]} : vector<3x3x8x16xbf16> to vector<1x1x8x16xbf16>
    %45 = vector.shape_cast %44 : vector<1x1x8x16xbf16> to vector<8x16xbf16>
    %cst_22 = arith.constant dense<0.000000e+00> : vector<240x16xf32>
    %46 = tpu.matmul %43, %45, %cst_22 {dimension_numbers = #tpu.dot_dimension_numbers<[1], [0], [0], [1], [0, 0, 1, 1], [], []>} : vector<240x8xbf16>, vector<8x16xbf16>, vector<240x16xf32> -> vector<240x16xf32>
    %47 = arith.addf %41, %46 : vector<240x16xf32>
    %48 = vector.extract_strided_slice %36 {offsets = [0, 2, 0], sizes = [10, 24, 8], strides = [1, 1, 1]} : vector<12x26x8xbf16> to vector<10x24x8xbf16>
    %49 = vector.shape_cast %48 : vector<10x24x8xbf16> to vector<240x8xbf16>
    %50 = vector.extract_strided_slice %5 {offsets = [0, 2, 0, 0], sizes = [1, 1, 8, 16], strides = [1, 1, 1, 1]} : vector<3x3x8x16xbf16> to vector<1x1x8x16xbf16>
    %51 = vector.shape_cast %50 : vector<1x1x8x16xbf16> to vector<8x16xbf16>
    %cst_23 = arith.constant dense<0.000000e+00> : vector<240x16xf32>
    %52 = tpu.matmul %49, %51, %cst_23 {dimension_numbers = #tpu.dot_dimension_numbers<[1], [0], [0], [1], [0, 0, 1, 1], [], []>} : vector<240x8xbf16>, vector<8x16xbf16>, vector<240x16xf32> -> vector<240x16xf32>
    %53 = arith.addf %47, %52 : vector<240x16xf32>
    %54 = vector.extract_strided_slice %36 {offsets = [1, 0, 0], sizes = [10, 24, 8], strides = [1, 1, 1]} : vector<12x26x8xbf16> to vector<10x24x8xbf16>
    %55 = vector.shape_cast %54 : vector<10x24x8xbf16> to vector<240x8xbf16>
    %56 = vector.extract_strided_slice %5 {offsets = [1, 0, 0, 0], sizes = [1, 1, 8, 16], strides = [1, 1, 1, 1]} : vector<3x3x8x16xbf16> to vector<1x1x8x16xbf16>
    %57 = vector.shape_cast %56 : vector<1x1x8x16xbf16> to vector<8x16xbf16>
    %cst_24 = arith.constant dense<0.000000e+00> : vector<240x16xf32>
    %58 = tpu.matmul %55, %57, %cst_24 {dimension_numbers = #tpu.dot_dimension_numbers<[1], [0], [0], [1], [0, 0, 1, 1], [], []>} : vector<240x8xbf16>, vector<8x16xbf16>, vector<240x16xf32> -> vector<240x16xf32>
    %59 = arith.addf %53, %58 : vector<240x16xf32>
    %60 = vector.extract_strided_slice %36 {offsets = [1, 1, 0], sizes = [10, 24, 8], strides = [1, 1, 1]} : vector<12x26x8xbf16> to vector<10x24x8xbf16>
    %61 = vector.shape_cast %60 : vector<10x24x8xbf16> to vector<240x8xbf16>
    %62 = vector.extract_strided_slice %5 {offsets = [1, 1, 0, 0], sizes = [1, 1, 8, 16], strides = [1, 1, 1, 1]} : vector<3x3x8x16xbf16> to vector<1x1x8x16xbf16>
    %63 = vector.shape_cast %62 : vector<1x1x8x16xbf16> to vector<8x16xbf16>
    %cst_25 = arith.constant dense<0.000000e+00> : vector<240x16xf32>
    %64 = tpu.matmul %61, %63, %cst_25 {dimension_numbers = #tpu.dot_dimension_numbers<[1], [0], [0], [1], [0, 0, 1, 1], [], []>} : vector<240x8xbf16>, vector<8x16xbf16>, vector<240x16xf32> -> vector<240x16xf32>
    %65 = arith.addf %59, %64 : vector<240x16xf32>
    %66 = vector.extract_strided_slice %36 {offsets = [1, 2, 0], sizes = [10, 24, 8], strides = [1, 1, 1]} : vector<12x26x8xbf16> to vector<10x24x8xbf16>
    %67 = vector.shape_cast %66 : vector<10x24x8xbf16> to vector<240x8xbf16>
    %68 = vector.extract_strided_slice %5 {offsets = [1, 2, 0, 0], sizes = [1, 1, 8, 16], strides = [1, 1, 1, 1]} : vector<3x3x8x16xbf16> to vector<1x1x8x16xbf16>
    %69 = vector.shape_cast %68 : vector<1x1x8x16xbf16> to vector<8x16xbf16>
    %cst_26 = arith.constant dense<0.000000e+00> : vector<240x16xf32>
    %70 = tpu.matmul %67, %69, %cst_26 {dimension_numbers = #tpu.dot_dimension_numbers<[1], [0], [0], [1], [0, 0, 1, 1], [], []>} : vector<240x8xbf16>, vector<8x16xbf16>, vector<240x16xf32> -> vector<240x16xf32>
    %71 = arith.addf %65, %70 : vector<240x16xf32>
    %72 = vector.extract_strided_slice %36 {offsets = [2, 0, 0], sizes = [10, 24, 8], strides = [1, 1, 1]} : vector<12x26x8xbf16> to vector<10x24x8xbf16>
    %73 = vector.shape_cast %72 : vector<10x24x8xbf16> to vector<240x8xbf16>
    %74 = vector.extract_strided_slice %5 {offsets = [2, 0, 0, 0], sizes = [1, 1, 8, 16], strides = [1, 1, 1, 1]} : vector<3x3x8x16xbf16> to vector<1x1x8x16xbf16>
    %75 = vector.shape_cast %74 : vector<1x1x8x16xbf16> to vector<8x16xbf16>
    %cst_27 = arith.constant dense<0.000000e+00> : vector<240x16xf32>
    %76 = tpu.matmul %73, %75, %cst_27 {dimension_numbers = #tpu.dot_dimension_numbers<[1], [0], [0], [1], [0, 0, 1, 1], [], []>} : vector<240x8xbf16>, vector<8x16xbf16>, vector<240x16xf32> -> vector<240x16xf32>
    %77 = arith.addf %71, %76 : vector<240x16xf32>
    %78 = vector.extract_strided_slice %36 {offsets = [2, 1, 0], sizes = [10, 24, 8], strides = [1, 1, 1]} : vector<12x26x8xbf16> to vector<10x24x8xbf16>
    %79 = vector.shape_cast %78 : vector<10x24x8xbf16> to vector<240x8xbf16>
    %80 = vector.extract_strided_slice %5 {offsets = [2, 1, 0, 0], sizes = [1, 1, 8, 16], strides = [1, 1, 1, 1]} : vector<3x3x8x16xbf16> to vector<1x1x8x16xbf16>
    %81 = vector.shape_cast %80 : vector<1x1x8x16xbf16> to vector<8x16xbf16>
    %cst_28 = arith.constant dense<0.000000e+00> : vector<240x16xf32>
    %82 = tpu.matmul %79, %81, %cst_28 {dimension_numbers = #tpu.dot_dimension_numbers<[1], [0], [0], [1], [0, 0, 1, 1], [], []>} : vector<240x8xbf16>, vector<8x16xbf16>, vector<240x16xf32> -> vector<240x16xf32>
    %83 = arith.addf %77, %82 : vector<240x16xf32>
    %84 = vector.extract_strided_slice %36 {offsets = [2, 2, 0], sizes = [10, 24, 8], strides = [1, 1, 1]} : vector<12x26x8xbf16> to vector<10x24x8xbf16>
    %85 = vector.shape_cast %84 : vector<10x24x8xbf16> to vector<240x8xbf16>
    %86 = vector.extract_strided_slice %5 {offsets = [2, 2, 0, 0], sizes = [1, 1, 8, 16], strides = [1, 1, 1, 1]} : vector<3x3x8x16xbf16> to vector<1x1x8x16xbf16>
    %87 = vector.shape_cast %86 : vector<1x1x8x16xbf16> to vector<8x16xbf16>
    %cst_29 = arith.constant dense<0.000000e+00> : vector<240x16xf32>
    %88 = tpu.matmul %85, %87, %cst_29 {dimension_numbers = #tpu.dot_dimension_numbers<[1], [0], [0], [1], [0, 0, 1, 1], [], []>} : vector<240x8xbf16>, vector<8x16xbf16>, vector<240x16xf32> -> vector<240x16xf32>
    %89 = arith.addf %83, %88 : vector<240x16xf32>
    %90 = vector.shape_cast %89 : vector<240x16xf32> to vector<10x24x16xf32>
    %c0_30 = arith.constant 0 : index
    %c0_31 = arith.constant 0 : index
    %91 = vector.load %arg8[%c0_30, %c0_31] : memref<1x16xf32, #tpu.memory_space<vmem>>, vector<1x16xf32>
    %92 = vector.shape_cast %91 : vector<1x16xf32> to vector<1x1x16xf32>
    %93 = vector.broadcast %92 : vector<1x1x16xf32> to vector<10x24x16xf32>
    %94 = arith.addf %90, %93 : vector<10x24x16xf32>
    %cst_32 = arith.constant 0.000000e+00 : f32
    %95 = vector.broadcast %cst_32 : f32 to vector<10x24x16xf32>
    %96 = arith.maximumf %94, %95 : vector<10x24x16xf32>
    %97 = tpu.iota {dimensions = array<i32: 0>} : vector<10x24x16xi32>
    %c1_i32_33 = arith.constant 1 : i32
    %98 = arith.subi %0, %c1_i32_33 : i32
    %99 = vector.broadcast %98 : i32 to vector<10x24x16xi32>
    %100 = arith.addi %97, %99 : vector<10x24x16xi32>
    %101 = tpu.iota {dimensions = array<i32: 1>} : vector<10x24x16xi32>
    %c1_i32_34 = arith.constant 1 : i32
    %102 = vector.broadcast %c1_i32_34 : i32 to vector<10x24x16xi32>
    %103 = arith.subi %101, %102 : vector<10x24x16xi32>
    %c0_i32 = arith.constant 0 : i32
    %104 = vector.broadcast %c0_i32 : i32 to vector<10x24x16xi32>
    %105 = arith.cmpi sge, %100, %104 : vector<10x24x16xi32>
    %c16_i32 = arith.constant 16 : i32
    %106 = vector.broadcast %c16_i32 : i32 to vector<10x24x16xi32>
    %107 = arith.cmpi slt, %100, %106 : vector<10x24x16xi32>
    %108 = arith.andi %105, %107 : vector<10x24x16xi1>
    %c0_i32_35 = arith.constant 0 : i32
    %109 = vector.broadcast %c0_i32_35 : i32 to vector<10x24x16xi32>
    %110 = arith.cmpi sge, %103, %109 : vector<10x24x16xi32>
    %111 = arith.andi %108, %110 : vector<10x24x16xi1>
    %c16_i32_36 = arith.constant 16 : i32
    %112 = vector.broadcast %c16_i32_36 : i32 to vector<10x24x16xi32>
    %113 = arith.cmpi slt, %103, %112 : vector<10x24x16xi32>
    %114 = arith.andi %111, %113 : vector<10x24x16xi1>
    %cst_37 = arith.constant 0.000000e+00 : f32
    %115 = vector.broadcast %cst_37 : f32 to vector<10x24x16xf32>
    %116 = arith.select %114, %96, %115 : vector<10x24x16xi1>, vector<10x24x16xf32>
    %117 = arith.truncf %116 : vector<10x24x16xf32> to vector<10x24x16xbf16>
    %118 = vector.extract_strided_slice %117 {offsets = [0, 0, 0], sizes = [8, 16, 16], strides = [1, 1, 1]} : vector<10x24x16xbf16> to vector<8x16x16xbf16>
    %119 = vector.shape_cast %118 : vector<8x16x16xbf16> to vector<128x16xbf16>
    %120 = vector.extract_strided_slice %7 {offsets = [0, 0, 0, 0], sizes = [1, 1, 16, 16], strides = [1, 1, 1, 1]} : vector<3x3x16x16xbf16> to vector<1x1x16x16xbf16>
    %121 = vector.shape_cast %120 : vector<1x1x16x16xbf16> to vector<16x16xbf16>
    %cst_38 = arith.constant dense<0.000000e+00> : vector<128x16xf32>
    %122 = tpu.matmul %119, %121, %cst_38 {dimension_numbers = #tpu.dot_dimension_numbers<[1], [0], [0], [1], [0, 0, 1, 1], [], []>} : vector<128x16xbf16>, vector<16x16xbf16>, vector<128x16xf32> -> vector<128x16xf32>
    %123 = vector.extract_strided_slice %117 {offsets = [0, 1, 0], sizes = [8, 16, 16], strides = [1, 1, 1]} : vector<10x24x16xbf16> to vector<8x16x16xbf16>
    %124 = vector.shape_cast %123 : vector<8x16x16xbf16> to vector<128x16xbf16>
    %125 = vector.extract_strided_slice %7 {offsets = [0, 1, 0, 0], sizes = [1, 1, 16, 16], strides = [1, 1, 1, 1]} : vector<3x3x16x16xbf16> to vector<1x1x16x16xbf16>
    %126 = vector.shape_cast %125 : vector<1x1x16x16xbf16> to vector<16x16xbf16>
    %cst_39 = arith.constant dense<0.000000e+00> : vector<128x16xf32>
    %127 = tpu.matmul %124, %126, %cst_39 {dimension_numbers = #tpu.dot_dimension_numbers<[1], [0], [0], [1], [0, 0, 1, 1], [], []>} : vector<128x16xbf16>, vector<16x16xbf16>, vector<128x16xf32> -> vector<128x16xf32>
    %128 = arith.addf %122, %127 : vector<128x16xf32>
    %129 = vector.extract_strided_slice %117 {offsets = [0, 2, 0], sizes = [8, 16, 16], strides = [1, 1, 1]} : vector<10x24x16xbf16> to vector<8x16x16xbf16>
    %130 = vector.shape_cast %129 : vector<8x16x16xbf16> to vector<128x16xbf16>
    %131 = vector.extract_strided_slice %7 {offsets = [0, 2, 0, 0], sizes = [1, 1, 16, 16], strides = [1, 1, 1, 1]} : vector<3x3x16x16xbf16> to vector<1x1x16x16xbf16>
    %132 = vector.shape_cast %131 : vector<1x1x16x16xbf16> to vector<16x16xbf16>
    %cst_40 = arith.constant dense<0.000000e+00> : vector<128x16xf32>
    %133 = tpu.matmul %130, %132, %cst_40 {dimension_numbers = #tpu.dot_dimension_numbers<[1], [0], [0], [1], [0, 0, 1, 1], [], []>} : vector<128x16xbf16>, vector<16x16xbf16>, vector<128x16xf32> -> vector<128x16xf32>
    %134 = arith.addf %128, %133 : vector<128x16xf32>
    %135 = vector.extract_strided_slice %117 {offsets = [1, 0, 0], sizes = [8, 16, 16], strides = [1, 1, 1]} : vector<10x24x16xbf16> to vector<8x16x16xbf16>
    %136 = vector.shape_cast %135 : vector<8x16x16xbf16> to vector<128x16xbf16>
    %137 = vector.extract_strided_slice %7 {offsets = [1, 0, 0, 0], sizes = [1, 1, 16, 16], strides = [1, 1, 1, 1]} : vector<3x3x16x16xbf16> to vector<1x1x16x16xbf16>
    %138 = vector.shape_cast %137 : vector<1x1x16x16xbf16> to vector<16x16xbf16>
    %cst_41 = arith.constant dense<0.000000e+00> : vector<128x16xf32>
    %139 = tpu.matmul %136, %138, %cst_41 {dimension_numbers = #tpu.dot_dimension_numbers<[1], [0], [0], [1], [0, 0, 1, 1], [], []>} : vector<128x16xbf16>, vector<16x16xbf16>, vector<128x16xf32> -> vector<128x16xf32>
    %140 = arith.addf %134, %139 : vector<128x16xf32>
    %141 = vector.extract_strided_slice %117 {offsets = [1, 1, 0], sizes = [8, 16, 16], strides = [1, 1, 1]} : vector<10x24x16xbf16> to vector<8x16x16xbf16>
    %142 = vector.shape_cast %141 : vector<8x16x16xbf16> to vector<128x16xbf16>
    %143 = vector.extract_strided_slice %7 {offsets = [1, 1, 0, 0], sizes = [1, 1, 16, 16], strides = [1, 1, 1, 1]} : vector<3x3x16x16xbf16> to vector<1x1x16x16xbf16>
    %144 = vector.shape_cast %143 : vector<1x1x16x16xbf16> to vector<16x16xbf16>
    %cst_42 = arith.constant dense<0.000000e+00> : vector<128x16xf32>
    %145 = tpu.matmul %142, %144, %cst_42 {dimension_numbers = #tpu.dot_dimension_numbers<[1], [0], [0], [1], [0, 0, 1, 1], [], []>} : vector<128x16xbf16>, vector<16x16xbf16>, vector<128x16xf32> -> vector<128x16xf32>
    %146 = arith.addf %140, %145 : vector<128x16xf32>
    %147 = vector.extract_strided_slice %117 {offsets = [1, 2, 0], sizes = [8, 16, 16], strides = [1, 1, 1]} : vector<10x24x16xbf16> to vector<8x16x16xbf16>
    %148 = vector.shape_cast %147 : vector<8x16x16xbf16> to vector<128x16xbf16>
    %149 = vector.extract_strided_slice %7 {offsets = [1, 2, 0, 0], sizes = [1, 1, 16, 16], strides = [1, 1, 1, 1]} : vector<3x3x16x16xbf16> to vector<1x1x16x16xbf16>
    %150 = vector.shape_cast %149 : vector<1x1x16x16xbf16> to vector<16x16xbf16>
    %cst_43 = arith.constant dense<0.000000e+00> : vector<128x16xf32>
    %151 = tpu.matmul %148, %150, %cst_43 {dimension_numbers = #tpu.dot_dimension_numbers<[1], [0], [0], [1], [0, 0, 1, 1], [], []>} : vector<128x16xbf16>, vector<16x16xbf16>, vector<128x16xf32> -> vector<128x16xf32>
    %152 = arith.addf %146, %151 : vector<128x16xf32>
    %153 = vector.extract_strided_slice %117 {offsets = [2, 0, 0], sizes = [8, 16, 16], strides = [1, 1, 1]} : vector<10x24x16xbf16> to vector<8x16x16xbf16>
    %154 = vector.shape_cast %153 : vector<8x16x16xbf16> to vector<128x16xbf16>
    %155 = vector.extract_strided_slice %7 {offsets = [2, 0, 0, 0], sizes = [1, 1, 16, 16], strides = [1, 1, 1, 1]} : vector<3x3x16x16xbf16> to vector<1x1x16x16xbf16>
    %156 = vector.shape_cast %155 : vector<1x1x16x16xbf16> to vector<16x16xbf16>
    %cst_44 = arith.constant dense<0.000000e+00> : vector<128x16xf32>
    %157 = tpu.matmul %154, %156, %cst_44 {dimension_numbers = #tpu.dot_dimension_numbers<[1], [0], [0], [1], [0, 0, 1, 1], [], []>} : vector<128x16xbf16>, vector<16x16xbf16>, vector<128x16xf32> -> vector<128x16xf32>
    %158 = arith.addf %152, %157 : vector<128x16xf32>
    %159 = vector.extract_strided_slice %117 {offsets = [2, 1, 0], sizes = [8, 16, 16], strides = [1, 1, 1]} : vector<10x24x16xbf16> to vector<8x16x16xbf16>
    %160 = vector.shape_cast %159 : vector<8x16x16xbf16> to vector<128x16xbf16>
    %161 = vector.extract_strided_slice %7 {offsets = [2, 1, 0, 0], sizes = [1, 1, 16, 16], strides = [1, 1, 1, 1]} : vector<3x3x16x16xbf16> to vector<1x1x16x16xbf16>
    %162 = vector.shape_cast %161 : vector<1x1x16x16xbf16> to vector<16x16xbf16>
    %cst_45 = arith.constant dense<0.000000e+00> : vector<128x16xf32>
    %163 = tpu.matmul %160, %162, %cst_45 {dimension_numbers = #tpu.dot_dimension_numbers<[1], [0], [0], [1], [0, 0, 1, 1], [], []>} : vector<128x16xbf16>, vector<16x16xbf16>, vector<128x16xf32> -> vector<128x16xf32>
    %164 = arith.addf %158, %163 : vector<128x16xf32>
    %165 = vector.extract_strided_slice %117 {offsets = [2, 2, 0], sizes = [8, 16, 16], strides = [1, 1, 1]} : vector<10x24x16xbf16> to vector<8x16x16xbf16>
    %166 = vector.shape_cast %165 : vector<8x16x16xbf16> to vector<128x16xbf16>
    %167 = vector.extract_strided_slice %7 {offsets = [2, 2, 0, 0], sizes = [1, 1, 16, 16], strides = [1, 1, 1, 1]} : vector<3x3x16x16xbf16> to vector<1x1x16x16xbf16>
    %168 = vector.shape_cast %167 : vector<1x1x16x16xbf16> to vector<16x16xbf16>
    %cst_46 = arith.constant dense<0.000000e+00> : vector<128x16xf32>
    %169 = tpu.matmul %166, %168, %cst_46 {dimension_numbers = #tpu.dot_dimension_numbers<[1], [0], [0], [1], [0, 0, 1, 1], [], []>} : vector<128x16xbf16>, vector<16x16xbf16>, vector<128x16xf32> -> vector<128x16xf32>
    %170 = arith.addf %164, %169 : vector<128x16xf32>
    %171 = vector.shape_cast %170 : vector<128x16xf32> to vector<8x16x16xf32>
    %172 = vector.extract_strided_slice %4 {offsets = [1, 1, 0], sizes = [8, 16, 8], strides = [1, 1, 1]} : vector<12x26x8xbf16> to vector<8x16x8xbf16>
    %173 = vector.shape_cast %172 : vector<8x16x8xbf16> to vector<128x8xbf16>
    %174 = vector.extract_strided_slice %6 {offsets = [0, 0, 0, 0], sizes = [1, 1, 8, 16], strides = [1, 1, 1, 1]} : vector<3x3x8x16xbf16> to vector<1x1x8x16xbf16>
    %175 = vector.shape_cast %174 : vector<1x1x8x16xbf16> to vector<8x16xbf16>
    %cst_47 = arith.constant dense<0.000000e+00> : vector<128x16xf32>
    %176 = tpu.matmul %173, %175, %cst_47 {dimension_numbers = #tpu.dot_dimension_numbers<[1], [0], [0], [1], [0, 0, 1, 1], [], []>} : vector<128x8xbf16>, vector<8x16xbf16>, vector<128x16xf32> -> vector<128x16xf32>
    %177 = vector.extract_strided_slice %4 {offsets = [1, 2, 0], sizes = [8, 16, 8], strides = [1, 1, 1]} : vector<12x26x8xbf16> to vector<8x16x8xbf16>
    %178 = vector.shape_cast %177 : vector<8x16x8xbf16> to vector<128x8xbf16>
    %179 = vector.extract_strided_slice %6 {offsets = [0, 1, 0, 0], sizes = [1, 1, 8, 16], strides = [1, 1, 1, 1]} : vector<3x3x8x16xbf16> to vector<1x1x8x16xbf16>
    %180 = vector.shape_cast %179 : vector<1x1x8x16xbf16> to vector<8x16xbf16>
    %cst_48 = arith.constant dense<0.000000e+00> : vector<128x16xf32>
    %181 = tpu.matmul %178, %180, %cst_48 {dimension_numbers = #tpu.dot_dimension_numbers<[1], [0], [0], [1], [0, 0, 1, 1], [], []>} : vector<128x8xbf16>, vector<8x16xbf16>, vector<128x16xf32> -> vector<128x16xf32>
    %182 = arith.addf %176, %181 : vector<128x16xf32>
    %183 = vector.extract_strided_slice %4 {offsets = [1, 3, 0], sizes = [8, 16, 8], strides = [1, 1, 1]} : vector<12x26x8xbf16> to vector<8x16x8xbf16>
    %184 = vector.shape_cast %183 : vector<8x16x8xbf16> to vector<128x8xbf16>
    %185 = vector.extract_strided_slice %6 {offsets = [0, 2, 0, 0], sizes = [1, 1, 8, 16], strides = [1, 1, 1, 1]} : vector<3x3x8x16xbf16> to vector<1x1x8x16xbf16>
    %186 = vector.shape_cast %185 : vector<1x1x8x16xbf16> to vector<8x16xbf16>
    %cst_49 = arith.constant dense<0.000000e+00> : vector<128x16xf32>
    %187 = tpu.matmul %184, %186, %cst_49 {dimension_numbers = #tpu.dot_dimension_numbers<[1], [0], [0], [1], [0, 0, 1, 1], [], []>} : vector<128x8xbf16>, vector<8x16xbf16>, vector<128x16xf32> -> vector<128x16xf32>
    %188 = arith.addf %182, %187 : vector<128x16xf32>
    %189 = vector.extract_strided_slice %4 {offsets = [2, 1, 0], sizes = [8, 16, 8], strides = [1, 1, 1]} : vector<12x26x8xbf16> to vector<8x16x8xbf16>
    %190 = vector.shape_cast %189 : vector<8x16x8xbf16> to vector<128x8xbf16>
    %191 = vector.extract_strided_slice %6 {offsets = [1, 0, 0, 0], sizes = [1, 1, 8, 16], strides = [1, 1, 1, 1]} : vector<3x3x8x16xbf16> to vector<1x1x8x16xbf16>
    %192 = vector.shape_cast %191 : vector<1x1x8x16xbf16> to vector<8x16xbf16>
    %cst_50 = arith.constant dense<0.000000e+00> : vector<128x16xf32>
    %193 = tpu.matmul %190, %192, %cst_50 {dimension_numbers = #tpu.dot_dimension_numbers<[1], [0], [0], [1], [0, 0, 1, 1], [], []>} : vector<128x8xbf16>, vector<8x16xbf16>, vector<128x16xf32> -> vector<128x16xf32>
    %194 = arith.addf %188, %193 : vector<128x16xf32>
    %195 = vector.extract_strided_slice %4 {offsets = [2, 2, 0], sizes = [8, 16, 8], strides = [1, 1, 1]} : vector<12x26x8xbf16> to vector<8x16x8xbf16>
    %196 = vector.shape_cast %195 : vector<8x16x8xbf16> to vector<128x8xbf16>
    %197 = vector.extract_strided_slice %6 {offsets = [1, 1, 0, 0], sizes = [1, 1, 8, 16], strides = [1, 1, 1, 1]} : vector<3x3x8x16xbf16> to vector<1x1x8x16xbf16>
    %198 = vector.shape_cast %197 : vector<1x1x8x16xbf16> to vector<8x16xbf16>
    %cst_51 = arith.constant dense<0.000000e+00> : vector<128x16xf32>
    %199 = tpu.matmul %196, %198, %cst_51 {dimension_numbers = #tpu.dot_dimension_numbers<[1], [0], [0], [1], [0, 0, 1, 1], [], []>} : vector<128x8xbf16>, vector<8x16xbf16>, vector<128x16xf32> -> vector<128x16xf32>
    %200 = arith.addf %194, %199 : vector<128x16xf32>
    %201 = vector.extract_strided_slice %4 {offsets = [2, 3, 0], sizes = [8, 16, 8], strides = [1, 1, 1]} : vector<12x26x8xbf16> to vector<8x16x8xbf16>
    %202 = vector.shape_cast %201 : vector<8x16x8xbf16> to vector<128x8xbf16>
    %203 = vector.extract_strided_slice %6 {offsets = [1, 2, 0, 0], sizes = [1, 1, 8, 16], strides = [1, 1, 1, 1]} : vector<3x3x8x16xbf16> to vector<1x1x8x16xbf16>
    %204 = vector.shape_cast %203 : vector<1x1x8x16xbf16> to vector<8x16xbf16>
    %cst_52 = arith.constant dense<0.000000e+00> : vector<128x16xf32>
    %205 = tpu.matmul %202, %204, %cst_52 {dimension_numbers = #tpu.dot_dimension_numbers<[1], [0], [0], [1], [0, 0, 1, 1], [], []>} : vector<128x8xbf16>, vector<8x16xbf16>, vector<128x16xf32> -> vector<128x16xf32>
    %206 = arith.addf %200, %205 : vector<128x16xf32>
    %207 = vector.extract_strided_slice %4 {offsets = [3, 1, 0], sizes = [8, 16, 8], strides = [1, 1, 1]} : vector<12x26x8xbf16> to vector<8x16x8xbf16>
    %208 = vector.shape_cast %207 : vector<8x16x8xbf16> to vector<128x8xbf16>
    %209 = vector.extract_strided_slice %6 {offsets = [2, 0, 0, 0], sizes = [1, 1, 8, 16], strides = [1, 1, 1, 1]} : vector<3x3x8x16xbf16> to vector<1x1x8x16xbf16>
    %210 = vector.shape_cast %209 : vector<1x1x8x16xbf16> to vector<8x16xbf16>
    %cst_53 = arith.constant dense<0.000000e+00> : vector<128x16xf32>
    %211 = tpu.matmul %208, %210, %cst_53 {dimension_numbers = #tpu.dot_dimension_numbers<[1], [0], [0], [1], [0, 0, 1, 1], [], []>} : vector<128x8xbf16>, vector<8x16xbf16>, vector<128x16xf32> -> vector<128x16xf32>
    %212 = arith.addf %206, %211 : vector<128x16xf32>
    %213 = vector.extract_strided_slice %4 {offsets = [3, 2, 0], sizes = [8, 16, 8], strides = [1, 1, 1]} : vector<12x26x8xbf16> to vector<8x16x8xbf16>
    %214 = vector.shape_cast %213 : vector<8x16x8xbf16> to vector<128x8xbf16>
    %215 = vector.extract_strided_slice %6 {offsets = [2, 1, 0, 0], sizes = [1, 1, 8, 16], strides = [1, 1, 1, 1]} : vector<3x3x8x16xbf16> to vector<1x1x8x16xbf16>
    %216 = vector.shape_cast %215 : vector<1x1x8x16xbf16> to vector<8x16xbf16>
    %cst_54 = arith.constant dense<0.000000e+00> : vector<128x16xf32>
    %217 = tpu.matmul %214, %216, %cst_54 {dimension_numbers = #tpu.dot_dimension_numbers<[1], [0], [0], [1], [0, 0, 1, 1], [], []>} : vector<128x8xbf16>, vector<8x16xbf16>, vector<128x16xf32> -> vector<128x16xf32>
    %218 = arith.addf %212, %217 : vector<128x16xf32>
    %219 = vector.extract_strided_slice %4 {offsets = [3, 3, 0], sizes = [8, 16, 8], strides = [1, 1, 1]} : vector<12x26x8xbf16> to vector<8x16x8xbf16>
    %220 = vector.shape_cast %219 : vector<8x16x8xbf16> to vector<128x8xbf16>
    %221 = vector.extract_strided_slice %6 {offsets = [2, 2, 0, 0], sizes = [1, 1, 8, 16], strides = [1, 1, 1, 1]} : vector<3x3x8x16xbf16> to vector<1x1x8x16xbf16>
    %222 = vector.shape_cast %221 : vector<1x1x8x16xbf16> to vector<8x16xbf16>
    %cst_55 = arith.constant dense<0.000000e+00> : vector<128x16xf32>
    %223 = tpu.matmul %220, %222, %cst_55 {dimension_numbers = #tpu.dot_dimension_numbers<[1], [0], [0], [1], [0, 0, 1, 1], [], []>} : vector<128x8xbf16>, vector<8x16xbf16>, vector<128x16xf32> -> vector<128x16xf32>
    %224 = arith.addf %218, %223 : vector<128x16xf32>
    %225 = vector.shape_cast %224 : vector<128x16xf32> to vector<8x16x16xf32>
    %c0_56 = arith.constant 0 : index
    %c0_57 = arith.constant 0 : index
    %226 = vector.load %arg10[%c0_56, %c0_57] : memref<1x16xf32, #tpu.memory_space<vmem>>, vector<1x16xf32>
    %227 = vector.shape_cast %226 : vector<1x16xf32> to vector<1x1x16xf32>
    %228 = vector.broadcast %227 : vector<1x1x16xf32> to vector<8x16x16xf32>
    %229 = arith.addf %171, %228 : vector<8x16x16xf32>
    %230 = arith.addf %229, %225 : vector<8x16x16xf32>
    %c0_58 = arith.constant 0 : index
    %c0_59 = arith.constant 0 : index
    %231 = vector.load %arg9[%c0_58, %c0_59] : memref<1x16xf32, #tpu.memory_space<vmem>>, vector<1x16xf32>
    %232 = vector.shape_cast %231 : vector<1x16xf32> to vector<1x1x16xf32>
    %233 = vector.broadcast %232 : vector<1x1x16xf32> to vector<8x16x16xf32>
    %234 = arith.addf %230, %233 : vector<8x16x16xf32>
    %235 = vector.shape_cast %234 : vector<8x16x16xf32> to vector<1x8x16x16xf32>
    %c0_60 = arith.constant 0 : index
    %c0_61 = arith.constant 0 : index
    %c0_62 = arith.constant 0 : index
    %c0_63 = arith.constant 0 : index
    %236 = vector.load %arg11[%c0_60, %c0_61, %c0_62, %c0_63] : memref<1x8x16x16xf32, #tpu.memory_space<vmem>>, vector<1x8x16x16xf32>
    tpu.vector_store %arg11[%c0_60, %c0_61, %c0_62, %c0_63], %235 {strides = array<i32>} : memref<1x8x16x16xf32, #tpu.memory_space<vmem>>, vector<1x8x16x16xf32>,
    return
  }
  func.func @transform_0(%arg0: i32, %arg1: i32) -> (i32, i32, i32, i32) {
    %c0_i32 = arith.constant 0 : i32
    %c0_i32_0 = arith.constant 0 : i32
    %c0_i32_1 = arith.constant 0 : i32
    %c0_i32_2 = arith.constant 0 : i32
    return %arg0, %c0_i32, %c0_i32_0, %c0_i32_1 : i32, i32, i32, i32
  }
  func.func @transform_1(%arg0: i32, %arg1: i32) -> (i32, i32, i32, i32) {
    %c0_i32 = arith.constant 0 : i32
    %c0_i32_0 = arith.constant 0 : i32
    %c0_i32_1 = arith.constant 0 : i32
    %c0_i32_2 = arith.constant 0 : i32
    %c0_i32_3 = arith.constant 0 : i32
    return %c0_i32, %c0_i32_0, %c0_i32_1, %c0_i32_2 : i32, i32, i32, i32
  }
  func.func @transform_2(%arg0: i32, %arg1: i32) -> (i32, i32, i32, i32) {
    %c0_i32 = arith.constant 0 : i32
    %c0_i32_0 = arith.constant 0 : i32
    %c0_i32_1 = arith.constant 0 : i32
    %c0_i32_2 = arith.constant 0 : i32
    %c0_i32_3 = arith.constant 0 : i32
    return %c0_i32, %c0_i32_0, %c0_i32_1, %c0_i32_2 : i32, i32, i32, i32
  }
  func.func @transform_3(%arg0: i32, %arg1: i32) -> (i32, i32, i32, i32) {
    %c0_i32 = arith.constant 0 : i32
    %c0_i32_0 = arith.constant 0 : i32
    %c0_i32_1 = arith.constant 0 : i32
    %c0_i32_2 = arith.constant 0 : i32
    %c0_i32_3 = arith.constant 0 : i32
    return %c0_i32, %c0_i32_0, %c0_i32_1, %c0_i32_2 : i32, i32, i32, i32
  }
  func.func @transform_4(%arg0: i32, %arg1: i32) -> (i32, i32) {
    %c0_i32 = arith.constant 0 : i32
    %c0_i32_0 = arith.constant 0 : i32
    %c0_i32_1 = arith.constant 0 : i32
    return %c0_i32, %c0_i32_0 : i32, i32
  }
  func.func @transform_5(%arg0: i32, %arg1: i32) -> (i32, i32) {
    %c0_i32 = arith.constant 0 : i32
    %c0_i32_0 = arith.constant 0 : i32
    %c0_i32_1 = arith.constant 0 : i32
    return %c0_i32, %c0_i32_0 : i32, i32
  }
  func.func @transform_6(%arg0: i32, %arg1: i32) -> (i32, i32) {
    %c0_i32 = arith.constant 0 : i32
    %c0_i32_0 = arith.constant 0 : i32
    %c0_i32_1 = arith.constant 0 : i32
    return %c0_i32, %c0_i32_0 : i32, i32
  }
  func.func @transform_7(%arg0: i32, %arg1: i32) -> (i32, i32) {
    %c0_i32 = arith.constant 0 : i32
    %c0_i32_0 = arith.constant 0 : i32
    %c0_i32_1 = arith.constant 0 : i32
    return %c0_i32, %c0_i32_0 : i32, i32
  }
  func.func @transform_8(%arg0: i32, %arg1: i32) -> (i32, i32) {
    %c0_i32 = arith.constant 0 : i32
    %c0_i32_0 = arith.constant 0 : i32
    %c0_i32_1 = arith.constant 0 : i32
    return %c0_i32, %c0_i32_0 : i32, i32
  }
  func.func @transform_9(%arg0: i32, %arg1: i32) -> (i32, i32, i32, i32) {
    %c0_i32 = arith.constant 0 : i32
    %c0_i32_0 = arith.constant 0 : i32
    %c0_i32_1 = arith.constant 0 : i32
    return %arg0, %arg1, %c0_i32, %c0_i32_0 : i32, i32, i32, i32
  }
}

</mosaic_0001>

<bundles_post_ra>
// kernel: residual_conv2d.1
= control target key start
LH: loop header
LB: loop body
LE: loop exit
PB: predicated region body
PF: predicated region fallthrough
CT: control target
= control target key end

     0   :  { %s9222_s30 = smov 0   ;;  %s9224_s10 = smov 0   ;;  %s13164_s0 = inlined_call_operand.vmem [shape: bf16[2,20,26,8], index: 0, kind: input, shape index: {}]   ;;  %s13165_s1 = inlined_call_operand.vmem [shape: bf16[3,3,8,16], index: 1, kind: input, shape index: {}]   ;;  %s13166_s2 = inlined_call_operand.vmem [shape: bf16[3,3,8,16], index: 2, kind: input, shape index: {}]   ;;  %s13167_s3 = inlined_call_operand.vmem [shape: bf16[3,3,16,16], index: 3, kind: input, shape index: {}]   ;;  %s13168_s4 = inlined_call_operand.vmem [shape: f32[1,8], index: 4, kind: input, shape index: {}]   ;;  %s13169_s5 = inlined_call_operand.vmem [shape: f32[1,8], index: 5, kind: input, shape index: {}]   ;;  %s13170_s6 = inlined_call_operand.vmem [shape: f32[1,16], index: 6, kind: input, shape index: {}]   ;;  %s13171_s7 = inlined_call_operand.vmem [shape: f32[1,16], index: 7, kind: input, shape index: {}]   ;;  %s13172_s8 = inlined_call_operand.vmem [shape: f32[1,16], index: 8, kind: input, shape index: {}]   ;;  %s13173_s9 = inlined_call_operand.vmem [shape: f32[2,16,16,16], index: 9, kind: output, shape index: {}]  }
   0x1   :  { %s9226_s11 = smov 0   ;;  %s9228_s12 = smov 0  }
   0x2   :  { %s9230_s13 = smov 0  }
   0x3 LB: > { %s28_s14 = sadd.s32 1, %s9158_s11  ;;  %s31_s15 = sadd.s32 1, %s9162_s12  ;;  %s9166_s13 = sphi %s9230_s13, %s19_s13   ;;  %s9162_s12 = sphi %s9228_s12, %s13790_s12   ;;  %s9158_s11 = sphi %s9226_s11, %s13789_s11   ;;  %s9154_s10 = sphi %s9224_s10, %s13788_s10   ;;  %s9150_s30 = sphi %s9222_s30, %s13787_s30  }
   0x4   : > { %p29_p0 = scmp.ge.s32.totalorder %s28_s14, 2  ;;  %p6998_p1 = scmp.ge.s32.totalorder %s9166_s13, 1 }
   0x5   : > { %p301_p2 = scmp.lt.s32.totalorder %s9166_s13, 5 }
   0x6   : > { %s13792_s14 = smov (%p29_p0, %s28_s14), 0  ;;  %s13794_s15 = smov (!%p29_p0, %s31_s15), %s9162_s12 }
   0x7   : > { %p302_p3 = pnand %p6998_p1, %p301_p2  ;;  %p33_p4 = scmp.ge.s32.totalorder %s13794_s15, 2 }
   0x9   : > { %s13796_s15 = smov (%p33_p4, %s13794_s15), 0  ;;  %305 = sbr.rel (%p302_p3) target bundleno = 1839 (0x72f), region = 56 }
  0x10   : > { %v412_v0 = vld [vmem:[%s13165_s1 + $0x4] sm:$0xf]  ;;  %vm1416_vm0 = vcmask 1043456   ;;  %p342_p5 = scmp.lt.s32.totalorder %s9154_s10, 1  ;;  %v665_v1 = vlaneseq  ;;  %v13176_v2 = vmov 0.0   ;;  %vm9169_vm1 = vmmov 0  }
  0x11   : > { %7859 = vmatprep.subr.bf16.mxu0 %v13176_v2  ;;  %v1418_v3 = vsel %vm1416_vm0, %v412_v0, 0  ;;  %7861 = vmatprep.mubr.msk.bf16.mxu0 %vm9169_vm1, %v13176_v2  ;;  %s9262_s18 = sshll.u32 %s9150_s30, 3  ;;  %s7484_s20 = sshll.u32 %s9150_s30, 7  ;;  %v411_v8 = vld [vmem:[%s13165_s1] sm:$0xf]  ;;  %v9170_v11 = vmov 0  }
  0x12   : > { %7860 = vmatpush3.bf16.msra.mxu0 %v1418_v3  ;;  %s13798_s10 = smov (!%p342_p5, %s9154_s10), 1  ;;  %v9267_v4 = vstv %s9262_s18  ;;  %v9269_v5 = vshrl.u32 %v665_v1, 7  ;;  %8741 = vmatprep.subr.bf16.mxu1 %v13176_v2  ;;  %v9292_v9 = vld [vmem:[%s13168_s4] ss:$0 sm:$0xff]  ;;  %v9296_v10 = vsel %vm1416_vm0, %v411_v8, 0  ;;  %v9301_v12 = vrot.slane %v9170_v11, 5 }
  0x13   : > { %7921 = vmatprep.subr.bf16.mxu0 %v13176_v2  ;;  %v654_v6 = vadd.s32 1, %v9267_v4  ;;  %8103 = vmatprep.mubr.msk.bf16.mxu1 %vm9169_vm1, %v13176_v2  ;;  %s9040_s19 = smul.u32 320, %s13798_s10  ;;  %vm670_vm2 = vcmp.ge.s32.totalorder %v9267_v4, 2  ;;  %vm682_vm3 = vcmp.lt.s32.totalorder %v9267_v4, 18  ;;  %v9304_v13 = vadd.s32 2, %v9267_v4  ;;  %s7282_s16 = sadd.s32 4294967295, %s9262_s18 }
  0x14   : > { %13351 = vst [vmem:[#allocation2_spill] sm:$0xff] %v9269_v5  ;;  %v9279_v7 = vadd.s32 16, %v9269_v5  ;;  %vm706_vm4 = vcmp.ge.s32.totalorder %v9269_v5, 2  ;;  %13353 = vst [vmem:[#allocation4_spill] sm:$0xff] %v9301_v12  ;;  %v9307_v14 = vadd.s32 3, %v9267_v4  ;;  %v9313_v18 = vadd.s32 4, %v9267_v4 }
  0x15   : > { %s346_s25 = scalar_lea.vmem %s13164_s0, %s9040_s19  ;;  %vm671_vm5 = vcmp.ge.s32.totalorder %v654_v6, 2  ;;  %vm683_vm6 = vcmp.lt.s32.totalorder %v654_v6, 18  ;;  %vm9319_vm8 = vmand %vm670_vm2, %vm682_vm3  ;;  %v9328_v26 = vld [vmem:[%s13169_s5] ss:$0 sm:$0xff]  ;;  %v9332_v30 = vadd.s32 5, %v9267_v4  ;;  %v9335_v31 = vadd.s32 6, %v9267_v4 }
  0x16   : > { %13352 = vst [vmem:[#allocation3_spill] sm:$0xff] %v9279_v7  ;;  %s9298_s28 = scalar_lea.vmem %s346_s25, %s7484_s20  ;;  %vm760_vm7 = vcmp.lt.s32.totalorder %v9279_v7, 18  ;;  %vm9343_vm9 = vmand %vm671_vm5, %vm683_vm6  ;;  %v9360_v43 = vadd.s32 7, %v9267_v4  ;;  %vm982_vm12 = vsmask.f32 3328  ;;  %vm672_vm15 = vcmp.ge.s32.totalorder %v9304_v13, 2 }
  0x17   : > { %v7545_v15 = vld [vmem:[%s9298_s28] sm:$0xff]   ;;  %v365_v16 = vld [vmem:[%s9298_s28 + $0x8] sm:$0xf]  ;;  %v367_v17 = vld [vmem:[%s9298_s28 + $0x10] sm:$0xf]  ;;  %vm684_vm2 = vcmp.lt.s32.totalorder %v9304_v13, 18 }
  0x18   : > { %v7546_v19 = vunpack.c.l.bf16 %v7545_v15  ;;  %v7547_v20 = vunpack.c.h.bf16 %v7545_v15  ;;  %v449_v21 = vunpack.c.l.bf16 %v365_v16  ;;  %v368_v23 = vld [vmem:[%s9298_s28 + $0x14] sm:$0xf]  ;;  %v451_v24 = vunpack.c.l.bf16 %v367_v17  ;;  %v369_v25 = vld [vmem:[%s9298_s28 + $0x18] sm:$0xf]  ;;  %v371_v29 = vld [vmem:[%s9298_s28 + $0x20] sm:$0xf] }
  0x19   : > { %v452_v27 = vunpack.c.l.bf16 %v368_v23  ;;  %v453_v28 = vunpack.c.l.bf16 %v369_v25  ;;  %v372_v37 = vld [vmem:[%s9298_s28 + $0x24] sm:$0xf]  ;;  %v373_v38 = vld [vmem:[%s9298_s28 + $0x28] sm:$0xf]  ;;  %vm9353_vm10 = vmand %vm9319_vm8, %vm706_vm4  ;;  %v455_v42 = vunpack.c.l.bf16 %v371_v29  ;;  %vm983_vm13 = vsmask.f32 7440 }
  0x1a   : > { %v502_v32 = vmul.f32 %v7546_v19, %v9292_v9  ;;  %v503_v33 = vmul.f32 %v7547_v20, %v9292_v9  ;;  %v504_v34 = vmul.f32 %v9292_v9, %v449_v21  ;;  %v506_v35 = vmul.f32 %v9292_v9, %v451_v24  ;;  %vm9369_vm11 = vmand %vm9319_vm8, %vm760_vm7  ;;  %p350_p6 = scmp.lt.s32.totalorder %s9262_s18, 15  ;;  %s7002_s26 = sshll.u32 %s13798_s10, 5 }
  0x1b   : > { %v507_v40 = vmul.f32 %v9292_v9, %v452_v27  ;;  %v508_v41 = vmul.f32 %v9292_v9, %v453_v28  ;;  %vm9379_vm14 = vmand %vm9343_vm9, %vm706_vm4  ;;  %v456_v52 = vunpack.c.l.bf16 %v372_v37  ;;  %v457_v53 = vunpack.c.l.bf16 %v373_v38 }
  0x1c   : > { %v557_v44 = vadd.f32 %v9328_v26, %v502_v32  ;;  %v558_v45 = vadd.f32 %v9328_v26, %v503_v33  ;;  %v559_v46 = vadd.f32 %v9328_v26, %v504_v34  ;;  %v561_v48 = vadd.f32 %v9328_v26, %v506_v35  ;;  %vm768_vm3 = vmand %vm9343_vm9, %vm760_vm7  ;;  %s13800_s18 = smov (!%p350_p6, %s9262_s18), 15 }
  0x1d   : > { %v562_v49 = vadd.f32 %v9328_v26, %v507_v40  ;;  %v563_v51 = vadd.f32 %v9328_v26, %v508_v41  ;;  %v510_v60 = vmul.f32 %v9292_v9, %v455_v42  ;;  %v511_v16 = vmul.f32 %v9292_v9, %v456_v52  ;;  %vm9451_vm6 = vmor %vm982_vm12, %vm983_vm13  ;;  %s7001_s25 = sshll.u32 %s13800_s18, 1 }
  0x1e   : > { %v605_v54 = vmax.f32 %v557_v44, 0.0  ;;  %v606_v55 = vmax.f32 %v558_v45, 0.0  ;;  %v607_v56 = vmax.f32 %v559_v46, 0.0  ;;  %v609_v57 = vmax.f32 %v561_v48, 0.0  ;;  %s354_s27 = sadd.s32 %s7002_s26, %s7001_s25 }
  0x1f   : > { %v610_v58 = vmax.f32 %v562_v49, 0.0  ;;  %v611_v59 = vmax.f32 %v563_v51, 0.0  ;;  %v512_v17 = vmul.f32 %v9292_v9, %v457_v53  ;;  %vm1370_vm5 = vcmask 64512   ;;  %v375_v53 = vld [vmem:[%s9298_s28 + $0x30] sm:$0xf] }
  0x20   : > { %v9389_v61 = vsel %vm9353_vm10, %v605_v54, 0.0  ;;  %v9393_v62 = vsel %vm9319_vm8, %v606_v55, 0.0  ;;  %v9397_v63 = vsel %vm9369_vm11, %v607_v56, 0.0  ;;  %v9401_v0 = vsel %vm9379_vm14, %v609_v57, 0.0  ;;  %vm9461_vm8 = vmand %vm672_vm15, %vm684_vm2 }
  0x21   : > { %v9405_v1 = vpack.c.bf16 %v9389_v61, %v9389_v61  ;;  %v9409_v3 = vpack.c.bf16 %v9393_v62, %v9393_v62  ;;  %v9413_v6 = vpack.c.bf16 %v9397_v63, %v9397_v63  ;;  %v9417_v8 = vsel %vm9343_vm9, %v610_v58, 0.0  ;;  %v376_v58 = vld [vmem:[%s9298_s28 + $0x34] sm:$0xf]  ;;  %vm9480_vm9 = vmand %vm9461_vm8, %vm706_vm4 }
  0x22   : > { %v9425_v11 = vpack.c.bf16 %v9401_v0, %v9401_v0  ;;  %v9429_v15 = vpack.c.bf16 %v9417_v8, %v9417_v8  ;;  %v9439_v25 = vsel %vm768_vm3, %v611_v59, 0.0  ;;  %v565_v27 = vadd.f32 %v9328_v26, %v510_v60  ;;  %vm9495_vm11 = vmand %vm9461_vm8, %vm760_vm7 }
  0x23   : > { %v986_v19 = vshrl.u32 %v9405_v1, 16  ;;  %v989_v20 = vshll.u32 %v9405_v1, 16  ;;  %v995_v21 = vshll.u32 %v9409_v3, 16  ;;  %v999_v22 = vshrl.u32 %v9409_v3, 16 }
  0x24   : > { %v1005_v23 = vshll.u32 %v9413_v6, 16  ;;  %v1009_v24 = vshrl.u32 %v9413_v6, 16  ;;  %v1020_v36 = vshrl.u32 %v9425_v11, 16  ;;  %v1023_v37 = vshll.u32 %v9425_v11, 16 }
  0x25   : > { %v988_v28 = vrot.slane %v986_v19, 4  ;;  %v991_v29 = vrot.slane %v989_v20, 5  ;;  %v997_v32 = vrot.slane %v995_v21, 5  ;;  %v1001_v33 = vrot.slane %v999_v22, 4 }
  0x26   : > { %v1007_v34 = vrot.slane %v1005_v23, 5  ;;  %v1011_v35 = vrot.slane %v1009_v24, 4  ;;  %v1029_v40 = vshll.u32 %v9429_v15, 16  ;;  %v9447_v41 = vpack.c.bf16 %v9439_v25, %v9439_v25 }
  0x27   : > { %v992_v38 = vor.u32 %v991_v29, %v988_v28  ;;  %v1002_v39 = vor.u32 %v1001_v33, %v997_v32  ;;  %v13364_v42 = vmov 0  ;;  %v1022_v45 = vrot.slane %v1020_v36, 4 }
  0x28   : > { %v13365_v42 = vsel %vm9451_vm6, 4294967295, %v13364_v42  ;;  %v1012_v44 = vor.u32 %v1011_v35, %v1007_v34  ;;  %v1025_v46 = vrot.slane %v1023_v37, 5  ;;  %v1033_v47 = vshrl.u32 %v9429_v15, 16 }
  0x29   : > { %13366 = vst [vmem:[#allocation5_spill] sm:$0xff] %v13365_v42  ;;  %v993_v48 = vrot.slane %v992_v38, 4  ;;  %v1003_v49 = vrot.slane %v1002_v39, 4  ;;  %v1031_v50 = vrot.slane %v1029_v40, 5  ;;  %v1039_v51 = vshll.u32 %v9447_v41, 16 }
  0x2a   : > { %v1013_v54 = vrot.slane %v1012_v44, 4  ;;  %v1026_v55 = vor.u32 %v1025_v46, %v1022_v45  ;;  %v1035_v56 = vrot.slane %v1033_v47, 4  ;;  %v1043_v57 = vshrl.u32 %v9447_v41, 16 }
  0x2b   : > { %v998_v59 = vsel %vm9451_vm6, %v993_v48, %v997_v32  ;;  %v1008_v60 = vsel %vm9451_vm6, %v1003_v49, %v1007_v34  ;;  %v1041_v19 = vrot.slane %v1039_v51, 5  ;;  %v566_v13 = vadd.f32 %v9328_v26, %v511_v16 }
  0x2c   : > { %v7049_v20 = vcombine.low %v998_v59, %v1008_v60  ;;  %v1018_v21 = vsel %vm9451_vm6, %v1013_v54, %v9301_v12  ;;  %v1027_v22 = vrot.slane %v1026_v55, 4  ;;  %v1036_v23 = vor.u32 %v1035_v56, %v1031_v50  ;;  %v377_v54 = vld [vmem:[%s9298_s28 + $0x38] sm:$0xf]  ;;  %v379_v59 = vld [vmem:[%s9298_s28 + $0x40] sm:$0xf] }
  0x2d   : > { %vm673_vm10 = vcmp.ge.s32.totalorder %v9307_v14, 2  ;;  %v1045_v28 = vrot.slane %v1043_v57, 4  ;;  %v567_v16 = vadd.f32 %v9328_v26, %v512_v17  ;;  %v613_v29 = vmax.f32 %v565_v27, 0.0 }
  0x2e   : > { %v614_v32 = vmax.f32 %v566_v13, 0.0  ;;  %7862 = vmatmul.mubr.msk.bf16.vlgmr.msra.gmra.mrb[0].mxu0 %vm1370_vm5, %v7049_v20  ;;  %v9489_v33 = vsel %vm9451_vm6, %v1027_v22, %v1031_v50  ;;  %v1037_v34 = vrot.slane %v1036_v23, 4  ;;  %v459_v36 = vunpack.c.l.bf16 %v375_v53 }
  0x2f   : > { %13371 = vst [vmem:[#allocation6_spill] sm:$0xff] %v9489_v33  ;;  %v460_v37 = vunpack.c.l.bf16 %v376_v58  ;;  %7922 = vmatpush3.bf16.msra.mxu0 %v9296_v10  ;;  %7865 = vmatprep.mubr.msk.bf16.mxu0 %vm9169_vm1, %v13176_v2  ;;  %v7050_v17 = vcombine.low %v1018_v21, %v9489_v33  ;;  %v1046_v27 = vor.u32 %v1045_v28, %v1041_v19  ;;  %v615_v38 = vmax.f32 %v567_v16, 0.0  ;;  %v380_v21 = vld [vmem:[%s9298_s28 + $0x44] sm:$0xf]  ;;  %v381_v16 = vld [vmem:[%s9298_s28 + $0x48] sm:$0xf] }
  0x30   : > { %v9505_v39 = vsel %vm9480_vm9, %v613_v29, 0.0  ;;  %v9509_v40 = vsel %vm9451_vm6, %v1037_v34, %v1041_v19  ;;  %v9513_v44 = vsel %vm9461_vm8, %v614_v32, 0.0  ;;  %v514_v45 = vmul.f32 %v9292_v9, %v459_v36  ;;  %7983 = vmatprep.subr.bf16.mxu0 %v13176_v2  ;;  %v387_v33 = vld [vmem:[%s9298_s28 + $0x60] sm:$0xf] }
  0x31   : > { %13374 = vst [vmem:[#allocation7_spill] sm:$0xff] %v9509_v40  ;;  %v9517_v10 = vpack.c.bf16 %v9505_v39, %v9505_v39  ;;  %v1047_v46 = vrot.slane %v1046_v27, 4  ;;  %v9525_v48 = vsel %vm9495_vm11, %v615_v38, 0.0  ;;  %v9529_v49 = vpack.c.bf16 %v9513_v44, %v9513_v44 }
  0x32   : > { %v9533_v50 = vpack.c.bf16 %v9525_v48, %v9525_v48  ;;  %v515_v53 = vmul.f32 %v9292_v9, %v460_v37  ;;  %v569_v58 = vadd.f32 %v9328_v26, %v514_v45  ;;  %vm685_vm12 = vcmp.lt.s32.totalorder %v9307_v14, 18 }
  0x33   : > { %13375 = vst [vmem:[#allocation8_spill] sm:$0xff] %v9517_v10  ;;  %13376 = vst [vmem:[#allocation9_spill] sm:$0xff] %v9529_v49  ;;  %v1054_v51 = vshrl.u32 %v9517_v10, 16  ;;  %v1057_v52 = vshll.u32 %v9517_v10, 16  ;;  %v9542_v55 = vsel %vm9451_vm6, %v1047_v46, %v9301_v12  ;;  %v1063_v56 = vshll.u32 %v9529_v49, 16 }
  0x34   : > { %13377 = vst [vmem:[#allocation10_spill] sm:$0xff] %v9533_v50  ;;  %13378 = vst [vmem:[#allocation11_spill] sm:$0xff] %v9542_v55  ;;  %v1067_v57 = vshrl.u32 %v9529_v49, 16  ;;  %v7051_v60 = vcombine.low %v9509_v40, %v9542_v55  ;;  %v1073_v20 = vshll.u32 %v9533_v50, 16  ;;  %v570_v24 = vadd.f32 %v9328_v26, %v515_v53  ;;  %v385_v55 = vld [vmem:[%s9298_s28 + $0x58] sm:$0xf] }
  0x35   : > { %v1056_v19 = vrot.slane %v1054_v51, 4  ;;  %v1059_v13 = vrot.slane %v1057_v52, 5  ;;  %v1065_v22 = vrot.slane %v1063_v56, 5  ;;  %v617_v28 = vmax.f32 %v569_v58, 0.0  ;;  %vm9561_vm13 = vmand %vm673_vm10, %vm685_vm12  ;;  %v397_v49 = vld [vmem:[%s9298_s28 + $0x88] sm:$0xf] }
  0x36   : > { %v1069_v23 = vrot.slane %v1067_v57, 4  ;;  %7866 = vmatmul.mubr.msk.bf16.gmra.mrb[4].mxu0 %vm1370_vm5, %v7050_v17  ;;  %v1075_v32 = vrot.slane %v1073_v20, 5  ;;  %v1077_v34 = vshrl.u32 %v9533_v50, 16  ;;  %v618_v36 = vmax.f32 %v570_v24, 0.0  ;;  %vm722_vm14 = vmand %vm9561_vm13, %vm706_vm4 }
  0x37   : > { %v1060_v29 = vor.u32 %v1059_v13, %v1056_v19  ;;  %7869 = vmatprep.mubr.msk.bf16.mxu0 %vm9169_vm1, %v13176_v2  ;;  %v461_v27 = vunpack.c.l.bf16 %v377_v54  ;;  %v463_v38 = vunpack.c.l.bf16 %v379_v59  ;;  %v464_v46 = vunpack.c.l.bf16 %v380_v21  ;;  %vm776_vm15 = vmand %vm9561_vm13, %vm760_vm7 }
  0x38   : > { %v1070_v35 = vor.u32 %v1069_v23, %v1065_v22  ;;  %v1079_v45 = vrot.slane %v1077_v34, 4  ;;  %v465_v51 = vunpack.c.l.bf16 %v381_v16  ;;  %v9569_v53 = vsel %vm722_vm14, %v617_v28, 0.0 }
  0x39   : > { %v1061_v17 = vrot.slane %v1060_v29, 4  ;;  %v9573_v14 = vsel %vm9561_vm13, %v618_v36, 0.0  ;;  %v516_v56 = vmul.f32 %v9292_v9, %v461_v27  ;;  %v9582_v57 = vpack.c.bf16 %v9569_v53, %v9569_v53 }
  0x3a   : > { %v1071_v52 = vrot.slane %v1070_v35, 4  ;;  %v9586_v58 = vpack.c.bf16 %v9573_v14, %v9573_v14  ;;  %v1080_v59 = vor.u32 %v1079_v45, %v1075_v32  ;;  %v518_v20 = vmul.f32 %v9292_v9, %v463_v38 }
  0x3b   : > { %v9578_v54 = vsel %vm9451_vm6, %v1061_v17, %v1065_v22  ;;  %13382 = vst [vmem:[#allocation13_spill] sm:$0xff] %v9582_v57  ;;  %v571_v13 = vadd.f32 %v9328_v26, %v516_v56  ;;  %v519_v21 = vmul.f32 %v9292_v9, %v464_v46  ;;  %v1088_v23 = vshrl.u32 %v9582_v57, 16 }
  0x3c   : > { %13381 = vst [vmem:[#allocation12_spill] sm:$0xff] %v9578_v54  ;;  %13383 = vst [vmem:[#allocation14_spill] sm:$0xff] %v9586_v58  ;;  %v9590_v19 = vsel %vm9451_vm6, %v1071_v52, %v1075_v32  ;;  %v1091_v24 = vshll.u32 %v9582_v57, 16  ;;  %v9606_v28 = vadd.s32 8, %v9267_v4  ;;  %v1097_v16 = vshll.u32 %v9586_v58, 16 }
  0x3d   : > { %13384 = vst [vmem:[#allocation15_spill] sm:$0xff] %v9590_v19  ;;  %v9597_v22 = vcombine.low %v9578_v54, %v9590_v19  ;;  %v619_v29 = vmax.f32 %v571_v13, 0.0  ;;  %v1101_v32 = vshrl.u32 %v9586_v58, 16  ;;  %v520_v34 = vmul.f32 %v9292_v9, %v465_v51  ;;  %v384_v13 = vld [vmem:[%s9298_s28 + $0x54] sm:$0xf] }
  0x3e   : > { %7870 = vmatmul.mubr.msk.bf16.gmra.mrb[8].mxu0 %vm1370_vm5, %v7051_v60  ;;  %v1081_v35 = vrot.slane %v1080_v59, 4  ;;  %v1090_v36 = vrot.slane %v1088_v23, 4  ;;  %v1093_v27 = vrot.slane %v1091_v24, 5  ;;  %v573_v37 = vadd.f32 %v9328_v26, %v518_v20  ;;  %v383_v59 = vld [vmem:[%s9298_s28 + $0x50] sm:$0xf] }
  0x3f   : > { %13385 = vst [vmem:[#allocation16_spill] sm:$0xff] %v9597_v22  ;;  %7873 = vmatprep.mubr.msk.bf16.mxu0 %vm9169_vm1, %v13176_v2  ;;  %v1099_v38 = vrot.slane %v1097_v16, 5  ;;  %v9615_v17 = vsel %vm776_vm15, %v619_v29, 0.0  ;;  %v1103_v45 = vrot.slane %v1101_v32, 4  ;;  %v574_v46 = vadd.f32 %v9328_v26, %v519_v21  ;;  %v396_v58 = vld [vmem:[%s9298_s28 + $0x84] sm:$0xf] }
  0x40   : > { %v1094_v52 = vor.u32 %v1093_v27, %v1090_v36  ;;  %v9620_v51 = vpack.c.bf16 %v9615_v17, %v9615_v17  ;;  %v575_v60 = vadd.f32 %v9328_v26, %v520_v34  ;;  %v621_v56 = vmax.f32 %v573_v37, 0.0 }
  0x41   : > { %v1104_v20 = vor.u32 %v1103_v45, %v1099_v38  ;;  %v622_v23 = vmax.f32 %v574_v46, 0.0  ;;  %vm674_vm2 = vcmp.ge.s32.totalorder %v9313_v18, 2  ;;  %vm686_vm3 = vcmp.lt.s32.totalorder %v9313_v18, 18 }
  0x42   : > { %13386 = vst [vmem:[#allocation17_spill] sm:$0xff] %v9620_v51  ;;  %v1095_v24 = vrot.slane %v1094_v52, 4  ;;  %v1107_v16 = vshll.u32 %v9620_v51, 16  ;;  %v1111_v21 = vshrl.u32 %v9620_v51, 16  ;;  %v623_v29 = vmax.f32 %v575_v60, 0.0  ;;  %vm698_vm8 = vmand %vm674_vm2, %vm686_vm3 }
  0x43   : > { %v9632_v32 = vsel %vm9451_vm6, %v1081_v35, %v9301_v12  ;;  %vm726_vm9 = vmand %vm698_vm8, %vm706_vm4  ;;  %v9636_v34 = vsel %vm698_vm8, %v622_v23, 0.0  ;;  %v467_v36 = vunpack.c.l.bf16 %v383_v59  ;;  %v468_v27 = vunpack.c.l.bf16 %v384_v13 }
  0x44   : > { %13387 = vst [vmem:[#allocation18_spill] sm:$0xff] %v9632_v32  ;;  %v9640_v18 = vsel %vm9451_vm6, %v1095_v24, %v1099_v38  ;;  %v1109_v37 = vrot.slane %v1107_v16, 5  ;;  %v1113_v45 = vrot.slane %v1111_v21, 4  ;;  %vm780_vm10 = vmand %vm698_vm8, %vm760_vm7  ;;  %v9644_v46 = vsel %vm726_vm9, %v621_v56, 0.0 }
  0x45   : > { %13388 = vst [vmem:[#allocation19_spill] sm:$0xff] %v9640_v18  ;;  %v1105_v35 = vrot.slane %v1104_v20, 4  ;;  %v9646_v52 = vsel %vm780_vm10, %v623_v29, 0.0  ;;  %v9650_v60 = vpack.c.bf16 %v9644_v46, %v9644_v46  ;;  %v9654_v59 = vpack.c.bf16 %v9636_v34, %v9636_v34 }
  0x46   : > { %7874 = vmatmul.mubr.msk.bf16.gmra.mrb[12].mxu0 %vm1370_vm5, %v9597_v22  ;;  %v9660_v38 = vcombine.low %v9632_v32, %v9640_v18  ;;  %v1114_v56 = vor.u32 %v1113_v45, %v1109_v37  ;;  %v9664_v13 = vpack.c.bf16 %v9646_v52, %v9646_v52  ;;  %v522_v20 = vmul.f32 %v9292_v9, %v467_v36  ;;  %v389_v22 = vld [vmem:[%s9298_s28 + $0x68] sm:$0xf] }
  0x47   : > { %13389 = vst [vmem:[#allocation20_spill] sm:$0xff] %v9650_v60  ;;  %13390 = vst [vmem:[#allocation21_spill] sm:$0xff] %v9654_v59  ;;  %7877 = vmatprep.mubr.msk.bf16.mxu0 %vm9169_vm1, %v13176_v2  ;;  %v1122_v23 = vshrl.u32 %v9650_v60, 16  ;;  %v1125_v24 = vshll.u32 %v9650_v60, 16  ;;  %v1131_v16 = vshll.u32 %v9654_v59, 16  ;;  %v1135_v21 = vshrl.u32 %v9654_v59, 16 }
  0x48   : > { %13391 = vst [vmem:[#allocation22_spill] sm:$0xff] %v9660_v38  ;;  %13392 = vst [vmem:[#allocation23_spill] sm:$0xff] %v9664_v13  ;;  %v1115_v29 = vrot.slane %v1114_v56, 4  ;;  %v1141_v45 = vshll.u32 %v9664_v13, 16  ;;  %v523_v47 = vmul.f32 %v9292_v9, %v468_v27  ;;  %v577_v36 = vadd.f32 %v9328_v26, %v522_v20  ;;  %v388_v20 = vld [vmem:[%s9298_s28 + $0x64] sm:$0xf] }
  0x49   : > { %v1124_v18 = vrot.slane %v1122_v23, 4  ;;  %v1127_v19 = vrot.slane %v1125_v24, 5  ;;  %v1133_v2 = vrot.slane %v1131_v16, 5  ;;  %v1137_v32 = vrot.slane %v1135_v21, 4 }
  0x4a   : > { %v9679_v54 = vsel %vm9451_vm6, %v1105_v35, %v1109_v37  ;;  %v9684_v56 = vsel %vm9451_vm6, %v1115_v29, %v9301_v12  ;;  %v1143_v40 = vrot.slane %v1141_v45, 5  ;;  %v578_v27 = vadd.f32 %v9328_v26, %v523_v47 }
  0x4b   : > { %13393 = vst [vmem:[#allocation24_spill] sm:$0xff] %v9679_v54  ;;  %13394 = vst [vmem:[#allocation25_spill] sm:$0xff] %v9684_v56  ;;  %v1128_v23 = vor.u32 %v1127_v19, %v1124_v18  ;;  %v1138_v24 = vor.u32 %v1137_v32, %v1133_v2  ;;  %v625_v16 = vmax.f32 %v577_v36, 0.0  ;;  %vm675_vm11 = vcmp.ge.s32.totalorder %v9332_v30, 2 }
  0x4c   : > { %v626_v21 = vmax.f32 %v578_v27, 0.0  ;;  %vm687_vm12 = vcmp.lt.s32.totalorder %v9332_v30, 18  ;;  %v1145_v37 = vshrl.u32 %v9664_v13, 16  ;;  %v469_v35 = vunpack.c.l.bf16 %v385_v55 }
  0x4d   : > { %v1129_v60 = vrot.slane %v1128_v23, 4  ;;  %v1139_v29 = vrot.slane %v1138_v24, 4  ;;  %vm9693_vm13 = vmand %vm675_vm11, %vm687_vm12  ;;  %v471_v47 = vunpack.c.l.bf16 %v387_v33  ;;  %v472_v59 = vunpack.c.l.bf16 %v388_v20 }
  0x4e   : > { %7878 = vmatmul.mubr.msk.bf16.gmra.mrb[16].mxu0 %vm1370_vm5, %v9660_v38  ;;  %v9701_v19 = vcombine.low %v9679_v54, %v9684_v56  ;;  %vm730_vm14 = vmand %vm9693_vm13, %vm706_vm4  ;;  %v9709_v30 = vsel %vm9693_vm13, %v626_v21, 0.0  ;;  %v1147_v55 = vrot.slane %v1145_v37, 4  ;;  %v524_v33 = vmul.f32 %v9292_v9, %v469_v35 }
  0x4f   : > { %v13398_v32 = vmov 0.0   ;;  %v9716_v18 = vsel %vm9451_vm6, %v1129_v60, %v1133_v2  ;;  %v9718_v36 = vsel %vm730_vm14, %v625_v16, 0.0  ;;  %v9722_v27 = vpack.c.bf16 %v9709_v30, %v9709_v30  ;;  %vm784_vm15 = vmand %vm9693_vm13, %vm760_vm7 }
  0x50   : > { %13397 = vst [vmem:[#allocation26_spill] sm:$0xff] %v9701_v19  ;;  %7881 = vmatprep.mubr.msk.bf16.mxu0 %vm9169_vm1, %v13398_v32  ;;  %13399 = vst [vmem:[#allocation27_spill] sm:$0xff] %v9716_v18  ;;  %v473_v20 = vunpack.c.l.bf16 %v389_v22  ;;  %v9726_v23 = vsel %vm9451_vm6, %v1139_v29, %v1143_v40  ;;  %v9730_v24 = vpack.c.bf16 %v9718_v36, %v9718_v36  ;;  %vm676_vm2 = vcmp.ge.s32.totalorder %v9335_v31, 2 }
  0x51   : > { %13400 = vst [vmem:[#allocation28_spill] sm:$0xff] %v9722_v27  ;;  %13401 = vst [vmem:[#allocation29_spill] sm:$0xff] %v9726_v23  ;;  %v1148_v21 = vor.u32 %v1147_v55, %v1143_v40  ;;  %v579_v37 = vadd.f32 %v9328_v26, %v524_v33  ;;  %v1165_v2 = vshll.u32 %v9722_v27, 16  ;;  %v1169_v22 = vshrl.u32 %v9722_v27, 16 }
  0x52   : > { %13402 = vst [vmem:[#allocation30_spill] sm:$0xff] %v9730_v24  ;;  %v526_v60 = vmul.f32 %v9292_v9, %v471_v47  ;;  %v527_v16 = vmul.f32 %v9292_v9, %v472_v59  ;;  %v1156_v29 = vshrl.u32 %v9730_v24, 16  ;;  %v1159_v40 = vshll.u32 %v9730_v24, 16 }
  0x53   : > { %v1149_v35 = vrot.slane %v1148_v21, 4  ;;  %v627_v55 = vmax.f32 %v579_v37, 0.0  ;;  %v1167_v33 = vrot.slane %v1165_v2, 5  ;;  %v1171_v56 = vrot.slane %v1169_v22, 4  ;;  %v391_v22 = vld [vmem:[%s9298_s28 + $0x70] sm:$0xf] }
  0x54   : > { %v528_v54 = vmul.f32 %v9292_v9, %v473_v20  ;;  %v581_v45 = vadd.f32 %v9328_v26, %v526_v60  ;;  %v1158_v59 = vrot.slane %v1156_v29, 4  ;;  %v1161_v21 = vrot.slane %v1159_v40, 5  ;;  %v392_v40 = vld [vmem:[%s9298_s28 + $0x74] sm:$0xf] }
  0x55   : > { %v9748_v47 = vsel %vm9451_vm6, %v1149_v35, %v9301_v12  ;;  %v9750_v38 = vsel %vm784_vm15, %v627_v55, 0.0  ;;  %v1172_v20 = vor.u32 %v1171_v56, %v1167_v33  ;;  %v582_v2 = vadd.f32 %v9328_v26, %v527_v16 }
  0x56   : > { %13403 = vst [vmem:[#allocation31_spill] sm:$0xff] %v9748_v47  ;;  %13404 = vst [vmem:[#allocation32_spill] sm:$0xff] %v9750_v38  ;;  %v9756_v37 = vpack.c.bf16 %v9750_v38, %v9750_v38  ;;  %7882 = vmatmul.mubr.msk.bf16.gmra.mrb[20].mxu0 %vm1370_vm5, %v9701_v19  ;;  %v1162_v60 = vor.u32 %v1161_v21, %v1158_v59  ;;  %v583_v35 = vadd.f32 %v9328_v26, %v528_v54 }
  0x57   : > { %v629_v29 = vmax.f32 %v581_v45, 0.0  ;;  %7885 = vmatprep.mubr.msk.bf16.mxu0 %vm9169_vm1, %v13398_v32  ;;  %v1173_v55 = vrot.slane %v1172_v20, 4  ;;  %v630_v16 = vmax.f32 %v582_v2, 0.0  ;;  %vm688_vm3 = vcmp.lt.s32.totalorder %v9335_v31, 18 }
  0x58   : > { %13405 = vst [vmem:[#allocation33_spill] sm:$0xff] %v9756_v37  ;;  %v1175_v27 = vshll.u32 %v9756_v37, 16  ;;  %v1179_v56 = vshrl.u32 %v9756_v37, 16  ;;  %v1163_v24 = vrot.slane %v1162_v60, 4  ;;  %v631_v13 = vmax.f32 %v583_v35, 0.0  ;;  %vm700_vm8 = vmand %vm676_vm2, %vm688_vm3 }
  0x59   : > { %v475_v59 = vunpack.c.l.bf16 %v391_v22  ;;  %v476_v45 = vunpack.c.l.bf16 %v392_v40  ;;  %vm677_vm9 = vcmp.ge.s32.totalorder %v9360_v43, 2  ;;  %v9773_v19 = vcombine.low %v9716_v18, %v9726_v23  ;;  %vm734_vm10 = vmand %vm700_vm8, %vm706_vm4  ;;  %v393_v18 = vld [vmem:[%s9298_s28 + $0x78] sm:$0xf] }
  0x5a   : > { %v1177_v21 = vrot.slane %v1175_v27, 5  ;;  %v1181_v54 = vrot.slane %v1179_v56, 4  ;;  %v9777_v20 = vsel %vm700_vm8, %v630_v16, 0.0  ;;  %vm689_vm11 = vcmp.lt.s32.totalorder %v9360_v43, 18  ;;  %vm788_vm12 = vmand %vm700_vm8, %vm760_vm7 }
  0x5b   : > { %13406 = vst [vmem:[#allocation34_spill] sm:$0xff] %v9773_v19  ;;  %v530_v2 = vmul.f32 %v9292_v9, %v475_v59  ;;  %v9783_v31 = vsel %vm9451_vm6, %v1163_v24, %v1167_v33  ;;  %v9791_v60 = vsel %vm734_vm10, %v629_v29, 0.0  ;;  %v9795_v40 = vsel %vm788_vm12, %v631_v13, 0.0  ;;  %vm9807_vm13 = vmand %vm677_vm9, %vm689_vm11  ;;  %v399_v33 = vld [vmem:[%s9298_s28 + $0x90] sm:$0xf] }
  0x5c   : > { %13407 = vst [vmem:[#allocation35_spill] sm:$0xff] %v9783_v31  ;;  %v9787_v27 = vsel %vm9451_vm6, %v1173_v55, %v1177_v21  ;;  %v1182_v22 = vor.u32 %v1181_v54, %v1177_v21  ;;  %13409 = vst [vmem:[#allocation37_spill] sm:$0xff] %v9791_v60  ;;  %v9799_v56 = vpack.c.bf16 %v9791_v60, %v9791_v60  ;;  %vm678_vm2 = vcmp.ge.s32.totalorder %v9606_v28, 2 }
  0x5d   : > { %13408 = vst [vmem:[#allocation36_spill] sm:$0xff] %v9787_v27  ;;  %13410 = vst [vmem:[#allocation38_spill] sm:$0xff] %v9795_v40  ;;  %v9803_v24 = vpack.c.bf16 %v9777_v20, %v9777_v20  ;;  %v9813_v13 = vpack.c.bf16 %v9795_v40, %v9795_v40  ;;  %v531_v55 = vmul.f32 %v9292_v9, %v476_v45  ;;  %vm690_vm3 = vcmp.lt.s32.totalorder %v9606_v28, 18 }
  0x5e   : > { %13411 = vst [vmem:[#allocation39_spill] sm:$0xff] %v9799_v56  ;;  %v1183_v29 = vrot.slane %v1182_v22, 4  ;;  %v585_v16 = vadd.f32 %v9328_v26, %v530_v2  ;;  %7886 = vmatmul.mubr.msk.bf16.gmra.mrb[24].mxu0 %vm1370_vm5, %v9773_v19  ;;  %v1190_v43 = vshrl.u32 %v9799_v56, 16  ;;  %v1193_v59 = vshll.u32 %v9799_v56, 16  ;;  %vm9827_vm14 = vmand %vm9807_vm13, %vm706_vm4  ;;  %v395_v19 = vld [vmem:[%s9298_s28 + $0x80] sm:$0xf] }
  0x5f   : > { %13412 = vst [vmem:[#allocation40_spill] sm:$0xff] %v9803_v24  ;;  %13415 = vst [vmem:[#allocation41_spill] sm:$0xff] %v9813_v13  ;;  %v1199_v21 = vshll.u32 %v9803_v24, 16  ;;  %v1203_v54 = vshrl.u32 %v9803_v24, 16  ;;  %7889 = vmatprep.mubr.msk.bf16.mxu0 %vm9169_vm1, %v13398_v32  ;;  %v9835_v2 = vcombine.low %v9748_v47, %v9783_v31  ;;  %v1209_v22 = vshll.u32 %v9813_v13, 16 }
  0x60   : > { %v586_v35 = vadd.f32 %v9328_v26, %v531_v55  ;;  %v633_v23 = vmax.f32 %v585_v16, 0.0  ;;  %v9844_v56 = vsel %vm9451_vm6, %v1183_v29, %v9301_v12  ;;  %v1192_v24 = vrot.slane %v1190_v43, 4  ;;  %vm792_vm15 = vmand %vm9807_vm13, %vm760_vm7 }
  0x61   : > { %13418 = vst [vmem:[#allocation42_spill] sm:$0xff] %v9835_v2  ;;  %13419 = vst [vmem:[#allocation43_spill] sm:$0xff] %v9844_v56  ;;  %v1195_v37 = vrot.slane %v1193_v59, 5  ;;  %v1201_v51 = vrot.slane %v1199_v21, 5  ;;  %v1205_v57 = vrot.slane %v1203_v54, 4  ;;  %v1211_v31 = vrot.slane %v1209_v22, 5 }
  0x62   : > { %v634_v47 = vmax.f32 %v586_v35, 0.0  ;;  %v9849_v50 = vsel %vm9827_vm14, %v633_v23, 0.0  ;;  %v1213_v10 = vshrl.u32 %v9813_v13, 16  ;;  %v477_v29 = vunpack.c.l.bf16 %v393_v18  ;;  %vm702_vm8 = vmand %vm678_vm2, %vm690_vm3 }
  0x63   : > { %v1196_v55 = vor.u32 %v1195_v37, %v1192_v24  ;;  %v9853_v16 = vpack.c.bf16 %v9849_v50, %v9849_v50  ;;  %v1206_v43 = vor.u32 %v1205_v57, %v1201_v51  ;;  %v479_v21 = vunpack.c.l.bf16 %v395_v19  ;;  %vm742_vm9 = vmand %vm702_vm8, %vm706_vm4 }
  0x64   : > { %v9859_v59 = vsel %vm9807_vm13, %v634_v47, 0.0  ;;  %v480_v35 = vunpack.c.l.bf16 %v396_v58  ;;  %v1215_v37 = vrot.slane %v1213_v10, 4  ;;  %v532_v18 = vmul.f32 %v9292_v9, %v477_v29  ;;  %vm796_vm10 = vmand %vm702_vm8, %vm760_vm7 }
  0x65   : > { %13420 = vst [vmem:[#allocation44_spill] sm:$0xff] %v9853_v16  ;;  %v1197_v54 = vrot.slane %v1196_v55, 4  ;;  %v9863_v23 = vpack.c.bf16 %v9859_v59, %v9859_v59  ;;  %v1224_v24 = vshrl.u32 %v9853_v16, 16  ;;  %v1207_v45 = vrot.slane %v1206_v43, 4 }
  0x66   : > { %v1227_v22 = vshll.u32 %v9853_v16, 16  ;;  %v481_v57 = vunpack.c.l.bf16 %v397_v49  ;;  %7890 = vmatmul.mubr.msk.bf16.gmra.mrb[28].mxu0 %vm1370_vm5, %v9835_v2  ;;  %v1216_v19 = vor.u32 %v1215_v37, %v1211_v31  ;;  %v9879_v10 = vcombine.low %v9787_v27, %v9844_v56 }
  0x67   : > { %13421 = vst [vmem:[#allocation45_spill] sm:$0xff] %v9863_v23  ;;  %v9872_v58 = vsel %vm9451_vm6, %v1197_v54, %v1201_v51  ;;  %v1226_v47 = vrot.slane %v1224_v24, 4  ;;  %v1233_v55 = vshll.u32 %v9863_v23, 16  ;;  %7893 = vmatprep.mubr.msk.bf16.mxu0 %vm9169_vm1, %v13398_v32  ;;  %v587_v43 = vadd.f32 %v9328_v26, %v532_v18 }
  0x68   : > { %13422 = vst [vmem:[#allocation46_spill] sm:$0xff] %v9872_v58  ;;  %13423 = vst [vmem:[#allocation47_spill] sm:$0xff] %v9879_v10  ;;  %v1229_v29 = vrot.slane %v1227_v22, 5  ;;  %v9886_v51 = vsel %vm9451_vm6, %v1207_v45, %v1211_v31  ;;  %v1217_v54 = vrot.slane %v1216_v19, 4  ;;  %v1237_v24 = vshrl.u32 %v9863_v23, 16 }
  0x69   : > { %13424 = vst [vmem:[#allocation48_spill] sm:$0xff] %v9886_v51  ;;  %v1235_v37 = vrot.slane %v1233_v55, 5  ;;  %v635_v2 = vmax.f32 %v587_v43, 0.0  ;;  %v534_v22 = vmul.f32 %v9292_v9, %v479_v21  ;;  %v535_v18 = vmul.f32 %v9292_v9, %v480_v35  ;;  %v401_v23 = vld [vmem:[%s9298_s28 + $0x98] sm:$0xf] }
  0x6a   : > { %v1230_v27 = vor.u32 %v1229_v29, %v1226_v47  ;;  %v9898_v31 = vsel %vm9451_vm6, %v1217_v54, %v9301_v12  ;;  %v1239_v45 = vrot.slane %v1237_v24, 4  ;;  %v536_v19 = vmul.f32 %v9292_v9, %v481_v57  ;;  %v400_v24 = vld [vmem:[%s9298_s28 + $0x94] sm:$0xf] }
  0x6b   : > { %13425 = vst [vmem:[#allocation49_spill] sm:$0xff] %v9898_v31  ;;  %v9905_v29 = vsel %vm792_vm15, %v635_v2, 0.0  ;;  %v589_v21 = vadd.f32 %v9328_v26, %v534_v22  ;;  %v590_v54 = vadd.f32 %v9328_v26, %v535_v18  ;;  %v483_v2 = vunpack.c.l.bf16 %v399_v33 }
  0x6c   : > { %v1231_v55 = vrot.slane %v1230_v27, 4  ;;  %13426 = vst [vmem:[#allocation50_spill] sm:$0xff] %v9905_v29  ;;  %v9910_v35 = vpack.c.bf16 %v9905_v29, %v9905_v29  ;;  %v1240_v43 = vor.u32 %v1239_v45, %v1235_v37  ;;  %v591_v57 = vadd.f32 %v9328_v26, %v536_v19 }
  0x6d   : > { %v9917_v27 = vcombine.low %v9872_v58, %v9886_v51  ;;  %v637_v49 = vmax.f32 %v589_v21, 0.0  ;;  %v638_v21 = vmax.f32 %v590_v54, 0.0  ;;  %v484_v47 = vunpack.c.l.bf16 %v400_v24 }
  0x6e   : > { %13427 = vst [vmem:[#allocation51_spill] sm:$0xff] %v9910_v35  ;;  %7894 = vmatmul.mubr.msk.bf16.gmra.mrb[32].mxu0 %vm1370_vm5, %v9879_v10  ;;  %v9924_v22 = vsel %vm9451_vm6, %v1231_v55, %v1235_v37  ;;  %v1241_v45 = vrot.slane %v1240_v43, 4  ;;  %v1243_v18 = vshll.u32 %v9910_v35, 16  ;;  %v1247_v19 = vshrl.u32 %v9910_v35, 16 }
  0x6f   : > { %13428 = vst [vmem:[#allocation52_spill] sm:$0xff] %v9917_v27  ;;  %13429 = vst [vmem:[#allocation53_spill] sm:$0xff] %v9924_v22  ;;  %7897 = vmatprep.mubr.msk.bf16.mxu0 %vm9169_vm1, %v13398_v32  ;;  %v639_v33 = vmax.f32 %v591_v57, 0.0  ;;  %v538_v37 = vmul.f32 %v9292_v9, %v483_v2  ;;  %v9937_v51 = vsel %vm742_vm9, %v637_v49, 0.0  ;;  %v662_v28 = vadd.s32 9, %v9267_v4 }
  0x70   : > { %v1245_v55 = vrot.slane %v1243_v18, 5  ;;  %v1249_v43 = vrot.slane %v1247_v19, 4  ;;  %13430 = vst [vmem:[#allocation54_spill] sm:$0xff] %v9937_v51  ;;  %v9940_v58 = vsel %vm702_vm8, %v638_v21, 0.0  ;;  %v9946_v54 = vpack.c.bf16 %v9937_v51, %v9937_v51 }
  0x71   : > { %13431 = vst [vmem:[#allocation55_spill] sm:$0xff] %v9940_v58  ;;  %v9942_v56 = vsel %vm796_vm10, %v639_v33, 0.0  ;;  %v539_v57 = vmul.f32 %v9292_v9, %v484_v47  ;;  %v9955_v49 = vpack.c.bf16 %v9940_v58, %v9940_v58  ;;  %v593_v33 = vadd.f32 %v9328_v26, %v538_v37 }
  0x72   : > { %13432 = vst [vmem:[#allocation56_spill] sm:$0xff] %v9942_v56  ;;  %13433 = vst [vmem:[#allocation57_spill] sm:$0xff] %v9946_v54  ;;  %v9951_v24 = vsel %vm9451_vm6, %v1241_v45, %v1245_v55  ;;  %v1250_v2 = vor.u32 %v1249_v43, %v1245_v55  ;;  %v9959_v18 = vpack.c.bf16 %v9942_v56, %v9942_v56  ;;  %v1258_v21 = vshrl.u32 %v9946_v54, 16 }
  0x73   : > { %13434 = vst [vmem:[#allocation58_spill] sm:$0xff] %v9951_v24  ;;  %v1261_v47 = vshll.u32 %v9946_v54, 16  ;;  %v1267_v45 = vshll.u32 %v9955_v49, 16  ;;  %v1271_v55 = vshrl.u32 %v9955_v49, 16  ;;  %v594_v35 = vadd.f32 %v9328_v26, %v539_v57 }
  0x74   : > { %v1260_v43 = vrot.slane %v1258_v21, 4  ;;  %v1251_v16 = vrot.slane %v1250_v2, 4  ;;  %v1277_v56 = vshll.u32 %v9959_v18, 16  ;;  %v641_v54 = vmax.f32 %v593_v33, 0.0 }
  0x75   : > { %v1263_v10 = vrot.slane %v1261_v47, 5  ;;  %v1269_v19 = vrot.slane %v1267_v45, 5  ;;  %v1273_v13 = vrot.slane %v1271_v55, 4  ;;  %v642_v58 = vmax.f32 %v594_v35, 0.0 }
  0x76   : > { %7898 = vmatmul.mubr.msk.bf16.gmra.mrb[36].mxu0 %vm1370_vm5, %v9917_v27  ;;  %vm679_vm11 = vcmp.ge.s32.totalorder %v662_v28, 2  ;;  %vm691_vm12 = vcmp.lt.s32.totalorder %v662_v28, 18  ;;  %v1281_v57 = vshrl.u32 %v9959_v18, 16  ;;  %v485_v47 = vunpack.c.l.bf16 %v401_v23 }
  0x77   : > { %7901 = vmatprep.mubr.msk.bf16.mxu0 %vm9169_vm1, %v13398_v32  ;;  %v1264_v37 = vor.u32 %v1263_v10, %v1260_v43  ;;  %v1274_v21 = vor.u32 %v1273_v13, %v1269_v19  ;;  %v9978_v27 = vcombine.low %v9898_v31, %v9924_v22  ;;  %vm9980_vm13 = vmand %vm679_vm11, %vm691_vm12  ;;  %v1279_v55 = vrot.slane %v1277_v56, 5  ;;  %v13488_v31 = vld [vmem:[#allocation14_spill] sm:$0xff] }
  0x78   : > { %vm746_vm14 = vmand %vm9980_vm13, %vm706_vm4  ;;  %v847_v13 = vsel %vm9980_vm13, %v642_v58, 0.0  ;;  %v1283_v10 = vrot.slane %v1281_v57, 4  ;;  %v540_v23 = vmul.f32 %v9292_v9, %v485_v47  ;;  %v9994_v35 = vsel %vm9451_vm6, %v1251_v16, %v9301_v12 }
  0x79   : > { %13435 = vst [vmem:[#allocation59_spill] sm:$0xff] %v9978_v27  ;;  %v1265_v2 = vrot.slane %v1264_v37, 4  ;;  %13438 = vst [vmem:[#allocation60_spill] sm:$0xff] %v9994_v35  ;;  %v1275_v56 = vrot.slane %v1274_v21, 4  ;;  %v10000_v33 = vsel %vm746_vm14, %v641_v54, 0.0  ;;  %v10008_v9 = vpack.c.bf16 %v847_v13, %v847_v13 }
  0x7a   : > { %v10006_v58 = vpack.c.bf16 %v10000_v33, %v10000_v33  ;;  %v1284_v37 = vor.u32 %v1283_v10, %v1279_v55  ;;  %v595_v16 = vadd.f32 %v9328_v26, %v540_v23  ;;  %vm800_vm15 = vmand %vm9980_vm13, %vm760_vm7  ;;  %v10037_v43 = vcombine.low %v9951_v24, %v9994_v35 }
  0x7b   : > { %v9998_v28 = vsel %vm9451_vm6, %v1265_v2, %v1269_v19  ;;  %v10023_v57 = vsel %vm9451_vm6, %v1275_v56, %v1279_v55  ;;  %v1301_v23 = vshll.u32 %v10008_v9, 16  ;;  %vm1789_vm2 = vcmask 1042432  }
  0x7c   : > { %13439 = vst [vmem:[#allocation61_spill] sm:$0xff] %v9998_v28  ;;  %v1285_v19 = vrot.slane %v1284_v37, 4  ;;  %v1292_v21 = vshrl.u32 %v10006_v58, 16  ;;  %v1295_v54 = vshll.u32 %v10006_v58, 16  ;;  %13440 = vst [vmem:[#allocation62_spill] sm:$0xff] %v10023_v57  ;;  %v643_v26 = vmax.f32 %v595_v16, 0.0 }
  0x7d   : > { %13443 = vst [vmem:[#allocation65_spill] sm:$0xff] %v10037_v43  ;;  %v1305_v16 = vshrl.u32 %v10008_v9, 16  ;;  %v10052_v24 = vcombine.low %v9998_v28, %v10023_v57  ;;  %vm1790_vm3 = vcmask 1046532   ;;  %v664_v28 = vadd.s32 11, %v9267_v4 }
  0x7e   : > { %7902 = vmatmul.mubr.msk.bf16.gmra.mrb[40].mxu0 %vm1370_vm5, %v9978_v27  ;;  %v10028_v47 = vsel %vm9451_vm6, %v1285_v19, %v9301_v12  ;;  %v1294_v2 = vrot.slane %v1292_v21, 4  ;;  %v1297_v10 = vrot.slane %v1295_v54, 5  ;;  %v10033_v37 = vsel %vm800_vm15, %v643_v26, 0.0  ;;  %vm10099_vm8 = vmor %vm1789_vm2, %vm1790_vm3 }
  0x7f   : > { %7905 = vmatprep.mubr.msk.bf16.mxu0 %vm9169_vm1, %v13398_v32  ;;  %13441 = vst [vmem:[#allocation63_spill] sm:$0xff] %v10028_v47  ;;  %13442 = vst [vmem:[#allocation64_spill] sm:$0xff] %v10033_v37  ;;  %v10041_v56 = vpack.c.bf16 %v10033_v37, %v10033_v37  ;;  %v1303_v19 = vrot.slane %v1301_v23, 5  ;;  %v1307_v21 = vrot.slane %v1305_v16, 4  ;;  %vm681_vm14 = vcmp.ge.s32.totalorder %v664_v28, 2 }
  0x80   : > { %v1298_v55 = vor.u32 %v1297_v10, %v1294_v2  ;;  %13444 = vst [vmem:[#allocation66_spill] sm:$0xff] %v10052_v24  ;;  %vm693_vm15 = vcmp.lt.s32.totalorder %v664_v28, 18 }
  0x81   : > { %v1311_v54 = vshll.u32 %v10041_v56, 16  ;;  %v1308_v45 = vor.u32 %v1307_v21, %v1303_v19  ;;  %v1315_v2 = vshrl.u32 %v10041_v56, 16  ;;  %v13225_v21 = vrot.slane %v9413_v6, 5  ;;  %vm10318_vm2 = vmand %vm681_vm14, %vm693_vm15 }
  0x82   : > { %v1299_v26 = vrot.slane %v1298_v55, 4  ;;  %vm754_vm3 = vmand %vm10318_vm2, %vm706_vm4 }
  0x83   : > { %v1309_v10 = vrot.slane %v1308_v45, 4  ;;  %v1313_v35 = vrot.slane %v1311_v54, 5  ;;  %v1317_v55 = vrot.slane %v1315_v2, 4  ;;  %v10066_v45 = vpack.c.bf16 %v9709_v30, %v9718_v36 }
  0x84   : > { %v10056_v23 = vsel %vm9451_vm6, %v1299_v26, %v1303_v19  ;;  %v10074_v54 = vpack.c.bf16 %v9859_v59, %v9849_v50  ;;  %v10081_v2 = vpack.c.bf16 %v847_v13, %v10000_v33  ;;  %v7099_v13 = vrot.slane %v9405_v1, 9 }
  0x85   : > { %13445 = vst [vmem:[#allocation67_spill] sm:$0xff] %v10056_v23  ;;  %v10060_v16 = vsel %vm9451_vm6, %v1309_v10, %v1313_v35  ;;  %13447 = vst [vmem:[#allocation69_spill] sm:$0xff] %v10066_v45  ;;  %v1318_v19 = vor.u32 %v1317_v55, %v1313_v35  ;;  %v10078_v26 = vcombine.low %v10028_v47, %v10056_v23  ;;  %v1794_v10 = vrot.slane %v9409_v3, 5 }
  0x86   : > { %7906 = vmatmul.mubr.msk.bf16.gmra.mrb[44].mxu0 %vm1370_vm5, %v10037_v43  ;;  %13446 = vst [vmem:[#allocation68_spill] sm:$0xff] %v10060_v16  ;;  %13448 = vst [vmem:[#allocation70_spill] sm:$0xff] %v10074_v54  ;;  %v13453_v55 = vmov 0  ;;  %v7525_v23 = vpack.c.bf16 %v9401_v0, %v9397_v63  ;;  %v1824_v43 = vrot.slane %v13488_v31, 5 }
  0x87   : > { %7909 = vmatprep.mubr.msk.bf16.mxu0 %vm9169_vm1, %v13398_v32  ;;  %13449 = vst [vmem:[#allocation71_spill] sm:$0xff] %v10078_v26  ;;  %13450 = vst [vmem:[#allocation72_spill] sm:$0xff] %v10081_v2  ;;  %v1319_v30 = vrot.slane %v1318_v19, 4  ;;  %v1796_v35 = vrot.slane %v1794_v10, 4  ;;  %v13454_v55 = vsel %vm10099_vm8, 4294967295, %v13453_v55  ;;  %v10105_v19 = vsel %vm10099_vm8, %v7099_v13, %v1794_v10 }
  0x88   : > { %13455 = vst [vmem:[#allocation75_spill] sm:$0xff] %v13454_v55  ;;  %v413_v13 = vld [vmem:[%s13165_s1 + $0x8] sm:$0xf]  ;;  %v1826_v27 = vrot.slane %v1824_v43, 4 }
  0x89   : > { %v10092_v59 = vsel %vm9451_vm6, %v1319_v30, %v9301_v12  ;;  %v10111_v30 = vsel %vm10099_vm8, %v1796_v35, %v13225_v21  ;;  %v858_v35 = vpack.c.bf16 %v9393_v62, %v9389_v61  ;;  %v1983_v1 = vsel %vm1416_vm0, %v413_v13, 0 }
  0x8a   : > { %13451 = vst [vmem:[#allocation73_spill] sm:$0xff] %v10092_v59  ;;  %v10097_v3 = vcombine.low %v10060_v16, %v10092_v59  ;;  %v414_v59 = vld [vmem:[%s13165_s1 + $0xc] sm:$0xf]  ;;  %v7100_v21 = vrot.slane %v9425_v11, 9  ;;  %v10143_v61 = vpack.c.bf16 %v9417_v8, %v9401_v0  ;;  %v861_v62 = vpack.c.bf16 %v13398_v32, %v9439_v25 }
  0x8b   : > { %v10123_v10 = vsel %vm1416_vm0, %v414_v59, 0  ;;  %v1804_v59 = vrot.slane %v9429_v15, 5  ;;  %v13481_v5 = vcombine.low %v10105_v19, %v10111_v30 }
  0x8c   : > { %13452 = vst [vmem:[#allocation74_spill] sm:$0xff] %v10097_v3  ;;  %8742 = vmatpush3.bf16.msra.mxu1 %v10123_v10  ;;  %v906_v63 = vunpack.c.h.b16 %v10143_v61  ;;  %v907_v0 = vunpack.c.l.b16 %v861_v62 }
  0x8d   : > { %8169 = vmatprep.subr.bf16.mxu1 %v13398_v32  ;;  %v1806_v16 = vrot.slane %v1804_v59, 4  ;;  %v10150_v15 = vsel %vm10099_vm8, %v7100_v21, %v1804_v59  ;;  %v10181_v21 = vpack.c.bf16 %v9573_v14, %v9569_v53  ;;  %v10206_v14 = vpack.c.bf16 %v9718_v36, %v9646_v52 }
  0x8e   : > { %7910 = vmatmul.mubr.msk.bf16.gmra.mrb[48].mxu0 %vm1370_vm5, %v10052_v24  ;;  %v1575_v13 = vpack.c.b16 %v907_v0, %v906_v63  ;;  %v869_v63 = vpack.c.bf16 %v13398_v32, %v9750_v38  ;;  %v10223_v36 = vpack.c.bf16 %v9777_v20, %v9791_v60  ;;  %v924_v20 = vunpack.c.h.b16 %v10074_v54  ;;  %v13500_v54 = vld [vmem:[#allocation28_spill] sm:$0xff] }
  0x8f   : > { %7913 = vmatprep.mubr.msk.bf16.mxu0 %vm9169_vm1, %v13398_v32  ;;  %13458 = vst [vmem:[#allocation78_spill] sm:$0xff] %v10206_v14 }
  0x90   : > { %v919_v0 = vunpack.c.l.b16 %v869_v63  ;;  %13460 = vst [vmem:[#allocation80_spill] sm:$0xff] %v10223_v36  ;;  %v404_v63 = vld [vmem:[%s9298_s28 + $0xa4] sm:$0xf] }
  0x91   : > { %v488_v8 = vunpack.c.l.bf16 %v404_v63 }
  0x96   : > { %7914 = vmatmul.mubr.msk.bf16.gmra.mrb[52].mxu0 %vm1370_vm5, %v10078_v26 }
  0x97   : > { %7917 = vmatprep.mubr.msk.bf16.mxu0 %vm9169_vm1, %v13398_v32 }
  0x9e   : > { %7918 = vmatmul.mubr.msk.bf16.gmra.mrb[56].mxu0 %vm1370_vm5, %v10097_v3  ;;  %v10309_v3 = vld [vmem:[%s9298_s28 + $0xb0] sm:$0xff]  }
  0x9f   : > { %7923 = vmatprep.mubr.msk.bf16.mxu0 %vm9169_vm1, %v13398_v32  ;;  %13473 = vst [vmem:[#allocation88_spill] sm:$0xff] %v10309_v3  ;;  %v7550_v22 = vunpack.c.l.bf16 %v10309_v3  ;;  %v13487_v3 = vld [vmem:[#allocation13_spill] sm:$0xff] }
  0xa0   : > { %v7102_v24 = vrot.slane %v13487_v3, 9 }
  0xa6   : > { %7924 = vmatmul.mubr.msk.bf16.vlgmr.msra.gmra.mrb[60].mxu0 %vm1370_vm5, %v858_v35  ;;  %v865_v35 = vpack.c.bf16 %v13398_v32, %v9615_v17 }
  0xa7   : > { %7984 = vmatpush3.bf16.msra.mxu0 %v1983_v1  ;;  %7927 = vmatprep.mubr.msk.bf16.mxu0 %vm9169_vm1, %v13398_v32  ;;  %v13228_v1 = vrot.slane %v9447_v41, 5 }
  0xa8   : > { %8045 = vmatprep.subr.bf16.mxu0 %v13398_v32  ;;  %v913_v59 = vunpack.c.l.b16 %v865_v35  ;;  %v10231_v35 = vpack.c.bf16 %v9849_v50, %v9795_v40  ;;  %v663_v50 = vadd.s32 10, %v9267_v4 }
  0xa9   : > { %v10156_v11 = vsel %vm10099_vm8, %v1806_v16, %v13228_v1  ;;  %v10169_v16 = vpack.c.bf16 %v9513_v44, %v9505_v39  ;;  %v912_v44 = vunpack.c.h.b16 %v10181_v21 }
  0xaa   : > { %13461 = vst [vmem:[#allocation81_spill] sm:$0xff] %v10231_v35  ;;  %vm680_vm9 = vcmp.ge.s32.totalorder %v663_v50, 2  ;;  %vm692_vm10 = vcmp.lt.s32.totalorder %v663_v50, 18 }
  0xab   : > { %v10190_v62 = vpack.c.b16 %v913_v59, %v912_v44  ;;  %v873_v44 = vpack.c.bf16 %v13398_v32, %v9905_v29  ;;  %v403_v59 = vld [vmem:[%s9298_s28 + $0xa0] sm:$0xf]  ;;  %vm10256_vm11 = vmand %vm680_vm9, %vm692_vm10 }
  0xac   : > { %vm750_vm12 = vmand %vm10256_vm11, %vm706_vm4 }
  0xad   : > { %13457 = vst [vmem:[#allocation77_spill] sm:$0xff] %v10190_v62  ;;  %vm804_vm13 = vmand %vm10256_vm11, %vm760_vm7 }
  0xae   : > { %7928 = vmatmul.mubr.msk.bf16.gmra.mrb[64].mxu0 %vm1370_vm5, %v7525_v23  ;;  %v10177_v23 = vpack.c.bf16 %v9569_v53, %v9525_v48  ;;  %v10198_v53 = vpack.c.bf16 %v9636_v34, %v9644_v46  ;;  %v918_v34 = vunpack.c.h.b16 %v10066_v45  ;;  %vm808_vm4 = vmand %vm10318_vm2, %vm760_vm7 }
  0xaf   : > { %7931 = vmatprep.mubr.msk.bf16.mxu0 %vm9169_vm1, %v13398_v32 }
  0xb0   : > { %13456 = vst [vmem:[#allocation76_spill] sm:$0xff] %v10177_v23 }
  0xb6   : > { %7932 = vmatmul.mubr.msk.bf16.gmra.mrb[68].mxu0 %vm1370_vm5, %v1575_v13  ;;  %v10215_v13 = vpack.c.b16 %v919_v0, %v918_v34  ;;  %v925_v34 = vunpack.c.l.b16 %v873_v44  ;;  %v487_v0 = vunpack.c.l.bf16 %v403_v59  ;;  %v9095_v44 = vld [vmem:[%s13169_s5] ss:$0 sm:$0xff] }
  0xb7   : > { %7935 = vmatprep.mubr.msk.bf16.mxu0 %vm9169_vm1, %v13398_v32 }
  0xb8   : > { %13459 = vst [vmem:[#allocation79_spill] sm:$0xff] %v10215_v13  ;;  %v10243_v1 = vpack.c.b16 %v925_v34, %v924_v20  ;;  %v405_v20 = vld [vmem:[%s9298_s28 + $0xa8] sm:$0xf] }
  0xba   : > { %13462 = vst [vmem:[#allocation82_spill] sm:$0xff] %v10243_v1 }
  0xbe   : > { %7936 = vmatmul.mubr.msk.bf16.gmra.mrb[72].mxu0 %vm1370_vm5, %v10169_v16 }
  0xbf   : > { %7939 = vmatprep.mubr.msk.bf16.mxu0 %vm9169_vm1, %v13398_v32 }
  0xc6   : > { %7940 = vmatmul.mubr.msk.bf16.gmra.mrb[76].mxu0 %vm1370_vm5, %v10177_v23 }
  0xc7   : > { %7943 = vmatprep.mubr.msk.bf16.mxu0 %vm9169_vm1, %v13398_v32 }
  0xce   : > { %7944 = vmatmul.mubr.msk.bf16.gmra.mrb[80].mxu0 %vm1370_vm5, %v10190_v62 }
  0xcf   : > { %7947 = vmatprep.mubr.msk.bf16.mxu0 %vm9169_vm1, %v13398_v32 }
  0xd6   : > { %7948 = vmatmul.mubr.msk.bf16.gmra.mrb[84].mxu0 %vm1370_vm5, %v10198_v53 }
  0xd7   : > { %7951 = vmatprep.mubr.msk.bf16.mxu0 %vm9169_vm1, %v13398_v32 }
  0xde   : > { %7952 = vmatmul.mubr.msk.bf16.gmra.mrb[88].mxu0 %vm1370_vm5, %v10206_v14 }
  0xdf   : > { %7955 = vmatprep.mubr.msk.bf16.mxu0 %vm9169_vm1, %v13398_v32 }
  0xe6   : > { %7956 = vmatmul.mubr.msk.bf16.gmra.mrb[92].mxu0 %vm1370_vm5, %v10215_v13  ;;  %v9094_v13 = vld [vmem:[%s13168_s4] ss:$0 sm:$0xff] }
  0xe7   : > { %7959 = vmatprep.mubr.msk.bf16.mxu0 %vm9169_vm1, %v13398_v32  ;;  %v542_v14 = vmul.f32 %v9094_v13, %v487_v0  ;;  %v543_v62 = vmul.f32 %v9094_v13, %v488_v8  ;;  %v489_v0 = vunpack.c.l.bf16 %v405_v20 }
  0xe9   : > { %v597_v59 = vadd.f32 %v9095_v44, %v542_v14  ;;  %v598_v63 = vadd.f32 %v9095_v44, %v543_v62  ;;  %v544_v62 = vmul.f32 %v9094_v13, %v489_v0  ;;  %v13470_v0 = vld [vmem:[#allocation56_spill] sm:$0xff] }
  0xeb   : > { %v645_v23 = vmax.f32 %v597_v59, 0.0  ;;  %v646_v12 = vmax.f32 %v598_v63, 0.0  ;;  %v599_v57 = vadd.f32 %v9095_v44, %v544_v62 }
  0xed   : > { %v10274_v20 = vsel %vm750_vm12, %v645_v23, 0.0  ;;  %v647_v59 = vmax.f32 %v599_v57, 0.0 }
  0xee   : > { %7960 = vmatmul.mubr.msk.bf16.gmra.mrb[96].mxu0 %vm1370_vm5, %v10223_v36  ;;  %13467 = vst [vmem:[#allocation83_spill] sm:$0xff] %v10274_v20  ;;  %v1844_v36 = vrot.slane %v13500_v54, 5 }
  0xef   : > { %7963 = vmatprep.mubr.msk.bf16.mxu0 %vm9169_vm1, %v13398_v32  ;;  %v10288_v63 = vsel %vm804_vm13, %v647_v59, 0.0 }
  0xf0   : > { %13469 = vst [vmem:[#allocation85_spill] sm:$0xff] %v10288_v63  ;;  %v879_v34 = vpack.c.bf16 %v13398_v32, %v10288_v63  ;;  %v1846_v40 = vrot.slane %v1844_v36, 4 }
  0xf6   : > { %7964 = vmatmul.mubr.msk.bf16.gmra.mrb[100].mxu0 %vm1370_vm5, %v10231_v35 }
  0xf7   : > { %7967 = vmatprep.mubr.msk.bf16.mxu0 %vm9169_vm1, %v13398_v32 }
  0xfe   : > { %7968 = vmatmul.mubr.msk.bf16.gmra.mrb[104].mxu0 %vm1370_vm5, %v10243_v1  ;;  %v13465_v1 = vld [vmem:[#allocation55_spill] sm:$0xff] }
  0xff   : > { %7971 = vmatprep.mubr.msk.bf16.mxu0 %vm9169_vm1, %v13398_v32  ;;  %v10264_v35 = vpack.c.bf16 %v13465_v1, %v9937_v51  ;;  %v10278_v1 = vsel %vm10256_vm11, %v646_v12, 0.0  ;;  %v877_v12 = vpack.c.bf16 %v13398_v32, %v10033_v37  ;;  %v13499_v51 = vld [vmem:[#allocation30_spill] sm:$0xff] }
 0x100   : > { %13468 = vst [vmem:[#allocation84_spill] sm:$0xff] %v10278_v1  ;;  %v10298_v57 = vpack.c.bf16 %v10278_v1, %v10274_v20  ;;  %v13494_v1 = vld [vmem:[#allocation20_spill] sm:$0xff]  ;;  %v7104_v29 = vrot.slane %v13499_v51, 9 }
 0x101   : > { %v10260_v8 = vpop.f32.mrb[0].mxu0  ;;  %13466 = vst [vmem:[#allocation55_spill] sm:$0xff] %v10264_v35  ;;  %v931_v42 = vunpack.c.l.b16 %v877_v12  ;;  %v7103_v20 = vrot.slane %v13494_v1, 9 }
 0x102   : > { %v7863_v50 = vpop.f32.mrb[1].mxu0  ;;  %13472 = vst [vmem:[#allocation87_spill] sm:$0xff] %v10298_v57  ;;  %v2171_v59 = vunpack.c.h.b16 %v10298_v57  ;;  %v13474_v57 = vmov 0 }
 0x103   : > { %v10266_v14 = vpop.f32.mrb[2].mxu0  ;;  %v10292_v50 = vpack.c.bf16 %v10000_v33, %v13470_v0  ;;  %v930_v33 = vunpack.c.h.b16 %v10081_v2  ;;  %v13475_v57 = vsel %vm10318_vm2, 4294967295, %v13474_v57 }
 0x104   : > { %v7864_v47 = vpop.f32.mrb[3].mxu0  ;;  %13476 = vst [vmem:[#allocation89_spill] sm:$0xff] %v13475_v57 }
 0x105   : > { %13471 = vst [vmem:[#allocation86_spill] sm:$0xff] %v10292_v50  ;;  %v10324_v12 = vpack.c.b16 %v931_v42, %v930_v33 }
 0x106   : > { %7972 = vmatmul.mubr.msk.bf16.gmra.mrb[108].mxu0 %vm1370_vm5, %v10264_v35 }
 0x107   : > { %7975 = vmatprep.mubr.msk.bf16.mxu0 %vm9169_vm1, %v13398_v32  ;;  %13477 = vst [vmem:[#allocation90_spill] sm:$0xff] %v10324_v12 }
 0x109   : > { %v10286_v47 = vpop.f32.mrb[4].mxu0 }
 0x10a   : > { %v7867_v23 = vpop.f32.mrb[5].mxu0 }
 0x10b   : > { %v10302_v62 = vpop.f32.mrb[6].mxu0  ;;  %v2172_v23 = vunpack.c.l.b16 %v879_v34  ;;  %v546_v34 = vmul.f32 %v9094_v13, %v7550_v22 }
 0x10c   : > { %v7868_v7 = vpop.f32.mrb[7].mxu0 }
 0x10d   : > { %v2187_v26 = vpack.c.b16 %v2172_v23, %v2171_v59  ;;  %v601_v23 = vadd.f32 %v9095_v44, %v546_v34  ;;  %v9171_v34 = vmov 0.0|0.0  }
 0x10e   : > { %7976 = vmatmul.mubr.msk.bf16.gmra.mrb[112].mxu0 %vm1370_vm5, %v10292_v50 }
 0x10f   : > { %7979 = vmatprep.mubr.msk.bf16.mxu0 %vm9169_vm1, %v13398_v32  ;;  %8104 = vmatmul.mubr.msk.bf16.vlgmr.msra.gmra.mrb[0].mxu1 %vm1370_vm5, %v2187_v26  ;;  %v649_v22 = vmax.f32 %v601_v23, 0.0 }
 0x110   : > { %8171 = vmatprep.mubr.msk.bf16.mxu1 %vm9169_vm1, %v13398_v32 }
 0x111   : > { %v10316_v7 = vpop.f32.mrb[8].mxu0  ;;  %v10336_v28 = vsel %vm754_vm3, %v649_v22, 0.0  ;;  %vm3847_vm3 = vsmask.f32 7424 }
 0x112   : > { %v7871_v4 = vpop.f32.mrb[9].mxu0  ;;  %13478 = vst [vmem:[#allocation91_spill] sm:$0xff] %v10336_v28 }
 0x113   : > { %v10326_v59 = vpop.f32.mrb[10].mxu0  ;;  %v10346_v4 = vrot.slane %v9171_v34, 5 }
 0x114   : > { %v7872_v50 = vpop.f32.mrb[11].mxu0 }
 0x115   : > { %v13479_v50 = vrot.slane %v9413_v6, 5  ;;  %13480 = vst [vmem:[#allocation92_spill] sm:$0xff] %v10346_v4 }
 0x116   : > { %7980 = vmatmul.mubr.msk.bf16.gmra.mrb[116].mxu0 %vm1370_vm5, %v10324_v12  ;;  %v13485_v12 = vld [vmem:[#allocation10_spill] sm:$0xff] }
 0x117   : > { %7985 = vmatprep.mubr.msk.bf16.mxu0 %vm9169_vm1, %v13398_v32  ;;  %v1799_v33 = vrot.slane %v13479_v50, 4  ;;  %v1817_v57 = vrot.slane %v13485_v12, 5 }
 0x119   : > { %v10340_v26 = vpop.f32.mrb[12].mxu0  ;;  %v1801_v22 = vsel %vm10099_vm8, %v1799_v33, %v10346_v4  ;;  %v13483_v33 = vld [vmem:[#allocation9_spill] sm:$0xff] }
 0x11a   : > { %v7875_v13 = vpop.f32.mrb[13].mxu0  ;;  %v7110_v50 = vcombine.low %v1801_v22, %v10150_v15 }
 0x11b   : > { %v10342_v44 = vpop.f32.mrb[14].mxu0 }
 0x11c   : > { %v7876_v23 = vpop.f32.mrb[15].mxu0 }
 0x11d   : > { %v1814_v23 = vrot.slane %v13483_v33, 5 }
 0x11e   : > { %7986 = vmatmul.mubr.msk.bf16.vlgmr.msra.gmra.mrb[120].mxu0 %vm1370_vm5, %v13481_v5  ;;  %v13482_v5 = vrot.slane %v9447_v41, 5 }
 0x11f   : > { %8046 = vmatpush3.bf16.msra.mxu0 %v10123_v10  ;;  %7989 = vmatprep.mubr.msk.bf16.mxu0 %vm9169_vm1, %v13398_v32  ;;  %v1816_v42 = vrot.slane %v1814_v23, 4 }
 0x120   : > { %8107 = vmatprep.subr.bf16.mxu0 %v13398_v32  ;;  %v1809_v19 = vrot.slane %v13482_v5, 4 }
 0x121   : > { %v10359_v6 = vpop.f32.mrb[16].mxu0  ;;  %v10392_v33 = vsel %vm10099_vm8, %v1816_v42, %v1817_v57 }
 0x122   : > { %v7879_v13 = vpop.f32.mrb[17].mxu0  ;;  %v10372_v10 = vsel %vm10099_vm8, %v1809_v19, %v10346_v4 }
 0x123   : > { %v10362_v34 = vpop.f32.mrb[18].mxu0  ;;  %v7111_v41 = vcombine.low %v10156_v11, %v10372_v10 }
 0x124   : > { %v7880_v30 = vpop.f32.mrb[19].mxu0 }
 0x125   : > { %v13484_v30 = vld [vmem:[#allocation8_spill] sm:$0xff] }
 0x126   : > { %7990 = vmatmul.mubr.msk.bf16.gmra.mrb[124].mxu0 %vm1370_vm5, %v7110_v50  ;;  %v7101_v50 = vrot.slane %v13484_v30, 9 }
 0x127   : > { %7993 = vmatprep.mubr.msk.bf16.mxu0 %vm9169_vm1, %v13398_v32 }
 0x128   : > { %v10388_v19 = vsel %vm10099_vm8, %v7101_v50, %v1814_v23  ;;  %v10415_v50 = vsel %vm10099_vm8, %v7102_v24, %v1824_v43 }
 0x129   : > { %v10375_v13 = vpop.f32.mrb[20].mxu0  ;;  %v10398_v12 = vcombine.low %v10388_v19, %v10392_v33 }
 0x12a   : > { %v7883_v22 = vpop.f32.mrb[21].mxu0 }
 0x12b   : > { %v10379_v5 = vpop.f32.mrb[22].mxu0  ;;  %13486 = vst [vmem:[#allocation9_spill] sm:$0xff] %v10398_v12 }
 0x12c   : > { %v7884_v28 = vpop.f32.mrb[23].mxu0 }
 0x12e   : > { %7994 = vmatmul.mubr.msk.bf16.gmra.mrb[128].mxu0 %vm1370_vm5, %v7111_v41  ;;  %v1819_v41 = vrot.slane %v1817_v57, 4  ;;  %v13489_v57 = vld [vmem:[#allocation17_spill] sm:$0xff] }
 0x12f   : > { %7997 = vmatprep.mubr.msk.bf16.mxu0 %vm9169_vm1, %v13398_v32  ;;  %v1827_v3 = vrot.slane %v13489_v57, 5  ;;  %v13491_v57 = vld [vmem:[#allocation21_spill] sm:$0xff] }
 0x130   : > { %v10411_v42 = vsel %vm10099_vm8, %v1819_v41, %v10346_v4 }
 0x131   : > { %v10394_v22 = vpop.f32.mrb[24].mxu0  ;;  %v1829_v37 = vrot.slane %v1827_v3, 4  ;;  %v10432_v24 = vsel %vm10099_vm8, %v1826_v27, %v1827_v3  ;;  %v13495_v3 = vld [vmem:[#allocation23_spill] sm:$0xff] }
 0x132   : > { %v7887_v30 = vpop.f32.mrb[25].mxu0  ;;  %v1837_v35 = vrot.slane %v13495_v3, 5 }
 0x133   : > { %v10400_v28 = vpop.f32.mrb[26].mxu0  ;;  %v10437_v41 = vsel %vm10099_vm8, %v1829_v37, %v10346_v4 }
 0x134   : > { %v7888_v23 = vpop.f32.mrb[27].mxu0 }
 0x135   : > { %v10422_v23 = vcombine.low %v10411_v42, %v10415_v50 }
 0x136   : > { %7998 = vmatmul.mubr.msk.bf16.gmra.mrb[132].mxu0 %vm1370_vm5, %v10398_v12 }
 0x137   : > { %8001 = vmatprep.mubr.msk.bf16.mxu0 %vm9169_vm1, %v13398_v32  ;;  %13490 = vst [vmem:[#allocation8_spill] sm:$0xff] %v10422_v23 }
 0x139   : > { %v10418_v30 = vpop.f32.mrb[28].mxu0 }
 0x13a   : > { %v7891_v31 = vpop.f32.mrb[29].mxu0 }
 0x13b   : > { %v10424_v12 = vpop.f32.mrb[30].mxu0  ;;  %v1834_v31 = vrot.slane %v13491_v57, 5 }
 0x13c   : > { %v7892_v2 = vpop.f32.mrb[31].mxu0 }
 0x13d   : > { %v1836_v27 = vrot.slane %v1834_v31, 4  ;;  %v10456_v37 = vsel %vm10099_vm8, %v7103_v20, %v1834_v31 }
 0x13e   : > { %8002 = vmatmul.mubr.msk.bf16.gmra.mrb[136].mxu0 %vm1370_vm5, %v10422_v23  ;;  %v10444_v23 = vcombine.low %v10432_v24, %v10437_v41 }
 0x13f   : > { %8005 = vmatprep.mubr.msk.bf16.mxu0 %vm9169_vm1, %v13398_v32  ;;  %v10460_v57 = vsel %vm10099_vm8, %v1836_v27, %v1837_v35  ;;  %v10483_v27 = vsel %vm10099_vm8, %v7104_v29, %v1844_v36 }
 0x140   : > { %13492 = vst [vmem:[#allocation10_spill] sm:$0xff] %v10444_v23 }
 0x141   : > { %v10440_v43 = vpop.f32.mrb[32].mxu0 }
 0x142   : > { %v7895_v2 = vpop.f32.mrb[33].mxu0 }
 0x143   : > { %v10446_v63 = vpop.f32.mrb[34].mxu0 }
 0x144   : > { %13493 = vst [vmem:[#allocation13_spill] sm:$0xff] %v10446_v63  ;;  %v7896_v0 = vpop.f32.mrb[35].mxu0 }
 0x145   : > { %v10466_v0 = vcombine.low %v10456_v37, %v10460_v57 }
 0x146   : > { %8006 = vmatmul.mubr.msk.bf16.gmra.mrb[140].mxu0 %vm1370_vm5, %v10444_v23  ;;  %v1839_v23 = vrot.slane %v1837_v35, 4  ;;  %v13501_v35 = vld [vmem:[#allocation33_spill] sm:$0xff] }
 0x147   : > { %8009 = vmatprep.mubr.msk.bf16.mxu0 %vm9169_vm1, %v13398_v32  ;;  %13497 = vst [vmem:[#allocation17_spill] sm:$0xff] %v10466_v0  ;;  %v1847_v51 = vrot.slane %v13501_v35, 5  ;;  %v13506_v35 = vld [vmem:[#allocation40_spill] sm:$0xff] }
 0x148   : > { %v10479_v31 = vsel %vm10099_vm8, %v1839_v23, %v10346_v4 }
 0x149   : > { %v10462_v2 = vpop.f32.mrb[36].mxu0  ;;  %v1849_v60 = vrot.slane %v1847_v51, 4  ;;  %v10500_v29 = vsel %vm10099_vm8, %v1846_v40, %v1847_v51  ;;  %v13511_v51 = vld [vmem:[#allocation41_spill] sm:$0xff] }
 0x14a   : > { %13496 = vst [vmem:[#allocation14_spill] sm:$0xff] %v10462_v2  ;;  %v7899_v1 = vpop.f32.mrb[37].mxu0 }
 0x14b   : > { %v10468_v3 = vpop.f32.mrb[38].mxu0  ;;  %v10505_v23 = vsel %vm10099_vm8, %v1849_v60, %v10346_v4 }
 0x14c   : > { %13498 = vst [vmem:[#allocation21_spill] sm:$0xff] %v10468_v3  ;;  %v7900_v20 = vpop.f32.mrb[39].mxu0  ;;  %13505 = vst [vmem:[#allocation28_spill] sm:$0xff] %v10505_v23  ;;  %v1857_v3 = vrot.slane %v13511_v51, 5 }
 0x14d   : > { %v10490_v20 = vcombine.low %v10479_v31, %v10483_v27 }
 0x14e   : > { %8010 = vmatmul.mubr.msk.bf16.gmra.mrb[144].mxu0 %vm1370_vm5, %v10466_v0 }
 0x14f   : > { %8013 = vmatprep.mubr.msk.bf16.mxu0 %vm9169_vm1, %v13398_v32  ;;  %13503 = vst [vmem:[#allocation23_spill] sm:$0xff] %v10490_v20 }
 0x151   : > { %v10486_v1 = vpop.f32.mrb[40].mxu0 }
 0x152   : > { %13502 = vst [vmem:[#allocation20_spill] sm:$0xff] %v10486_v1  ;;  %v7903_v54 = vpop.f32.mrb[41].mxu0  ;;  %v13510_v1 = vld [vmem:[#allocation39_spill] sm:$0xff] }
 0x153   : > { %v10492_v0 = vpop.f32.mrb[42].mxu0  ;;  %v1854_v54 = vrot.slane %v13506_v35, 5  ;;  %v7105_v45 = vrot.slane %v13510_v1, 9 }
 0x154   : > { %13504 = vst [vmem:[#allocation30_spill] sm:$0xff] %v10492_v0  ;;  %v7904_v38 = vpop.f32.mrb[43].mxu0 }
 0x155   : > { %v1856_v40 = vrot.slane %v1854_v54, 4  ;;  %v10524_v60 = vsel %vm10099_vm8, %v7105_v45, %v1854_v54 }
 0x156   : > { %8014 = vmatmul.mubr.msk.bf16.gmra.mrb[148].mxu0 %vm1370_vm5, %v10490_v20  ;;  %v10512_v20 = vcombine.low %v10500_v29, %v10505_v23  ;;  %v13517_v23 = vld [vmem:[#allocation45_spill] sm:$0xff] }
 0x157   : > { %8017 = vmatprep.mubr.msk.bf16.mxu0 %vm9169_vm1, %v13398_v32  ;;  %v10528_v35 = vsel %vm10099_vm8, %v1856_v40, %v1857_v3  ;;  %v1864_v63 = vrot.slane %v13517_v23, 5 }
 0x158   : > { %13508 = vst [vmem:[#allocation40_spill] sm:$0xff] %v10512_v20  ;;  %13512 = vst [vmem:[#allocation39_spill] sm:$0xff] %v10528_v35 }
 0x159   : > { %v10508_v36 = vpop.f32.mrb[44].mxu0 }
 0x15a   : > { %13507 = vst [vmem:[#allocation33_spill] sm:$0xff] %v10508_v36  ;;  %v7907_v38 = vpop.f32.mrb[45].mxu0 }
 0x15b   : > { %v10514_v0 = vpop.f32.mrb[46].mxu0 }
 0x15c   : > { %13509 = vst [vmem:[#allocation93_spill] sm:$0xff] %v10514_v0  ;;  %v7908_v2 = vpop.f32.mrb[47].mxu0  ;;  %v13516_v0 = vld [vmem:[#allocation44_spill] sm:$0xff] }
 0x15d   : > { %v10534_v2 = vcombine.low %v10524_v60, %v10528_v35  ;;  %v7106_v36 = vrot.slane %v13516_v0, 9 }
 0x15e   : > { %8018 = vmatmul.mubr.msk.bf16.gmra.mrb[152].mxu0 %vm1370_vm5, %v10512_v20  ;;  %v1859_v20 = vrot.slane %v1857_v3, 4  ;;  %v13519_v3 = vld [vmem:[#allocation51_spill] sm:$0xff] }
 0x15f   : > { %8021 = vmatprep.mubr.msk.bf16.mxu0 %vm9169_vm1, %v13398_v32  ;;  %13514 = vst [vmem:[#allocation94_spill] sm:$0xff] %v10534_v2  ;;  %v10551_v40 = vsel %vm10099_vm8, %v7106_v36, %v1864_v63  ;;  %v1867_v0 = vrot.slane %v13519_v3, 5  ;;  %v1874_v3 = vrot.slane %v9955_v49, 5 }
 0x160   : > { %v10547_v54 = vsel %vm10099_vm8, %v1859_v20, %v10346_v4  ;;  %13518 = vst [vmem:[#allocation44_spill] sm:$0xff] %v10551_v40 }
 0x161   : > { %v10530_v38 = vpop.f32.mrb[48].mxu0 }
 0x162   : > { %13513 = vst [vmem:[#allocation41_spill] sm:$0xff] %v10530_v38  ;;  %v7911_v1 = vpop.f32.mrb[49].mxu0  ;;  %v1869_v38 = vrot.slane %v1867_v0, 4 }
 0x163   : > { %v10536_v51 = vpop.f32.mrb[50].mxu0 }
 0x164   : > { %13515 = vst [vmem:[#allocation95_spill] sm:$0xff] %v10536_v51  ;;  %v7912_v45 = vpop.f32.mrb[51].mxu0  ;;  %v1866_v51 = vrot.slane %v1864_v63, 4  ;;  %v10573_v36 = vsel %vm10099_vm8, %v1869_v38, %v10346_v4 }
 0x165   : > { %v10558_v45 = vcombine.low %v10547_v54, %v10551_v40 }
 0x166   : > { %8022 = vmatmul.mubr.msk.bf16.gmra.mrb[156].mxu0 %vm1370_vm5, %v10534_v2  ;;  %v10568_v20 = vsel %vm10099_vm8, %v1866_v51, %v1867_v0  ;;  %v1876_v51 = vrot.slane %v1874_v3, 4  ;;  %v1877_v0 = vrot.slane %v9959_v18, 5 }
 0x167   : > { %8025 = vmatprep.mubr.msk.bf16.mxu0 %vm9169_vm1, %v13398_v32  ;;  %13521 = vst [vmem:[#allocation51_spill] sm:$0xff] %v10558_v45 }
 0x168   : > { %v10596_v38 = vsel %vm10099_vm8, %v1876_v51, %v1877_v0 }
 0x169   : > { %v10554_v1 = vpop.f32.mrb[52].mxu0 }
 0x16a   : > { %13520 = vst [vmem:[#allocation45_spill] sm:$0xff] %v10554_v1  ;;  %v7915_v23 = vpop.f32.mrb[53].mxu0 }
 0x16b   : > { %v10560_v2 = vpop.f32.mrb[54].mxu0  ;;  %v10580_v23 = vcombine.low %v10568_v20, %v10573_v36 }
 0x16c   : > { %13522 = vst [vmem:[#allocation96_spill] sm:$0xff] %v10560_v2  ;;  %v7916_v35 = vpop.f32.mrb[55].mxu0  ;;  %v13526_v2 = vld [vmem:[#allocation57_spill] sm:$0xff] }
 0x16d   : > { %13524 = vst [vmem:[#allocation98_spill] sm:$0xff] %v10580_v23  ;;  %v7107_v1 = vrot.slane %v13526_v2, 9 }
 0x16e   : > { %8026 = vmatmul.mubr.msk.bf16.gmra.mrb[160].mxu0 %vm1370_vm5, %v10558_v45 }
 0x16f   : > { %8029 = vmatprep.mubr.msk.bf16.mxu0 %vm9169_vm1, %v13398_v32  ;;  %v10592_v49 = vsel %vm10099_vm8, %v7107_v1, %v1874_v3  ;;  %v1884_v1 = vrot.slane %v10008_v9, 5  ;;  %v1887_v9 = vrot.slane %v10041_v56, 5 }
 0x171   : > { %v10576_v63 = vpop.f32.mrb[56].mxu0 }
 0x172   : > { %13523 = vst [vmem:[#allocation97_spill] sm:$0xff] %v10576_v63  ;;  %v7919_v35 = vpop.f32.mrb[57].mxu0  ;;  %v7108_v63 = vrot.slane %v10006_v58, 9 }
 0x173   : > { %v10582_v45 = vpop.f32.mrb[58].mxu0 }
 0x174   : > { %13525 = vst [vmem:[#allocation99_spill] sm:$0xff] %v10582_v45  ;;  %v7920_v40 = vpop.f32.mrb[59].mxu0  ;;  %v1879_v45 = vrot.slane %v1877_v0, 4  ;;  %v10621_v58 = vsel %vm10099_vm8, %v7108_v63, %v1884_v1 }
 0x175   : > { %v10603_v40 = vcombine.low %v10592_v49, %v10596_v38 }
 0x176   : > { %8030 = vmatmul.mubr.msk.bf16.gmra.mrb[164].mxu0 %vm1370_vm5, %v10580_v23 }
 0x177   : > { %8033 = vmatprep.mubr.msk.bf16.mxu0 %vm9169_vm1, %v13398_v32  ;;  %13527 = vst [vmem:[#allocation57_spill] sm:$0xff] %v10603_v40 }
 0x179   : > { %v1670_v35 = vpop.f32.mrb[60].mxu0 }
 0x17a   : > { %v10599_v2 = vadd.f32 %v1670_v35, %v10260_v8  ;;  %v7925_v18 = vpop.f32.mrb[61].mxu0  ;;  %v10617_v8 = vsel %vm10099_vm8, %v1879_v45, %v10346_v4  ;;  %v416_v45 = vld [vmem:[%s13165_s1 + $0x14] sm:$0xf] }
 0x17b   : > { %v1673_v23 = vpop.f32.mrb[62].mxu0  ;;  %v10629_v35 = vcombine.low %v10617_v8, %v10621_v58 }
 0x17c   : > { %v10608_v3 = vadd.f32 %v1673_v23, %v10266_v14  ;;  %v7926_v51 = vpop.f32.mrb[63].mxu0 }
 0x17d   : > { %13529 = vst [vmem:[#allocation101_spill] sm:$0xff] %v10629_v35  ;;  %v1886_v51 = vrot.slane %v1884_v1, 4  ;;  %v13530_v1 = vcombine.low %v10150_v15, %v10156_v11  ;;  %v7195_v15 = vcombine.low %v10372_v10, %v10388_v19 }
 0x17e   : > { %13528 = vst [vmem:[#allocation100_spill] sm:$0xff] %v10608_v3  ;;  %8034 = vmatmul.mubr.msk.bf16.gmra.mrb[168].mxu0 %vm1370_vm5, %v10603_v40  ;;  %v1889_v40 = vrot.slane %v1887_v9, 4  ;;  %v2781_v3 = vsel %vm1416_vm0, %v416_v45, 0 }
 0x17f   : > { %8037 = vmatprep.mubr.msk.bf16.mxu0 %vm9169_vm1, %v13398_v32  ;;  %8170 = vmatpush3.bf16.msra.mxu1 %v2781_v3 }
 0x180   : > { %8293 = vmatprep.subr.bf16.mxu1 %v13398_v32 }
 0x181   : > { %v1678_v14 = vpop.f32.mrb[64].mxu0 }
 0x182   : > { %v10625_v23 = vadd.f32 %v1678_v14, %v10286_v47  ;;  %v7929_v0 = vpop.f32.mrb[65].mxu0  ;;  %v10645_v47 = vsel %vm10099_vm8, %v1886_v51, %v1887_v9  ;;  %8172 = vmatmul.mubr.msk.bf16.vlgmr.msra.gmra.mrb[4].mxu1 %vm1370_vm5, %v13530_v1 }
 0x183   : > { %v1681_v18 = vpop.f32.mrb[66].mxu0  ;;  %8175 = vmatprep.mubr.msk.bf16.mxu1 %vm9169_vm1, %v13398_v32 }
 0x184   : > { %v10635_v63 = vadd.f32 %v1681_v18, %v10302_v62  ;;  %v7930_v56 = vpop.f32.mrb[67].mxu0  ;;  %v10650_v62 = vsel %vm10099_vm8, %v1889_v40, %v10346_v4 }
 0x185   : > { %v10663_v9 = vcombine.low %v10645_v47, %v10650_v62 }
 0x186   : > { %8038 = vmatmul.mubr.msk.bf16.gmra.mrb[172].mxu0 %vm1370_vm5, %v10629_v35 }
 0x187   : > { %8041 = vmatprep.mubr.msk.bf16.mxu0 %vm9169_vm1, %v13398_v32  ;;  %13531 = vst [vmem:[#allocation102_spill] sm:$0xff] %v10663_v9 }
 0x189   : > { %v1686_v3 = vpop.f32.mrb[68].mxu0 }
 0x18a   : > { %v10659_v14 = vadd.f32 %v1686_v3, %v10316_v7  ;;  %v7933_v0 = vpop.f32.mrb[69].mxu0  ;;  %8176 = vmatmul.mubr.msk.bf16.gmra.mrb[8].mxu1 %vm1370_vm5, %v7195_v15  ;;  %v415_v7 = vld [vmem:[%s13165_s1 + $0x10] sm:$0xf]  ;;  %v7196_v3 = vcombine.low %v10392_v33, %v10411_v42  ;;  %v863_v33 = vpack.c.bf16 %v13398_v32, %v9525_v48  ;;  %v909_v15 = vunpack.c.h.b16 %v10169_v16 }
 0x18b   : > { %v1689_v18 = vpop.f32.mrb[70].mxu0  ;;  %8179 = vmatprep.mubr.msk.bf16.mxu1 %vm9169_vm1, %v13398_v32  ;;  %v2522_v1 = vsel %vm1416_vm0, %v415_v7, 0 }
 0x18c   : > { %v10666_v40 = vadd.f32 %v1689_v18, %v10326_v59  ;;  %v7934_v51 = vpop.f32.mrb[71].mxu0 }
 0x18e   : > { %8042 = vmatmul.mubr.msk.bf16.gmra.mrb[176].mxu0 %vm1370_vm5, %v10663_v9 }
 0x18f   : > { %8047 = vmatprep.mubr.msk.bf16.mxu0 %vm9169_vm1, %v13398_v32 }
 0x191   : > { %v1694_v11 = vpop.f32.mrb[72].mxu0 }
 0x192   : > { %v10681_v59 = vadd.f32 %v1694_v11, %v10340_v26  ;;  %v7937_v45 = vpop.f32.mrb[73].mxu0  ;;  %8180 = vmatmul.mubr.msk.bf16.gmra.mrb[12].mxu1 %vm1370_vm5, %v7196_v3  ;;  %v910_v11 = vunpack.c.l.b16 %v863_v33 }
 0x193   : > { %v1697_v56 = vpop.f32.mrb[74].mxu0  ;;  %8183 = vmatprep.mubr.msk.bf16.mxu1 %vm9169_vm1, %v13398_v32 }
 0x194   : > { %v10684_v10 = vadd.f32 %v1697_v56, %v10342_v44  ;;  %v7938_v19 = vpop.f32.mrb[75].mxu0 }
 0x196   : > { %8048 = vmatmul.mubr.msk.bf16.vlgmr.msra.gmra.mrb[180].mxu0 %vm1370_vm5, %v10143_v61  ;;  %v7530_v61 = vpack.c.bf16 %v9505_v39, %v9439_v25 }
 0x197   : > { %8108 = vmatpush3.bf16.msra.mxu0 %v2522_v1  ;;  %8051 = vmatprep.mubr.msk.bf16.mxu0 %vm9169_vm1, %v13398_v32 }
 0x198   : > { %8231 = vmatprep.subr.bf16.mxu0 %v13398_v32 }
 0x199   : > { %v1702_v26 = vpop.f32.mrb[76].mxu0 }
 0x19a   : > { %v10698_v44 = vadd.f32 %v1702_v26, %v10359_v6  ;;  %v7941_v0 = vpop.f32.mrb[77].mxu0  ;;  %v7197_v6 = vcombine.low %v10415_v50, %v10432_v24  ;;  %v7198_v50 = vcombine.low %v10437_v41, %v10456_v37  ;;  %v7199_v41 = vcombine.low %v10460_v57, %v10479_v31 }
 0x19b   : > { %v1705_v42 = vpop.f32.mrb[78].mxu0  ;;  %v7531_v26 = vpack.c.bf16 %v9644_v46, %v9615_v17 }
 0x19c   : > { %v10705_v18 = vadd.f32 %v1705_v42, %v10362_v34  ;;  %v7942_v51 = vpop.f32.mrb[79].mxu0  ;;  %8184 = vmatmul.mubr.msk.bf16.gmra.mrb[16].mxu1 %vm1370_vm5, %v7197_v6  ;;  %v2175_v34 = vpack.c.b16 %v910_v11, %v909_v15 }
 0x19d   : > { %8187 = vmatprep.mubr.msk.bf16.mxu1 %vm9169_vm1, %v13398_v32  ;;  %v13532_v51 = vld [vmem:[#allocation13_spill] sm:$0xff] }
 0x19e   : > { %8052 = vmatmul.mubr.msk.bf16.gmra.mrb[184].mxu0 %vm1370_vm5, %v7530_v61  ;;  %v915_v61 = vunpack.c.h.b16 %v10198_v53 }
 0x19f   : > { %8055 = vmatprep.mubr.msk.bf16.mxu0 %vm9169_vm1, %v13398_v32 }
 0x1a1   : > { %v1710_v25 = vpop.f32.mrb[80].mxu0 }
 0x1a2   : > { %v10717_v39 = vadd.f32 %v1710_v25, %v10375_v13  ;;  %v7945_v48 = vpop.f32.mrb[81].mxu0 }
 0x1a3   : > { %v1713_v7 = vpop.f32.mrb[82].mxu0 }
 0x1a4   : > { %v10720_v45 = vadd.f32 %v1713_v7, %v10379_v5  ;;  %v7946_v56 = vpop.f32.mrb[83].mxu0  ;;  %8188 = vmatmul.mubr.msk.bf16.gmra.mrb[20].mxu1 %vm1370_vm5, %v7198_v50  ;;  %v13535_v7 = vld [vmem:[#allocation21_spill] sm:$0xff] }
 0x1a5   : > { %8191 = vmatprep.mubr.msk.bf16.mxu1 %vm9169_vm1, %v13398_v32 }
 0x1a6   : > { %8056 = vmatmul.mubr.msk.bf16.gmra.mrb[188].mxu0 %vm1370_vm5, %v2175_v34 }
 0x1a7   : > { %8059 = vmatprep.mubr.msk.bf16.mxu0 %vm9169_vm1, %v13398_v32 }
 0x1a9   : > { %v1718_v24 = vpop.f32.mrb[84].mxu0 }
 0x1aa   : > { %v10731_v13 = vadd.f32 %v1718_v24, %v10394_v22  ;;  %v7949_v5 = vpop.f32.mrb[85].mxu0  ;;  %v13536_v24 = vld [vmem:[#allocation69_spill] sm:$0xff] }
 0x1ab   : > { %v1721_v19 = vpop.f32.mrb[86].mxu0 }
 0x1ac   : > { %v10734_v1 = vadd.f32 %v1721_v19, %v10400_v28  ;;  %v7950_v3 = vpop.f32.mrb[87].mxu0  ;;  %8192 = vmatmul.mubr.msk.bf16.gmra.mrb[24].mxu1 %vm1370_vm5, %v7199_v41  ;;  %v13538_v41 = vld [vmem:[#allocation32_spill] sm:$0xff] }
 0x1ad   : > { %8195 = vmatprep.mubr.msk.bf16.mxu1 %vm9169_vm1, %v13398_v32 }
 0x1ae   : > { %8060 = vmatmul.mubr.msk.bf16.gmra.mrb[192].mxu0 %vm1370_vm5, %v10181_v21  ;;  %v867_v21 = vpack.c.bf16 %v13398_v32, %v9646_v52 }
 0x1af   : > { %8063 = vmatprep.mubr.msk.bf16.mxu0 %vm9169_vm1, %v13398_v32 }
 0x1b0   : > { %v916_v33 = vunpack.c.l.b16 %v867_v21 }
 0x1b1   : > { %v1726_v37 = vpop.f32.mrb[88].mxu0 }
 0x1b2   : > { %v10746_v22 = vadd.f32 %v1726_v37, %v10418_v30  ;;  %v7953_v28 = vpop.f32.mrb[89].mxu0  ;;  %v7200_v30 = vcombine.low %v10483_v27, %v10500_v29  ;;  %v13533_v27 = vld [vmem:[#allocation28_spill] sm:$0xff]  ;;  %v13539_v37 = vld [vmem:[#allocation37_spill] sm:$0xff] }
 0x1b3   : > { %v1729_v57 = vpop.f32.mrb[90].mxu0  ;;  %v7201_v29 = vcombine.low %v13533_v27, %v10524_v60  ;;  %v13537_v60 = vld [vmem:[#allocation39_spill] sm:$0xff]  ;;  %v7532_v28 = vpack.c.bf16 %v13539_v37, %v13538_v41 }
 0x1b4   : > { %v10753_v31 = vadd.f32 %v1729_v57, %v10424_v12  ;;  %v7954_v0 = vpop.f32.mrb[91].mxu0  ;;  %8196 = vmatmul.mubr.msk.bf16.gmra.mrb[28].mxu1 %vm1370_vm5, %v7200_v30  ;;  %v2178_v12 = vpack.c.b16 %v916_v33, %v915_v61  ;;  %v7202_v5 = vcombine.low %v13537_v60, %v10547_v54  ;;  %v13541_v57 = vld [vmem:[#allocation20_spill] sm:$0xff]  ;;  %v13542_v33 = vld [vmem:[#allocation30_spill] sm:$0xff]  ;;  %v13548_v37 = vld [vmem:[#allocation95_spill] sm:$0xff] }
 0x1b5   : > { %8199 = vmatprep.mubr.msk.bf16.mxu1 %vm9169_vm1, %v13398_v32 }
 0x1b6   : > { %8064 = vmatmul.mubr.msk.bf16.gmra.mrb[196].mxu0 %vm1370_vm5, %v7531_v26  ;;  %v13540_v26 = vld [vmem:[#allocation38_spill] sm:$0xff] }
 0x1b7   : > { %8067 = vmatprep.mubr.msk.bf16.mxu0 %vm9169_vm1, %v13398_v32  ;;  %v871_v21 = vpack.c.bf16 %v13398_v32, %v13540_v26  ;;  %v13549_v26 = vld [vmem:[#allocation70_spill] sm:$0xff] }
 0x1b9   : > { %v1734_v17 = vpop.f32.mrb[92].mxu0 }
 0x1ba   : > { %v10765_v46 = vadd.f32 %v1734_v17, %v10440_v43  ;;  %v7957_v52 = vpop.f32.mrb[93].mxu0  ;;  %v13534_v43 = vld [vmem:[#allocation14_spill] sm:$0xff]  ;;  %v13543_v17 = vld [vmem:[#allocation80_spill] sm:$0xff] }
 0x1bb   : > { %v1737_v42 = vpop.f32.mrb[94].mxu0  ;;  %v921_v52 = vunpack.c.h.b16 %v13543_v17 }
 0x1bc   : > { %v10768_v15 = vadd.f32 %v1737_v42, %v13532_v51  ;;  %v7958_v11 = vpop.f32.mrb[95].mxu0  ;;  %8200 = vmatmul.mubr.msk.bf16.gmra.mrb[32].mxu1 %vm1370_vm5, %v7201_v29  ;;  %v13544_v42 = vld [vmem:[#allocation44_spill] sm:$0xff] }
 0x1bd   : > { %8203 = vmatprep.mubr.msk.bf16.mxu1 %vm9169_vm1, %v13398_v32  ;;  %v7203_v51 = vcombine.low %v13544_v42, %v10568_v20  ;;  %v7204_v20 = vcombine.low %v10573_v36, %v10592_v49  ;;  %v7205_v36 = vcombine.low %v10596_v38, %v10617_v8 }
 0x1be   : > { %8068 = vmatmul.mubr.msk.bf16.gmra.mrb[200].mxu0 %vm1370_vm5, %v2178_v12  ;;  %v922_v12 = vunpack.c.l.b16 %v871_v21 }
 0x1bf   : > { %8071 = vmatprep.mubr.msk.bf16.mxu0 %vm9169_vm1, %v13398_v32 }
 0x1c0   : > { %v2181_v29 = vpack.c.b16 %v922_v12, %v921_v52  ;;  %v13553_v12 = vld [vmem:[#allocation45_spill] sm:$0xff] }
 0x1c1   : > { %v1742_v6 = vpop.f32.mrb[96].mxu0 }
 0x1c2   : > { %v10779_v25 = vadd.f32 %v1742_v6, %v13534_v43  ;;  %v7961_v48 = vpop.f32.mrb[97].mxu0  ;;  %v13545_v6 = vld [vmem:[#allocation33_spill] sm:$0xff] }
 0x1c3   : > { %v1745_v34 = vpop.f32.mrb[98].mxu0 }
 0x1c4   : > { %v10782_v56 = vadd.f32 %v1745_v34, %v13535_v7  ;;  %v7962_v50 = vpop.f32.mrb[99].mxu0  ;;  %8204 = vmatmul.mubr.msk.bf16.gmra.mrb[36].mxu1 %vm1370_vm5, %v7202_v5  ;;  %v13546_v7 = vld [vmem:[#allocation93_spill] sm:$0xff] }
 0x1c5   : > { %8207 = vmatprep.mubr.msk.bf16.mxu1 %vm9169_vm1, %v13398_v32  ;;  %v13547_v5 = vld [vmem:[#allocation41_spill] sm:$0xff] }
 0x1c6   : > { %8072 = vmatmul.mubr.msk.bf16.gmra.mrb[204].mxu0 %vm1370_vm5, %v13536_v24 }
 0x1c7   : > { %8075 = vmatprep.mubr.msk.bf16.mxu0 %vm9169_vm1, %v13398_v32 }
 0x1c9   : > { %v1750_v19 = vpop.f32.mrb[100].mxu0 }
 0x1ca   : > { %v7965_v3 = vpop.f32.mrb[101].mxu0  ;;  %v10798_v0 = vadd.f32 %v1750_v19, %v13541_v57  ;;  %v13550_v57 = vld [vmem:[#allocation50_spill] sm:$0xff] }
 0x1cb   : > { %v1753_v54 = vpop.f32.mrb[102].mxu0 }
 0x1cc   : > { %v7966_v61 = vpop.f32.mrb[103].mxu0  ;;  %v10801_v30 = vadd.f32 %v1753_v54, %v13542_v33  ;;  %8208 = vmatmul.mubr.msk.bf16.gmra.mrb[40].mxu1 %vm1370_vm5, %v7203_v51  ;;  %v13551_v54 = vld [vmem:[#allocation54_spill] sm:$0xff]  ;;  %v13552_v33 = vld [vmem:[#allocation56_spill] sm:$0xff] }
 0x1cd   : > { %8211 = vmatprep.mubr.msk.bf16.mxu1 %vm9169_vm1, %v13398_v32  ;;  %v7533_v61 = vpack.c.bf16 %v13551_v54, %v13550_v57  ;;  %v875_v52 = vpack.c.bf16 %v13398_v32, %v13552_v33 }
 0x1ce   : > { %8076 = vmatmul.mubr.msk.bf16.gmra.mrb[208].mxu0 %vm1370_vm5, %v7532_v28 }
 0x1cf   : > { %8079 = vmatprep.mubr.msk.bf16.mxu0 %vm9169_vm1, %v13398_v32 }
 0x1d1   : > { %v1758_v11 = vpop.f32.mrb[104].mxu0 }
 0x1d2   : > { %v7969_v27 = vpop.f32.mrb[105].mxu0  ;;  %v10813_v43 = vadd.f32 %v1758_v11, %v13545_v6  ;;  %v13554_v11 = vld [vmem:[#allocation96_spill] sm:$0xff] }
 0x1d3   : > { %v1761_v48 = vpop.f32.mrb[106].mxu0 }
 0x1d4   : > { %v7970_v34 = vpop.f32.mrb[107].mxu0  ;;  %v10816_v50 = vadd.f32 %v1761_v48, %v13546_v7  ;;  %8212 = vmatmul.mubr.msk.bf16.gmra.mrb[44].mxu1 %vm1370_vm5, %v7204_v20  ;;  %v13555_v48 = vld [vmem:[#allocation55_spill] sm:$0xff]  ;;  %v928_v7 = vunpack.c.l.b16 %v875_v52  ;;  %v7206_v20 = vcombine.low %v10621_v58, %v10645_v47  ;;  %v13558_v47 = vld [vmem:[#allocation97_spill] sm:$0xff] }
 0x1d5   : > { %8215 = vmatprep.mubr.msk.bf16.mxu1 %vm9169_vm1, %v13398_v32  ;;  %v927_v34 = vunpack.c.h.b16 %v13555_v48 }
 0x1d6   : > { %8080 = vmatmul.mubr.msk.bf16.gmra.mrb[212].mxu0 %vm1370_vm5, %v2181_v29 }
 0x1d7   : > { %8083 = vmatprep.mubr.msk.bf16.mxu0 %vm9169_vm1, %v13398_v32  ;;  %v2184_v58 = vpack.c.b16 %v928_v7, %v927_v34 }
 0x1d9   : > { %v1766_v24 = vpop.f32.mrb[108].mxu0 }
 0x1da   : > { %v7973_v60 = vpop.f32.mrb[109].mxu0  ;;  %v10827_v19 = vadd.f32 %v1766_v24, %v13547_v5 }
 0x1db   : > { %v1769_v3 = vpop.f32.mrb[110].mxu0  ;;  %v13556_v60 = vld [vmem:[#allocation83_spill] sm:$0xff] }
 0x1dc   : > { %v7974_v41 = vpop.f32.mrb[111].mxu0  ;;  %v10830_v28 = vadd.f32 %v1769_v3, %v13548_v37  ;;  %8216 = vmatmul.mubr.msk.bf16.gmra.mrb[48].mxu1 %vm1370_vm5, %v7205_v36  ;;  %v10864_v5 = vpack.c.bf16 %v13556_v60, %v13556_v60  ;;  %v13557_v3 = vld [vmem:[#allocation84_spill] sm:$0xff] }
 0x1dd   : > { %8219 = vmatprep.mubr.msk.bf16.mxu1 %vm9169_vm1, %v13398_v32  ;;  %v10868_v41 = vpack.c.bf16 %v13557_v3, %v13557_v3 }
 0x1de   : > { %8084 = vmatmul.mubr.msk.bf16.gmra.mrb[216].mxu0 %vm1370_vm5, %v13549_v26 }
 0x1df   : > { %8087 = vmatprep.mubr.msk.bf16.mxu0 %vm9169_vm1, %v13398_v32  ;;  %v2709_v57 = vrot.slane %v10868_v41, 5 }
 0x1e1   : > { %v1774_v49 = vpop.f32.mrb[112].mxu0 }
 0x1e2   : > { %v7977_v21 = vpop.f32.mrb[113].mxu0  ;;  %v10846_v42 = vadd.f32 %v1774_v49, %v13553_v12  ;;  %v10848_v8 = vpop.f32.mrb[0].mxu1 }
 0x1e3   : > { %v1777_v38 = vpop.f32.mrb[114].mxu0  ;;  %v8105_v29 = vpop.f32.mrb[1].mxu1  ;;  %v7193_v21 = vrot.slane %v10864_v5, 9 }
 0x1e4   : > { %v7978_v51 = vpop.f32.mrb[115].mxu0  ;;  %v10851_v27 = vadd.f32 %v1777_v38, %v13554_v11  ;;  %v10853_v6 = vpop.f32.mrb[2].mxu1  ;;  %8220 = vmatmul.mubr.msk.bf16.gmra.mrb[52].mxu1 %vm1370_vm5, %v7206_v20  ;;  %v13561_v38 = vld [vmem:[#allocation85_spill] sm:$0xff]  ;;  %v2711_v20 = vrot.slane %v2709_v57, 4 }
 0x1e5   : > { %v8106_v24 = vpop.f32.mrb[3].mxu1  ;;  %8223 = vmatprep.mubr.msk.bf16.mxu1 %vm9169_vm1, %v13398_v32  ;;  %v10882_v52 = vsel %vm10099_vm8, %v7193_v21, %v2709_v57  ;;  %v10889_v51 = vpack.c.bf16 %v13561_v38, %v13561_v38 }
 0x1e6   : > { %8088 = vmatmul.mubr.msk.bf16.gmra.mrb[220].mxu0 %vm1370_vm5, %v7533_v61  ;;  %v13559_v61 = vld [vmem:[#allocation99_spill] sm:$0xff]  ;;  %13560 = vst [vmem:[#allocation13_spill] sm:$0xff] %v10882_v52  ;;  %v7207_v12 = vcombine.low %v10650_v62, %v10882_v52  ;;  %v13605_v52 = vld [vmem:[#allocation60_spill] sm:$0xff] }
 0x1e7   : > { %8091 = vmatprep.mubr.msk.bf16.mxu0 %vm9169_vm1, %v13398_v32  ;;  %v2712_v29 = vrot.slane %v10889_v51, 5 }
 0x1e9   : > { %v1782_v37 = vpop.f32.mrb[116].mxu0  ;;  %v2714_v24 = vrot.slane %v2712_v29, 4 }
 0x1ea   : > { %v7981_v26 = vpop.f32.mrb[117].mxu0  ;;  %v10873_v36 = vadd.f32 %v1782_v37, %v13558_v47  ;;  %v13562_v37 = vld [vmem:[#allocation100_spill] sm:$0xff] }
 0x1eb   : > { %v1785_v49 = vpop.f32.mrb[118].mxu0  ;;  %v10910_v47 = vsel %vm10099_vm8, %v2714_v24, %v10346_v4 }
 0x1ec   : > { %v7982_v54 = vpop.f32.mrb[119].mxu0  ;;  %v10878_v33 = vadd.f32 %v1785_v49, %v13559_v61  ;;  %8224 = vmatmul.mubr.msk.bf16.gmra.mrb[56].mxu1 %vm1370_vm5, %v7207_v12  ;;  %13564 = vst [vmem:[#allocation14_spill] sm:$0xff] %v10910_v47  ;;  %v13565_v49 = vld [vmem:[#allocation72_spill] sm:$0xff] }
 0x1ed   : > { %8227 = vmatprep.mubr.msk.bf16.mxu1 %vm9169_vm1, %v13398_v32  ;;  %v13566_v61 = vld [vmem:[#allocation64_spill] sm:$0xff] }
 0x1ee   : > { %8092 = vmatmul.mubr.msk.bf16.gmra.mrb[224].mxu0 %vm1370_vm5, %v2184_v58  ;;  %v10905_v58 = vsel %vm10099_vm8, %v2711_v20, %v2712_v29  ;;  %v7534_v12 = vpack.c.bf16 %v13556_v60, %v13566_v61  ;;  %v13567_v60 = vld [vmem:[#allocation16_spill] sm:$0xff]  ;;  %v13568_v61 = vld [vmem:[#allocation6_spill] sm:$0xff] }
 0x1ef   : > { %8095 = vmatprep.mubr.msk.bf16.mxu0 %vm9169_vm1, %v13398_v32  ;;  %13563 = vst [vmem:[#allocation28_spill] sm:$0xff] %v10905_v58 }
 0x1f1   : > { %v2019_v11 = vpop.f32.mrb[120].mxu0 }
 0x1f2   : > { %v7987_v34 = vpop.f32.mrb[121].mxu0  ;;  %v10898_v7 = vadd.f32 %v2019_v11, %v10599_v2  ;;  %v7208_v2 = vcombine.low %v10905_v58, %v10910_v47 }
 0x1f3   : > { %v2022_v62 = vpop.f32.mrb[122].mxu0  ;;  %v418_v34 = vld [vmem:[%s13165_s1 + $0x1c] sm:$0xf] }
 0x1f4   : > { %v7988_v3 = vpop.f32.mrb[123].mxu0  ;;  %v10901_v26 = vadd.f32 %v2022_v62, %v13562_v37  ;;  %8228 = vmatmul.mubr.msk.bf16.gmra.mrb[60].mxu1 %vm1370_vm5, %v7208_v2  ;;  %v3224_v24 = vsel %vm1416_vm0, %v418_v34, 0 }
 0x1f5   : > { %8295 = vmatprep.mubr.msk.bf16.mxu1 %vm9169_vm1, %v13398_v32  ;;  %8294 = vmatpush3.bf16.msra.mxu1 %v3224_v24  ;;  %v417_v3 = vld [vmem:[%s13165_s1 + $0x18] sm:$0xf]  ;;  %v13573_v24 = vld [vmem:[#allocation11_spill] sm:$0xff] }
 0x1f6   : > { %8096 = vmatmul.mubr.msk.bf16.gmra.mrb[228].mxu0 %vm1370_vm5, %v13565_v49 }
 0x1f7   : > { %8099 = vmatprep.mubr.msk.bf16.mxu0 %vm9169_vm1, %v13398_v32 }
 0x1f9   : > { %v2027_v57 = vpop.f32.mrb[124].mxu0 }
 0x1fa   : > { %v7991_v54 = vpop.f32.mrb[125].mxu0  ;;  %v10926_v11 = vadd.f32 %v2027_v57, %v10625_v23  ;;  %v2984_v57 = vsel %vm1416_vm0, %v417_v3, 0 }
 0x1fb   : > { %v2030_v29 = vpop.f32.mrb[126].mxu0 }
 0x1fc   : > { %v7992_v62 = vpop.f32.mrb[127].mxu0  ;;  %v10932_v20 = vadd.f32 %v2030_v29, %v10635_v63  ;;  %8296 = vmatmul.mubr.msk.bf16.vlgmr.msra.gmra.mrb[64].mxu1 %vm1370_vm5, %v13567_v60 }
 0x1fd   : > { %8299 = vmatprep.mubr.msk.bf16.mxu1 %vm9169_vm1, %v13398_v32  ;;  %v13572_v62 = vld [vmem:[#allocation12_spill] sm:$0xff] }
 0x1fe   : > { %8100 = vmatmul.mubr.msk.bf16.gmra.mrb[232].mxu0 %vm1370_vm5, %v7534_v12  ;;  %v13569_v12 = vld [vmem:[#allocation7_spill] sm:$0xff]  ;;  %v7164_v60 = vcombine.low %v13573_v24, %v13572_v62  ;;  %v13577_v62 = vld [vmem:[#allocation34_spill] sm:$0xff] }
 0x1ff   : > { %8109 = vmatprep.mubr.msk.bf16.mxu0 %vm9169_vm1, %v13398_v32  ;;  %v13570_v29 = vcombine.low %v13568_v61, %v13569_v12  ;;  %v13576_v12 = vld [vmem:[#allocation15_spill] sm:$0xff] }
 0x201   : > { %v2035_v23 = vpop.f32.mrb[128].mxu0 }
 0x202   : > { %v7995_v63 = vpop.f32.mrb[129].mxu0  ;;  %v10946_v37 = vadd.f32 %v2035_v23, %v10659_v14  ;;  %v13571_v14 = vld [vmem:[#allocation22_spill] sm:$0xff] }
 0x203   : > { %v2038_v49 = vpop.f32.mrb[130].mxu0 }
 0x204   : > { %v7996_v2 = vpop.f32.mrb[131].mxu0  ;;  %v10950_v54 = vadd.f32 %v2038_v49, %v10666_v40  ;;  %8300 = vmatmul.mubr.msk.bf16.gmra.mrb[68].mxu1 %vm1370_vm5, %v13571_v14 }
 0x205   : > { %8303 = vmatprep.mubr.msk.bf16.mxu1 %vm9169_vm1, %v13398_v32  ;;  %v13574_v2 = vld [vmem:[#allocation26_spill] sm:$0xff] }
 0x206   : > { %8110 = vmatmul.mubr.msk.bf16.vlgmr.msra.gmra.mrb[236].mxu0 %vm1370_vm5, %v13570_v29 }
 0x207   : > { %8232 = vmatpush3.bf16.msra.mxu0 %v2984_v57  ;;  %8113 = vmatprep.mubr.msk.bf16.mxu0 %vm9169_vm1, %v13398_v32 }
 0x208   : > { %8355 = vmatprep.subr.bf16.mxu0 %v13398_v32 }
 0x209   : > { %v2043_v34 = vpop.f32.mrb[132].mxu0 }
 0x20a   : > { %v7999_v40 = vpop.f32.mrb[133].mxu0  ;;  %v10966_v23 = vadd.f32 %v2043_v34, %v10681_v59  ;;  %v13575_v59 = vld [vmem:[#allocation18_spill] sm:$0xff] }
 0x20b   : > { %v2046_v3 = vpop.f32.mrb[134].mxu0  ;;  %v7165_v29 = vcombine.low %v13576_v12, %v13575_v59  ;;  %v13580_v59 = vld [vmem:[#allocation42_spill] sm:$0xff] }
 0x20c   : > { %v8000_v63 = vpop.f32.mrb[135].mxu0  ;;  %v10969_v49 = vadd.f32 %v2046_v3, %v10684_v10  ;;  %8304 = vmatmul.mubr.msk.bf16.gmra.mrb[72].mxu1 %vm1370_vm5, %v13574_v2  ;;  %v13579_v3 = vld [vmem:[#allocation19_spill] sm:$0xff] }
 0x20d   : > { %8307 = vmatprep.mubr.msk.bf16.mxu1 %vm9169_vm1, %v13398_v32 }
 0x20e   : > { %8114 = vmatmul.mubr.msk.bf16.gmra.mrb[240].mxu0 %vm1370_vm5, %v7164_v60 }
 0x20f   : > { %8117 = vmatprep.mubr.msk.bf16.mxu0 %vm9169_vm1, %v13398_v32 }
 0x211   : > { %v2051_v57 = vpop.f32.mrb[136].mxu0 }
 0x212   : > { %v8003_v61 = vpop.f32.mrb[137].mxu0  ;;  %v10981_v14 = vadd.f32 %v2051_v57, %v10698_v44  ;;  %v13578_v44 = vld [vmem:[#allocation24_spill] sm:$0xff] }
 0x213   : > { %v2054_v10 = vpop.f32.mrb[138].mxu0  ;;  %v7166_v63 = vcombine.low %v13579_v3, %v13578_v44  ;;  %v13583_v44 = vld [vmem:[#allocation47_spill] sm:$0xff] }
 0x214   : > { %v8004_v34 = vpop.f32.mrb[139].mxu0  ;;  %v10984_v40 = vadd.f32 %v2054_v10, %v10705_v18  ;;  %8308 = vmatmul.mubr.msk.bf16.gmra.mrb[76].mxu1 %vm1370_vm5, %v13577_v62  ;;  %v13582_v10 = vld [vmem:[#allocation25_spill] sm:$0xff] }
 0x215   : > { %8311 = vmatprep.mubr.msk.bf16.mxu1 %vm9169_vm1, %v13398_v32 }
 0x216   : > { %8118 = vmatmul.mubr.msk.bf16.gmra.mrb[244].mxu0 %vm1370_vm5, %v7165_v29 }
 0x217   : > { %8121 = vmatprep.mubr.msk.bf16.mxu0 %vm9169_vm1, %v13398_v32 }
 0x219   : > { %v2059_v24 = vpop.f32.mrb[140].mxu0 }
 0x21a   : > { %v8007_v60 = vpop.f32.mrb[141].mxu0  ;;  %v10996_v2 = vadd.f32 %v2059_v24, %v10717_v39  ;;  %v13581_v39 = vld [vmem:[#allocation27_spill] sm:$0xff] }
 0x21b   : > { %v2062_v18 = vpop.f32.mrb[142].mxu0  ;;  %v7167_v34 = vcombine.low %v13582_v10, %v13581_v39  ;;  %v13587_v39 = vld [vmem:[#allocation52_spill] sm:$0xff] }
 0x21c   : > { %v8008_v57 = vpop.f32.mrb[143].mxu0  ;;  %v10999_v61 = vadd.f32 %v2062_v18, %v10720_v45  ;;  %8312 = vmatmul.mubr.msk.bf16.gmra.mrb[80].mxu1 %vm1370_vm5, %v13580_v59  ;;  %v13584_v59 = vld [vmem:[#allocation29_spill] sm:$0xff] }
 0x21d   : > { %8315 = vmatprep.mubr.msk.bf16.mxu1 %vm9169_vm1, %v13398_v32 }
 0x21e   : > { %8122 = vmatmul.mubr.msk.bf16.gmra.mrb[248].mxu0 %vm1370_vm5, %v7166_v63 }
 0x21f   : > { %8125 = vmatprep.mubr.msk.bf16.mxu0 %vm9169_vm1, %v13398_v32 }
 0x221   : > { %v2067_v12 = vpop.f32.mrb[144].mxu0 }
 0x222   : > { %v8011_v29 = vpop.f32.mrb[145].mxu0  ;;  %v11011_v62 = vadd.f32 %v2067_v12, %v10731_v13  ;;  %v13585_v12 = vld [vmem:[#allocation31_spill] sm:$0xff] }
 0x223   : > { %v2070_v45 = vpop.f32.mrb[146].mxu0  ;;  %v13586_v29 = vcombine.low %v13584_v59, %v13585_v12 }
 0x224   : > { %v8012_v24 = vpop.f32.mrb[147].mxu0  ;;  %v11014_v60 = vadd.f32 %v2070_v45, %v10734_v1  ;;  %8316 = vmatmul.mubr.msk.bf16.gmra.mrb[84].mxu1 %vm1370_vm5, %v13583_v44  ;;  %v13588_v44 = vld [vmem:[#allocation35_spill] sm:$0xff] }
 0x225   : > { %8319 = vmatprep.mubr.msk.bf16.mxu1 %vm9169_vm1, %v13398_v32 }
 0x226   : > { %8126 = vmatmul.mubr.msk.bf16.gmra.mrb[252].mxu0 %vm1370_vm5, %v7167_v34 }
 0x227   : > { %8129 = vmatprep.mubr.msk.bf16.mxu0 %vm9169_vm1, %v13398_v32 }
 0x229   : > { %v2075_v3 = vpop.f32.mrb[148].mxu0 }
 0x22a   : > { %v8015_v63 = vpop.f32.mrb[149].mxu0  ;;  %v11024_v13 = vadd.f32 %v2075_v3, %v10746_v22  ;;  %v13589_v3 = vld [vmem:[#allocation36_spill] sm:$0xff] }
 0x22b   : > { %v2078_v18 = vpop.f32.mrb[150].mxu0  ;;  %v13590_v63 = vcombine.low %v13588_v44, %v13589_v3 }
 0x22c   : > { %v8016_v57 = vpop.f32.mrb[151].mxu0  ;;  %v11027_v1 = vadd.f32 %v2078_v18, %v10753_v31  ;;  %8320 = vmatmul.mubr.msk.bf16.gmra.mrb[88].mxu1 %vm1370_vm5, %v13587_v39  ;;  %v13591_v18 = vld [vmem:[#allocation59_spill] sm:$0xff] }
 0x22d   : > { %8323 = vmatprep.mubr.msk.bf16.mxu1 %vm9169_vm1, %v13398_v32  ;;  %v13592_v39 = vld [vmem:[#allocation43_spill] sm:$0xff] }
 0x22e   : > { %8130 = vmatmul.mubr.msk.bf16.gmra.mrb[0].mxu0 %vm1370_vm5, %v13586_v29 }
 0x22f   : > { %8133 = vmatprep.mubr.msk.bf16.mxu0 %vm9169_vm1, %v13398_v32 }
 0x231   : > { %v2083_v10 = vpop.f32.mrb[152].mxu0 }
 0x232   : > { %v8019_v22 = vpop.f32.mrb[153].mxu0  ;;  %v11040_v34 = vadd.f32 %v2083_v10, %v10765_v46  ;;  %v13593_v10 = vld [vmem:[#allocation46_spill] sm:$0xff] }
 0x233   : > { %v2086_v31 = vpop.f32.mrb[154].mxu0  ;;  %v13594_v22 = vcombine.low %v13592_v39, %v13593_v10 }
 0x234   : > { %v8020_v45 = vpop.f32.mrb[155].mxu0  ;;  %v11043_v24 = vadd.f32 %v2086_v31, %v10768_v15  ;;  %8324 = vmatmul.mubr.msk.bf16.gmra.mrb[92].mxu1 %vm1370_vm5, %v13591_v18  ;;  %v13595_v31 = vld [vmem:[#allocation65_spill] sm:$0xff]  ;;  %v13596_v18 = vld [vmem:[#allocation48_spill] sm:$0xff] }
 0x235   : > { %8327 = vmatprep.mubr.msk.bf16.mxu1 %vm9169_vm1, %v13398_v32 }
 0x236   : > { %8134 = vmatmul.mubr.msk.bf16.gmra.mrb[4].mxu0 %vm1370_vm5, %v13590_v63 }
 0x237   : > { %8137 = vmatprep.mubr.msk.bf16.mxu0 %vm9169_vm1, %v13398_v32 }
 0x239   : > { %v2091_v57 = vpop.f32.mrb[156].mxu0 }
 0x23a   : > { %v8023_v46 = vpop.f32.mrb[157].mxu0  ;;  %v11056_v59 = vadd.f32 %v2091_v57, %v10779_v25  ;;  %v13597_v57 = vld [vmem:[#allocation49_spill] sm:$0xff] }
 0x23b   : > { %v2094_v15 = vpop.f32.mrb[158].mxu0  ;;  %v13598_v46 = vcombine.low %v13596_v18, %v13597_v57  ;;  %v409_v18 = vld [vmem:[%s9298_s28 + $0xb8] sm:$0xf]  ;;  %v9096_v57 = vld [vmem:[%s13168_s4] ss:$0 sm:$0xff] }
 0x23c   : > { %v8024_v12 = vpop.f32.mrb[159].mxu0  ;;  %v11059_v29 = vadd.f32 %v2094_v15, %v10782_v56  ;;  %8328 = vmatmul.mubr.msk.bf16.gmra.mrb[96].mxu1 %vm1370_vm5, %v13595_v31  ;;  %v13599_v15 = vld [vmem:[#allocation66_spill] sm:$0xff]  ;;  %v2428_v31 = vshll.u32 %v10864_v5, 16 }
 0x23d   : > { %8331 = vmatprep.mubr.msk.bf16.mxu1 %vm9169_vm1, %v13398_v32  ;;  %v13600_v12 = vld [vmem:[#allocation88_spill] sm:$0xff] }
 0x23e   : > { %8138 = vmatmul.mubr.msk.bf16.gmra.mrb[8].mxu0 %vm1370_vm5, %v13594_v22  ;;  %v2425_v22 = vshrl.u32 %v10864_v5, 16  ;;  %v2430_v5 = vrot.slane %v2428_v31, 5 }
 0x23f   : > { %8141 = vmatprep.mubr.msk.bf16.mxu0 %vm9169_vm1, %v13398_v32 }
 0x241   : > { %v2099_v45 = vpop.f32.mrb[160].mxu0 }
 0x242   : > { %v11072_v25 = vadd.f32 %v2099_v45, %v10798_v0  ;;  %v8027_v56 = vpop.f32.mrb[161].mxu0 }
 0x243   : > { %v2102_v44 = vpop.f32.mrb[162].mxu0 }
 0x244   : > { %v11075_v3 = vadd.f32 %v2102_v44, %v10801_v30  ;;  %v8028_v63 = vpop.f32.mrb[163].mxu0  ;;  %8332 = vmatmul.mubr.msk.bf16.gmra.mrb[100].mxu1 %vm1370_vm5, %v13599_v15  ;;  %v7551_v30 = vunpack.c.h.bf16 %v13600_v12  ;;  %v13602_v15 = vld [vmem:[#allocation58_spill] sm:$0xff]  ;;  %v2427_v12 = vrot.slane %v2425_v22, 4 }
 0x245   : > { %8335 = vmatprep.mubr.msk.bf16.mxu1 %vm9169_vm1, %v13398_v32  ;;  %v2438_v63 = vshrl.u32 %v10868_v41, 16 }
 0x246   : > { %8142 = vmatmul.mubr.msk.bf16.gmra.mrb[12].mxu0 %vm1370_vm5, %v13598_v46  ;;  %v547_v46 = vmul.f32 %v9096_v57, %v7551_v30  ;;  %v9097_v30 = vld [vmem:[%s13169_s5] ss:$0 sm:$0xff] }
 0x247   : > { %8145 = vmatprep.mubr.msk.bf16.mxu0 %vm9169_vm1, %v13398_v32 }
 0x248   : > { %v602_v22 = vadd.f32 %v9097_v30, %v547_v46  ;;  %v13606_v46 = vld [vmem:[#allocation61_spill] sm:$0xff] }
 0x249   : > { %v2107_v0 = vpop.f32.mrb[164].mxu0  ;;  %v13607_v9 = vcombine.low %v13605_v52, %v13606_v46 }
 0x24a   : > { %v11089_v39 = vadd.f32 %v2107_v0, %v10813_v43  ;;  %v8031_v10 = vpop.f32.mrb[165].mxu0  ;;  %v13601_v43 = vld [vmem:[#allocation53_spill] sm:$0xff]  ;;  %v650_v58 = vmax.f32 %v602_v22, 0.0 }
 0x24b   : > { %v2110_v45 = vpop.f32.mrb[166].mxu0  ;;  %v13603_v0 = vcombine.low %v13601_v43, %v13602_v15  ;;  %v2434_v10 = vshll.u32 %v10868_v41, 16  ;;  %v2431_v43 = vor.u32 %v2430_v5, %v2427_v12  ;;  %v13608_v5 = vld [vmem:[#allocation74_spill] sm:$0xff] }
 0x24c   : > { %v11094_v56 = vadd.f32 %v2110_v45, %v10816_v50  ;;  %v8032_v44 = vpop.f32.mrb[167].mxu0  ;;  %v493_v50 = vunpack.c.l.bf16 %v409_v18  ;;  %v13604_v45 = vld [vmem:[#allocation71_spill] sm:$0xff]  ;;  %v11139_v52 = vsel %vm10318_vm2, %v650_v58, 0.0 }
 0x24d   : > { %8336 = vmatmul.mubr.msk.bf16.gmra.mrb[104].mxu1 %vm1370_vm5, %v13604_v45  ;;  %v2440_v44 = vrot.slane %v2438_v63, 4  ;;  %v2436_v15 = vrot.slane %v2434_v10, 5  ;;  %v2444_v45 = vshll.u32 %v10889_v51, 16  ;;  %v2448_v63 = vshrl.u32 %v10889_v51, 16  ;;  %v13609_v51 = vld [vmem:[#allocation91_spill] sm:$0xff] }
 0x24e   : > { %8146 = vmatmul.mubr.msk.bf16.gmra.mrb[16].mxu0 %vm1370_vm5, %v13603_v0  ;;  %8339 = vmatprep.mubr.msk.bf16.mxu1 %vm9169_vm1, %v13398_v32  ;;  %v548_v0 = vmul.f32 %v9096_v57, %v493_v50 }
 0x24f   : > { %8149 = vmatprep.mubr.msk.bf16.mxu0 %vm9169_vm1, %v13398_v32  ;;  %v2441_v55 = vor.u32 %v2440_v44, %v2436_v15  ;;  %v2446_v57 = vrot.slane %v2444_v45, 5  ;;  %v2450_v12 = vrot.slane %v2448_v63, 4 }
 0x251   : > { %v2115_v21 = vpop.f32.mrb[168].mxu0 }
 0x252   : > { %v11116_v31 = vadd.f32 %v2115_v21, %v10827_v19  ;;  %v8035_v41 = vpop.f32.mrb[169].mxu0  ;;  %v2432_v19 = vrot.slane %v2431_v43, 4  ;;  %v603_v21 = vadd.f32 %v9097_v30, %v548_v0 }
 0x253   : > { %v2118_v18 = vpop.f32.mrb[170].mxu0 }
 0x254   : > { %v11121_v4 = vadd.f32 %v2118_v18, %v10830_v28  ;;  %v8036_v47 = vpop.f32.mrb[171].mxu0  ;;  %v2442_v28 = vrot.slane %v2441_v55, 4  ;;  %v11148_v41 = vsel %vm9451_vm6, %v2432_v19, %v2436_v15  ;;  %v651_v43 = vmax.f32 %v603_v21, 0.0  ;;  %v13615_v21 = vld [vmem:[#allocation62_spill] sm:$0xff] }
 0x255   : > { %8340 = vmatmul.mubr.msk.bf16.gmra.mrb[108].mxu1 %vm1370_vm5, %v13608_v5  ;;  %v11133_v47 = vpack.c.bf16 %v13609_v51, %v13609_v51  ;;  %v11144_v22 = vpop.f32.mrb[4].mxu1  ;;  %v2451_v18 = vor.u32 %v2450_v12, %v2446_v57  ;;  %v11163_v15 = vpack.c.bf16 %v11139_v52, %v11139_v52  ;;  %v13616_v12 = vld [vmem:[#allocation63_spill] sm:$0xff] }
 0x256   : > { %8150 = vmatmul.mubr.msk.bf16.gmra.mrb[20].mxu0 %vm1370_vm5, %v13607_v9  ;;  %8343 = vmatprep.mubr.msk.bf16.mxu1 %vm9169_vm1, %v13398_v32  ;;  %v8173_v63 = vpop.f32.mrb[5].mxu1  ;;  %v13617_v5 = vcombine.low %v13615_v21, %v13616_v12 }
 0x257   : > { %8153 = vmatprep.mubr.msk.bf16.mxu0 %vm9169_vm1, %v13398_v32  ;;  %13610 = vst [vmem:[#allocation21_spill] sm:$0xff] %v11133_v47  ;;  %13614 = vst [vmem:[#allocation69_spill] sm:$0xff] %v11163_v15  ;;  %v11165_v46 = vpop.f32.mrb[6].mxu1  ;;  %v3178_v19 = vshll.u32 %v11133_v47, 16  ;;  %v3184_v21 = vshll.u32 %v11163_v15, 16 }
 0x259   : > { %v2123_v10 = vpop.f32.mrb[172].mxu0  ;;  %v3180_v9 = vrot.slane %v3178_v19, 5  ;;  %v3186_v19 = vrot.slane %v3184_v21, 5  ;;  %v3188_v21 = vshrl.u32 %v11163_v15, 16 }
 0x25a   : > { %v11142_v50 = vadd.f32 %v2123_v10, %v10846_v42  ;;  %v8039_v44 = vpop.f32.mrb[173].mxu0  ;;  %v11159_v42 = vsel %vm9451_vm6, %v2442_v28, %v2446_v57  ;;  %v8174_v57 = vpop.f32.mrb[7].mxu1 }
 0x25b   : > { %v2126_v30 = vpop.f32.mrb[174].mxu0  ;;  %v7244_v10 = vcombine.low %v11148_v41, %v11159_v42  ;;  %v11177_v44 = vsel %vm808_vm4, %v651_v43, 0.0 }
 0x25c   : > { %v11151_v0 = vadd.f32 %v2126_v30, %v10851_v27  ;;  %v8040_v45 = vpop.f32.mrb[175].mxu0  ;;  %v3175_v27 = vshrl.u32 %v11133_v47, 16  ;;  %v2452_v30 = vrot.slane %v2451_v18, 4  ;;  %v11188_v43 = vpack.c.bf16 %v11177_v44, %v11177_v44  ;;  %v13619_v18 = vld [vmem:[#allocation4_spill] sm:$0xff] }
 0x25d   : > { %8344 = vmatmul.mubr.msk.bf16.gmra.mrb[112].mxu1 %vm1370_vm5, %v7244_v10  ;;  %v11184_v58 = vpop.f32.mrb[8].mxu1 }
 0x25e   : > { %8154 = vmatmul.mubr.msk.bf16.gmra.mrb[24].mxu0 %vm1370_vm5, %v13617_v5  ;;  %v3177_v28 = vrot.slane %v3175_v27, 4  ;;  %8347 = vmatprep.mubr.msk.bf16.mxu1 %vm9169_vm1, %v13398_v32  ;;  %13618 = vst [vmem:[#allocation39_spill] sm:$0xff] %v11188_v43  ;;  %v2457_v10 = vsel %vm9451_vm6, %v2452_v30, %v13619_v18  ;;  %v3194_v47 = vshll.u32 %v11188_v43, 16  ;;  %v3198_v35 = vshrl.u32 %v11188_v43, 16 }
 0x25f   : > { %8157 = vmatprep.mubr.msk.bf16.mxu0 %vm9169_vm1, %v13398_v32 }
 0x260   : > { %v3181_v63 = vor.u32 %v3180_v9, %v3177_v28  ;;  %v3200_v15 = vrot.slane %v3198_v35, 4 }
 0x261   : > { %v2131_v45 = vpop.f32.mrb[176].mxu0 }
 0x262   : > { %v2166_v12 = vadd.f32 %v2131_v45, %v10873_v36  ;;  %v8043_v5 = vpop.f32.mrb[177].mxu0  ;;  %v3182_v27 = vrot.slane %v3181_v63, 4  ;;  %v8177_v45 = vpop.f32.mrb[9].mxu1 }
 0x263   : > { %v2134_v57 = vpop.f32.mrb[178].mxu0  ;;  %v11197_v5 = vpop.f32.mrb[10].mxu1  ;;  %v3196_v45 = vrot.slane %v3194_v47, 5 }
 0x264   : > { %v2167_v28 = vadd.f32 %v2134_v57, %v10878_v33  ;;  %v11195_v9 = vadd.f32 %v10848_v8, %v2166_v12  ;;  %v8044_v36 = vpop.f32.mrb[179].mxu0  ;;  %v3187_v63 = vsel %vm9451_vm6, %v3182_v27, %v3186_v19  ;;  %v13622_v33 = vld [vmem:[#allocation67_spill] sm:$0xff]  ;;  %v13623_v57 = vld [vmem:[#allocation68_spill] sm:$0xff]  ;;  %v3190_v27 = vrot.slane %v3188_v21, 4 }
 0x265   : > { %v13624_v8 = vcombine.low %v13622_v33, %v13623_v57  ;;  %v7245_v12 = vcombine.low %v2457_v10, %v3187_v63  ;;  %v8178_v36 = vpop.f32.mrb[11].mxu1  ;;  %v13625_v33 = vld [vmem:[#allocation73_spill] sm:$0xff] }
 0x266   : > { %13620 = vst [vmem:[#allocation32_spill] sm:$0xff] %v11195_v9  ;;  %v11205_v30 = vadd.f32 %v10853_v6, %v2167_v28  ;;  %v3191_v6 = vor.u32 %v3190_v27, %v3186_v19  ;;  %v3201_v28 = vor.u32 %v3200_v15, %v3196_v45  ;;  %v7176_v57 = vcombine.low %v13625_v33, %v11148_v41  ;;  %v11221_v43 = vpop.f32.mrb[12].mxu1 }
 0x267   : > { %8158 = vmatmul.mubr.msk.bf16.gmra.mrb[28].mxu0 %vm1370_vm5, %v13624_v8  ;;  %8348 = vmatmul.mubr.msk.bf16.gmra.mrb[116].mxu1 %vm1370_vm5, %v7245_v12 }
 0x268   : > { %13621 = vst [vmem:[#allocation37_spill] sm:$0xff] %v11205_v30  ;;  %8161 = vmatprep.mubr.msk.bf16.mxu0 %vm9169_vm1, %v13398_v32  ;;  %8351 = vmatprep.mubr.msk.bf16.mxu1 %vm9169_vm1, %v13398_v32  ;;  %v3192_v47 = vrot.slane %v3191_v6, 4  ;;  %v3202_v35 = vrot.slane %v3201_v28, 4  ;;  %v8181_v30 = vpop.f32.mrb[13].mxu1 }
 0x269   : > { %v2270_v9 = vpop.f32.mrb[180].mxu0  ;;  %v11226_v38 = vpop.f32.mrb[14].mxu1 }
 0x26a   : > { %v11219_v63 = vadd.f32 %v2270_v9, %v10898_v7  ;;  %v8049_v8 = vpop.f32.mrb[181].mxu0  ;;  %v3197_v15 = vsel %vm9451_vm6, %v3192_v47, %v3196_v45  ;;  %v3207_v7 = vsel %vm9451_vm6, %v3202_v35, %v13619_v18  ;;  %v8182_v19 = vpop.f32.mrb[15].mxu1  ;;  %v7177_v9 = vcombine.low %v11159_v42, %v2457_v10 }
 0x26b   : > { %v2273_v36 = vpop.f32.mrb[182].mxu0  ;;  %v7246_v41 = vcombine.low %v3197_v15, %v3207_v7 }
 0x26c   : > { %v11224_v21 = vadd.f32 %v2273_v36, %v10901_v26  ;;  %v8050_v12 = vpop.f32.mrb[183].mxu0 }
 0x26f   : > { %8162 = vmatmul.mubr.msk.bf16.gmra.mrb[32].mxu0 %vm1370_vm5, %v7176_v57  ;;  %8352 = vmatmul.mubr.msk.bf16.gmra.mrb[120].mxu1 %vm1370_vm5, %v7246_v41  ;;  %v11241_v6 = vpop.f32.mrb[16].mxu1 }
 0x270   : > { %8165 = vmatprep.mubr.msk.bf16.mxu0 %vm9169_vm1, %v13398_v32  ;;  %v8185_v33 = vpop.f32.mrb[17].mxu1 }
 0x271   : > { %v2278_v26 = vpop.f32.mrb[184].mxu0  ;;  %v11246_v57 = vpop.f32.mrb[18].mxu1 }
 0x272   : > { %v11239_v30 = vadd.f32 %v2278_v26, %v10926_v11  ;;  %v8053_v27 = vpop.f32.mrb[185].mxu0  ;;  %v8186_v8 = vpop.f32.mrb[19].mxu1  ;;  %v419_v11 = vld [vmem:[%s13165_s1 + $0x20] sm:$0xf] }
 0x273   : > { %v2281_v45 = vpop.f32.mrb[186].mxu0  ;;  %v3435_v15 = vsel %vm1416_vm0, %v419_v11, 0 }
 0x274   : > { %v11244_v18 = vadd.f32 %v2281_v45, %v10932_v20  ;;  %v8054_v28 = vpop.f32.mrb[187].mxu0 }
 0x277   : > { %8166 = vmatmul.mubr.msk.bf16.gmra.mrb[36].mxu0 %vm1370_vm5, %v7177_v9  ;;  %v11257_v47 = vpop.f32.mrb[20].mxu1 }
 0x278   : > { %8233 = vmatprep.mubr.msk.bf16.mxu0 %vm9169_vm1, %v13398_v32  ;;  %v8189_v7 = vpop.f32.mrb[21].mxu1 }
 0x279   : > { %v2286_v42 = vpop.f32.mrb[188].mxu0  ;;  %v11263_v41 = vpop.f32.mrb[22].mxu1 }
 0x27a   : > { %v11255_v10 = vadd.f32 %v2286_v42, %v10946_v37  ;;  %v8057_v20 = vpop.f32.mrb[189].mxu0  ;;  %v8190_v19 = vpop.f32.mrb[23].mxu1 }
 0x27b   : > { %v2289_v36 = vpop.f32.mrb[190].mxu0 }
 0x27c   : > { %v11260_v35 = vadd.f32 %v2289_v36, %v10950_v54  ;;  %v8058_v12 = vpop.f32.mrb[191].mxu0 }
 0x27f   : > { %8234 = vmatmul.mubr.msk.bf16.vlgmr.msra.gmra.mrb[40].mxu0 %vm1370_vm5, %v10169_v16  ;;  %v11272_v27 = vpop.f32.mrb[24].mxu1  ;;  %v13626_v16 = vld [vmem:[#allocation76_spill] sm:$0xff] }
 0x280   : > { %8356 = vmatpush3.bf16.msra.mxu0 %v3435_v15  ;;  %8237 = vmatprep.mubr.msk.bf16.mxu0 %vm9169_vm1, %v13398_v32  ;;  %v8193_v33 = vpop.f32.mrb[25].mxu1 }
 0x281   : > { %v2294_v37 = vpop.f32.mrb[192].mxu0  ;;  %v11277_v8 = vpop.f32.mrb[26].mxu1 }
 0x282   : > { %v11270_v26 = vadd.f32 %v2294_v37, %v10966_v23  ;;  %v8061_v54 = vpop.f32.mrb[193].mxu0  ;;  %v8194_v42 = vpop.f32.mrb[27].mxu1  ;;  %v13627_v37 = vld [vmem:[#allocation77_spill] sm:$0xff] }
 0x283   : > { %v2297_v9 = vpop.f32.mrb[194].mxu0 }
 0x284   : > { %v11275_v45 = vadd.f32 %v2297_v9, %v10969_v49  ;;  %v8062_v28 = vpop.f32.mrb[195].mxu0 }
 0x287   : > { %8238 = vmatmul.mubr.msk.bf16.gmra.mrb[44].mxu0 %vm1370_vm5, %v13626_v16  ;;  %v11286_v12 = vpop.f32.mrb[28].mxu1 }
 0x288   : > { %8241 = vmatprep.mubr.msk.bf16.mxu0 %vm9169_vm1, %v13398_v32  ;;  %v8197_v7 = vpop.f32.mrb[29].mxu1 }
 0x289   : > { %v2302_v23 = vpop.f32.mrb[196].mxu0  ;;  %v11291_v19 = vpop.f32.mrb[30].mxu1 }
 0x28a   : > { %v11284_v11 = vadd.f32 %v2302_v23, %v10981_v14  ;;  %v8065_v20 = vpop.f32.mrb[197].mxu0  ;;  %v8198_v54 = vpop.f32.mrb[31].mxu1 }
 0x28b   : > { %v2305_v36 = vpop.f32.mrb[198].mxu0 }
 0x28c   : > { %v11289_v49 = vadd.f32 %v2305_v36, %v10984_v40  ;;  %v8066_v15 = vpop.f32.mrb[199].mxu0 }
 0x28f   : > { %8242 = vmatmul.mubr.msk.bf16.gmra.mrb[48].mxu0 %vm1370_vm5, %v13627_v37  ;;  %v11300_v16 = vpop.f32.mrb[32].mxu1 }
 0x290   : > { %8245 = vmatprep.mubr.msk.bf16.mxu0 %vm9169_vm1, %v13398_v32  ;;  %v8201_v23 = vpop.f32.mrb[33].mxu1 }
 0x291   : > { %v2310_v14 = vpop.f32.mrb[200].mxu0  ;;  %v11305_v20 = vpop.f32.mrb[34].mxu1 }
 0x292   : > { %v11298_v9 = vadd.f32 %v2310_v14, %v10996_v2  ;;  %v8069_v28 = vpop.f32.mrb[201].mxu0  ;;  %v8202_v36 = vpop.f32.mrb[35].mxu1 }
 0x293   : > { %v2313_v33 = vpop.f32.mrb[202].mxu0 }
 0x294   : > { %v11303_v40 = vadd.f32 %v2313_v33, %v10999_v61  ;;  %v8070_v42 = vpop.f32.mrb[203].mxu0 }
 0x297   : > { %8246 = vmatmul.mubr.msk.bf16.gmra.mrb[52].mxu0 %vm1370_vm5, %v10198_v53  ;;  %v11314_v54 = vpop.f32.mrb[36].mxu1  ;;  %v13628_v53 = vld [vmem:[#allocation78_spill] sm:$0xff] }
 0x298   : > { %8249 = vmatprep.mubr.msk.bf16.mxu0 %vm9169_vm1, %v13398_v32  ;;  %v8205_v28 = vpop.f32.mrb[37].mxu1 }
 0x299   : > { %v2318_v2 = vpop.f32.mrb[204].mxu0  ;;  %v11319_v33 = vpop.f32.mrb[38].mxu1 }
 0x29a   : > { %v11312_v15 = vadd.f32 %v2318_v2, %v11011_v62  ;;  %v8073_v7 = vpop.f32.mrb[205].mxu0  ;;  %v8206_v42 = vpop.f32.mrb[39].mxu1 }
 0x29b   : > { %v2321_v37 = vpop.f32.mrb[206].mxu0 }
 0x29c   : > { %v11317_v61 = vadd.f32 %v2321_v37, %v11014_v60  ;;  %v8074_v14 = vpop.f32.mrb[207].mxu0 }
 0x29f   : > { %8250 = vmatmul.mubr.msk.bf16.gmra.mrb[56].mxu0 %vm1370_vm5, %v13628_v53  ;;  %v11328_v7 = vpop.f32.mrb[40].mxu1  ;;  %v13630_v53 = vld [vmem:[#allocation79_spill] sm:$0xff] }
 0x2a0   : > { %8253 = vmatprep.mubr.msk.bf16.mxu0 %vm9169_vm1, %v13398_v32  ;;  %13629 = vst [vmem:[#allocation38_spill] sm:$0xff] %v11328_v7  ;;  %v8209_v14 = vpop.f32.mrb[41].mxu1 }
 0x2a1   : > { %v2326_v62 = vpop.f32.mrb[208].mxu0  ;;  %v11333_v28 = vpop.f32.mrb[42].mxu1 }
 0x2a2   : > { %v11326_v23 = vadd.f32 %v2326_v62, %v11024_v13  ;;  %v8077_v36 = vpop.f32.mrb[209].mxu0  ;;  %v8210_v42 = vpop.f32.mrb[43].mxu1 }
 0x2a3   : > { %v2329_v2 = vpop.f32.mrb[210].mxu0 }
 0x2a4   : > { %v11331_v60 = vadd.f32 %v2329_v2, %v11027_v1  ;;  %v8078_v37 = vpop.f32.mrb[211].mxu0 }
 0x2a7   : > { %8254 = vmatmul.mubr.msk.bf16.gmra.mrb[60].mxu0 %vm1370_vm5, %v13630_v53  ;;  %v11342_v7 = vpop.f32.mrb[44].mxu1 }
 0x2a8   : > { %8257 = vmatprep.mubr.msk.bf16.mxu0 %vm9169_vm1, %v13398_v32  ;;  %13631 = vst [vmem:[#allocation20_spill] sm:$0xff] %v11342_v7  ;;  %v8213_v37 = vpop.f32.mrb[45].mxu1 }
 0x2a9   : > { %v2334_v13 = vpop.f32.mrb[212].mxu0  ;;  %v11347_v14 = vpop.f32.mrb[46].mxu1 }
 0x2aa   : > { %v11340_v62 = vadd.f32 %v2334_v13, %v11040_v34  ;;  %v8081_v36 = vpop.f32.mrb[213].mxu0  ;;  %13632 = vst [vmem:[#allocation30_spill] sm:$0xff] %v11347_v14  ;;  %v8214_v53 = vpop.f32.mrb[47].mxu1 }
 0x2ab   : > { %v2337_v55 = vpop.f32.mrb[214].mxu0 }
 0x2ac   : > { %v11345_v1 = vadd.f32 %v2337_v55, %v11043_v24  ;;  %v8082_v2 = vpop.f32.mrb[215].mxu0 }
 0x2af   : > { %8258 = vmatmul.mubr.msk.bf16.gmra.mrb[64].mxu0 %vm1370_vm5, %v13543_v17  ;;  %v11356_v7 = vpop.f32.mrb[48].mxu1  ;;  %v13635_v17 = vld [vmem:[#allocation81_spill] sm:$0xff] }
 0x2b0   : > { %8261 = vmatprep.mubr.msk.bf16.mxu0 %vm9169_vm1, %v13398_v32  ;;  %13633 = vst [vmem:[#allocation80_spill] sm:$0xff] %v11356_v7  ;;  %v8217_v2 = vpop.f32.mrb[49].mxu1 }
 0x2b1   : > { %v2342_v34 = vpop.f32.mrb[216].mxu0  ;;  %v11361_v37 = vpop.f32.mrb[50].mxu1 }
 0x2b2   : > { %v11354_v42 = vadd.f32 %v2342_v34, %v11056_v59  ;;  %v8085_v13 = vpop.f32.mrb[217].mxu0  ;;  %13634 = vst [vmem:[#allocation44_spill] sm:$0xff] %v11361_v37  ;;  %v8218_v53 = vpop.f32.mrb[51].mxu1 }
 0x2b3   : > { %v2345_v36 = vpop.f32.mrb[218].mxu0 }
 0x2b4   : > { %v11359_v24 = vadd.f32 %v2345_v36, %v11059_v29  ;;  %v8086_v55 = vpop.f32.mrb[219].mxu0 }
 0x2b7   : > { %8262 = vmatmul.mubr.msk.bf16.gmra.mrb[68].mxu0 %vm1370_vm5, %v13635_v17  ;;  %v11370_v14 = vpop.f32.mrb[52].mxu1  ;;  %v13637_v17 = vld [vmem:[#allocation82_spill] sm:$0xff] }
 0x2b8   : > { %8265 = vmatprep.mubr.msk.bf16.mxu0 %vm9169_vm1, %v13398_v32  ;;  %13636 = vst [vmem:[#allocation33_spill] sm:$0xff] %v11370_v14  ;;  %v8221_v55 = vpop.f32.mrb[53].mxu1 }
 0x2b9   : > { %v2350_v59 = vpop.f32.mrb[220].mxu0  ;;  %v11375_v2 = vpop.f32.mrb[54].mxu1 }
 0x2ba   : > { %v11368_v34 = vadd.f32 %v2350_v59, %v11072_v25  ;;  %v8089_v13 = vpop.f32.mrb[221].mxu0  ;;  %v8222_v53 = vpop.f32.mrb[55].mxu1 }
 0x2bb   : > { %v2353_v7 = vpop.f32.mrb[222].mxu0 }
 0x2bc   : > { %v11373_v29 = vadd.f32 %v2353_v7, %v11075_v3  ;;  %v8090_v36 = vpop.f32.mrb[223].mxu0 }
 0x2bf   : > { %8266 = vmatmul.mubr.msk.bf16.gmra.mrb[72].mxu0 %vm1370_vm5, %v13637_v17  ;;  %v11384_v37 = vpop.f32.mrb[56].mxu1 }
 0x2c0   : > { %8269 = vmatprep.mubr.msk.bf16.mxu0 %vm9169_vm1, %v13398_v32  ;;  %13638 = vst [vmem:[#allocation93_spill] sm:$0xff] %v11384_v37  ;;  %v8225_v36 = vpop.f32.mrb[57].mxu1 }
 0x2c1   : > { %v2358_v25 = vpop.f32.mrb[224].mxu0  ;;  %v11389_v55 = vpop.f32.mrb[58].mxu1 }
 0x2c2   : > { %v11382_v59 = vadd.f32 %v2358_v25, %v11089_v39  ;;  %v8093_v13 = vpop.f32.mrb[225].mxu0  ;;  %13639 = vst [vmem:[#allocation41_spill] sm:$0xff] %v11389_v55  ;;  %v8226_v17 = vpop.f32.mrb[59].mxu1 }
 0x2c3   : > { %v2361_v14 = vpop.f32.mrb[226].mxu0 }
 0x2c4   : > { %v11387_v3 = vadd.f32 %v2361_v14, %v11094_v56  ;;  %v8094_v7 = vpop.f32.mrb[227].mxu0 }
 0x2c7   : > { %8270 = vmatmul.mubr.msk.bf16.gmra.mrb[76].mxu0 %vm1370_vm5, %v13555_v48  ;;  %v11398_v37 = vpop.f32.mrb[60].mxu1  ;;  %v13642_v48 = vld [vmem:[#allocation86_spill] sm:$0xff] }
 0x2c8   : > { %8273 = vmatprep.mubr.msk.bf16.mxu0 %vm9169_vm1, %v13398_v32  ;;  %13640 = vst [vmem:[#allocation95_spill] sm:$0xff] %v11398_v37  ;;  %v8229_v7 = vpop.f32.mrb[61].mxu1 }
 0x2c9   : > { %v2366_v39 = vpop.f32.mrb[228].mxu0  ;;  %v11403_v36 = vpop.f32.mrb[62].mxu1 }
 0x2ca   : > { %v11396_v53 = vadd.f32 %v2366_v39, %v11116_v31  ;;  %v8097_v25 = vpop.f32.mrb[229].mxu0  ;;  %13641 = vst [vmem:[#allocation70_spill] sm:$0xff] %v11403_v36  ;;  %v8230_v17 = vpop.f32.mrb[63].mxu1 }
 0x2cb   : > { %v2369_v13 = vpop.f32.mrb[230].mxu0 }
 0x2cc   : > { %v11401_v56 = vadd.f32 %v2369_v13, %v11121_v4  ;;  %v8098_v14 = vpop.f32.mrb[231].mxu0 }
 0x2cf   : > { %8274 = vmatmul.mubr.msk.bf16.gmra.mrb[80].mxu0 %vm1370_vm5, %v13642_v48  ;;  %v11412_v55 = vpop.f32.mrb[64].mxu1  ;;  %v13645_v48 = vld [vmem:[#allocation90_spill] sm:$0xff] }
 0x2d0   : > { %8277 = vmatprep.mubr.msk.bf16.mxu0 %vm9169_vm1, %v13398_v32  ;;  %13643 = vst [vmem:[#allocation50_spill] sm:$0xff] %v11412_v55  ;;  %v8297_v14 = vpop.f32.mrb[65].mxu1 }
 0x2d1   : > { %v2374_v31 = vpop.f32.mrb[232].mxu0  ;;  %v11417_v7 = vpop.f32.mrb[66].mxu1 }
 0x2d2   : > { %v11410_v39 = vadd.f32 %v2374_v31, %v11142_v50  ;;  %v8101_v25 = vpop.f32.mrb[233].mxu0  ;;  %13644 = vst [vmem:[#allocation54_spill] sm:$0xff] %v11417_v7  ;;  %v8298_v17 = vpop.f32.mrb[67].mxu1 }
 0x2d3   : > { %v2377_v37 = vpop.f32.mrb[234].mxu0  ;;  %v13648_v17 = vld [vmem:[#allocation87_spill] sm:$0xff] }
 0x2d4   : > { %v11415_v4 = vadd.f32 %v2377_v37, %v11151_v0  ;;  %v8102_v13 = vpop.f32.mrb[235].mxu0 }
 0x2d7   : > { %8278 = vmatmul.mubr.msk.bf16.gmra.mrb[84].mxu0 %vm1370_vm5, %v13645_v48  ;;  %v11424_v55 = vpop.f32.mrb[68].mxu1 }
 0x2d8   : > { %8281 = vmatprep.mubr.msk.bf16.mxu0 %vm9169_vm1, %v13398_v32  ;;  %13646 = vst [vmem:[#allocation56_spill] sm:$0xff] %v11424_v55  ;;  %v8301_v14 = vpop.f32.mrb[69].mxu1 }
 0x2d9   : > { %v2558_v50 = vpop.f32.mrb[236].mxu0  ;;  %v11430_v7 = vpop.f32.mrb[70].mxu1 }
 0x2da   : > { %v2677_v31 = vadd.f32 %v2558_v50, %v11219_v63  ;;  %v8111_v25 = vpop.f32.mrb[237].mxu0  ;;  %13647 = vst [vmem:[#allocation45_spill] sm:$0xff] %v11430_v7  ;;  %v8302_v63 = vpop.f32.mrb[71].mxu1 }
 0x2db   : > { %v2561_v36 = vpop.f32.mrb[238].mxu0 }
 0x2dc   : > { %v2678_v0 = vadd.f32 %v2561_v36, %v11224_v21  ;;  %v11428_v37 = vadd.f32 %v11144_v22, %v2677_v31  ;;  %v8112_v13 = vpop.f32.mrb[239].mxu0  ;;  %v880_v21 = vpack.c.bf16 %v11139_v52, %v13609_v51  ;;  %v881_v22 = vpack.c.bf16 %v13398_v32, %v11177_v44  ;;  %v13649_v44 = vld [vmem:[#allocation85_spill] sm:$0xff] }
 0x2de   : > { %v11433_v48 = vadd.f32 %v11165_v46, %v2678_v0  ;;  %v2969_v7 = vunpack.c.h.b16 %v880_v21  ;;  %v2970_v52 = vunpack.c.l.b16 %v881_v22 }
 0x2df   : > { %8282 = vmatmul.mubr.msk.bf16.gmra.mrb[88].mxu0 %vm1370_vm5, %v13648_v17  ;;  %v11444_v46 = vpop.f32.mrb[72].mxu1 }
 0x2e0   : > { %8285 = vmatprep.mubr.msk.bf16.mxu0 %vm9169_vm1, %v13398_v32  ;;  %v8305_v17 = vpop.f32.mrb[73].mxu1 }
 0x2e1   : > { %v2566_v50 = vpop.f32.mrb[240].mxu0  ;;  %v11450_v63 = vpop.f32.mrb[74].mxu1 }
 0x2e2   : > { %v2679_v36 = vadd.f32 %v2566_v50, %v11239_v30  ;;  %v8115_v31 = vpop.f32.mrb[241].mxu0  ;;  %v13650_v30 = vpack.c.bf16 %v13609_v51, %v13649_v44  ;;  %v8306_v50 = vpop.f32.mrb[75].mxu1 }
 0x2e3   : > { %v2569_v25 = vpop.f32.mrb[242].mxu0 }
 0x2e4   : > { %v2680_v0 = vadd.f32 %v2569_v25, %v11244_v18  ;;  %v11448_v13 = vadd.f32 %v11184_v58, %v2679_v36  ;;  %v8116_v14 = vpop.f32.mrb[243].mxu0  ;;  %v2973_v18 = vpack.c.b16 %v2970_v52, %v2969_v7 }
 0x2e6   : > { %v11453_v55 = vadd.f32 %v11197_v5, %v2680_v0 }
 0x2e7   : > { %8286 = vmatmul.mubr.msk.bf16.gmra.mrb[92].mxu0 %vm1370_vm5, %v13650_v30  ;;  %v11462_v21 = vpop.f32.mrb[76].mxu1 }
 0x2e8   : > { %8289 = vmatprep.mubr.msk.bf16.mxu0 %vm9169_vm1, %v13398_v32  ;;  %v8309_v0 = vpop.f32.mrb[77].mxu1 }
 0x2e9   : > { %v2574_v58 = vpop.f32.mrb[244].mxu0  ;;  %v11468_v14 = vpop.f32.mrb[78].mxu1 }
 0x2ea   : > { %v2681_v36 = vadd.f32 %v2574_v58, %v11255_v10  ;;  %v8119_v31 = vpop.f32.mrb[245].mxu0  ;;  %v8310_v7 = vpop.f32.mrb[79].mxu1 }
 0x2eb   : > { %v2577_v25 = vpop.f32.mrb[246].mxu0  ;;  %v13651_v31 = vld [vmem:[#allocation9_spill] sm:$0xff] }
 0x2ec   : > { %v2682_v5 = vadd.f32 %v2577_v25, %v11260_v35  ;;  %v11466_v22 = vadd.f32 %v11221_v43, %v2681_v36  ;;  %v8120_v51 = vpop.f32.mrb[247].mxu0 }
 0x2ee   : > { %v11471_v17 = vadd.f32 %v11226_v38, %v2682_v5 }
 0x2ef   : > { %8290 = vmatmul.mubr.msk.bf16.gmra.mrb[96].mxu0 %vm1370_vm5, %v2973_v18  ;;  %v11477_v43 = vpop.f32.mrb[80].mxu1 }
 0x2f0   : > { %8357 = vmatprep.mubr.msk.bf16.mxu0 %vm9169_vm1, %v13398_v32  ;;  %v8313_v58 = vpop.f32.mrb[81].mxu1 }
 0x2f1   : > { %v2582_v10 = vpop.f32.mrb[248].mxu0  ;;  %v11483_v36 = vpop.f32.mrb[82].mxu1 }
 0x2f2   : > { %v2683_v52 = vadd.f32 %v2582_v10, %v11270_v26  ;;  %v8123_v35 = vpop.f32.mrb[249].mxu0  ;;  %v8314_v26 = vpop.f32.mrb[83].mxu1 }
 0x2f3   : > { %v2585_v44 = vpop.f32.mrb[250].mxu0 }
 0x2f4   : > { %v2684_v30 = vadd.f32 %v2585_v44, %v11275_v45  ;;  %v11481_v50 = vadd.f32 %v11241_v6, %v2683_v52  ;;  %v8124_v38 = vpop.f32.mrb[251].mxu0  ;;  %v13652_v44 = vld [vmem:[#allocation8_spill] sm:$0xff] }
 0x2f6   : > { %v11486_v18 = vadd.f32 %v11246_v57, %v2684_v30 }
 0x2f7   : > { %8358 = vmatmul.mubr.msk.bf16.vlgmr.msra.gmra.mrb[100].mxu0 %vm1370_vm5, %v13651_v31  ;;  %v11493_v51 = vpop.f32.mrb[84].mxu1 }
 0x2f8   : > { %8361 = vmatprep.mubr.msk.bf16.mxu0 %vm9169_vm1, %v13398_v32  ;;  %v8317_v10 = vpop.f32.mrb[85].mxu1 }
 0x2f9   : > { %v2590_v25 = vpop.f32.mrb[252].mxu0  ;;  %v11499_v52 = vpop.f32.mrb[86].mxu1 }
 0x2fa   : > { %v2685_v45 = vadd.f32 %v2590_v25, %v11284_v11  ;;  %v8127_v5 = vpop.f32.mrb[253].mxu0  ;;  %v8318_v11 = vpop.f32.mrb[87].mxu1 }
 0x2fb   : > { %v2593_v6 = vpop.f32.mrb[254].mxu0 }
 0x2fc   : > { %v2686_v0 = vadd.f32 %v2593_v6, %v11289_v49  ;;  %v11497_v7 = vadd.f32 %v11257_v47, %v2685_v45  ;;  %v8128_v57 = vpop.f32.mrb[255].mxu0  ;;  %v13653_v6 = vld [vmem:[#allocation10_spill] sm:$0xff] }
 0x2fe   : > { %v11502_v35 = vadd.f32 %v11263_v41, %v2686_v0 }
 0x2ff   : > { %8362 = vmatmul.mubr.msk.bf16.gmra.mrb[104].mxu0 %vm1370_vm5, %v13652_v44  ;;  %v11509_v58 = vpop.f32.mrb[88].mxu1 }
 0x300   : > { %8365 = vmatprep.mubr.msk.bf16.mxu0 %vm9169_vm1, %v13398_v32  ;;  %v8321_v25 = vpop.f32.mrb[89].mxu1 }
 0x301   : > { %v2598_v30 = vpop.f32.mrb[0].mxu0  ;;  %v11515_v45 = vpop.f32.mrb[90].mxu1 }
 0x302   : > { %v2687_v49 = vadd.f32 %v2598_v30, %v11298_v9  ;;  %v8131_v38 = vpop.f32.mrb[1].mxu0  ;;  %v8322_v9 = vpop.f32.mrb[91].mxu1 }
 0x303   : > { %v2601_v47 = vpop.f32.mrb[2].mxu0 }
 0x304   : > { %v2688_v31 = vadd.f32 %v2601_v47, %v11303_v40  ;;  %v11513_v26 = vadd.f32 %v11272_v27, %v2687_v49  ;;  %v8132_v41 = vpop.f32.mrb[3].mxu0  ;;  %v13654_v47 = vld [vmem:[#allocation17_spill] sm:$0xff] }
 0x306   : > { %v11518_v5 = vadd.f32 %v11277_v8, %v2688_v31 }
 0x307   : > { %8366 = vmatmul.mubr.msk.bf16.gmra.mrb[108].mxu0 %vm1370_vm5, %v13653_v6  ;;  %v11525_v10 = vpop.f32.mrb[92].mxu1 }
 0x308   : > { %8369 = vmatprep.mubr.msk.bf16.mxu0 %vm9169_vm1, %v13398_v32  ;;  %v8325_v30 = vpop.f32.mrb[93].mxu1 }
 0x309   : > { %v2606_v0 = vpop.f32.mrb[4].mxu0  ;;  %v11531_v49 = vpop.f32.mrb[94].mxu1 }
 0x30a   : > { %v2689_v40 = vadd.f32 %v2606_v0, %v11312_v15  ;;  %v8135_v57 = vpop.f32.mrb[5].mxu0  ;;  %v8326_v15 = vpop.f32.mrb[95].mxu1 }
 0x30b   : > { %v2609_v27 = vpop.f32.mrb[6].mxu0 }
 0x30c   : > { %v2690_v44 = vadd.f32 %v2609_v27, %v11317_v61  ;;  %v11529_v11 = vadd.f32 %v11286_v12, %v2689_v40  ;;  %v8136_v8 = vpop.f32.mrb[7].mxu0  ;;  %v13655_v27 = vld [vmem:[#allocation23_spill] sm:$0xff] }
 0x30e   : > { %v11534_v38 = vadd.f32 %v11291_v19, %v2690_v44 }
 0x30f   : > { %8370 = vmatmul.mubr.msk.bf16.gmra.mrb[112].mxu0 %vm1370_vm5, %v13654_v47  ;;  %v11541_v25 = vpop.f32.mrb[96].mxu1 }
 0x310   : > { %8373 = vmatprep.mubr.msk.bf16.mxu0 %vm9169_vm1, %v13398_v32  ;;  %v8329_v0 = vpop.f32.mrb[97].mxu1 }
 0x311   : > { %v2614_v31 = vpop.f32.mrb[8].mxu0  ;;  %v11547_v40 = vpop.f32.mrb[98].mxu1 }
 0x312   : > { %v2691_v61 = vadd.f32 %v2614_v31, %v11326_v23  ;;  %v8139_v41 = vpop.f32.mrb[9].mxu0  ;;  %v8330_v23 = vpop.f32.mrb[99].mxu1 }
 0x313   : > { %v2617_v12 = vpop.f32.mrb[10].mxu0  ;;  %v13657_v23 = vld [vmem:[#allocation38_spill] sm:$0xff] }
 0x314   : > { %v2692_v6 = vadd.f32 %v2617_v12, %v11331_v60  ;;  %v11545_v9 = vadd.f32 %v11300_v16, %v2691_v61  ;;  %v8140_v19 = vpop.f32.mrb[11].mxu0  ;;  %v13656_v12 = vld [vmem:[#allocation40_spill] sm:$0xff] }
 0x316   : > { %v11550_v57 = vadd.f32 %v11305_v20, %v2692_v6 }
 0x317   : > { %8374 = vmatmul.mubr.msk.bf16.gmra.mrb[116].mxu0 %vm1370_vm5, %v13655_v27  ;;  %v11557_v30 = vpop.f32.mrb[100].mxu1 }
 0x318   : > { %8377 = vmatprep.mubr.msk.bf16.mxu0 %vm9169_vm1, %v13398_v32  ;;  %v8333_v31 = vpop.f32.mrb[101].mxu1 }
 0x319   : > { %v2622_v44 = vpop.f32.mrb[12].mxu0  ;;  %v11563_v61 = vpop.f32.mrb[102].mxu1 }
 0x31a   : > { %v2693_v60 = vadd.f32 %v2622_v44, %v11340_v62  ;;  %v8143_v8 = vpop.f32.mrb[13].mxu0  ;;  %v8334_v62 = vpop.f32.mrb[103].mxu1 }
 0x31b   : > { %v2625_v16 = vpop.f32.mrb[14].mxu0 }
 0x31c   : > { %v2694_v47 = vadd.f32 %v2625_v16, %v11345_v1  ;;  %v11561_v15 = vadd.f32 %v11314_v54, %v2693_v60  ;;  %v8144_v20 = vpop.f32.mrb[15].mxu0  ;;  %v9085_v54 = vld [vmem:[%s13167_s3 + $0x8] sm:$0xff]  }
 0x31d   : > { %8417 = vmatprep.subr.bf16.mxu1 %v9085_v54 }
 0x31e   : > { %v11566_v41 = vadd.f32 %v11319_v33, %v2694_v47  ;;  %8418 = vmatpush3.bf16.msra.mxu1 %v9085_v54  ;;  %v13658_v47 = vld [vmem:[#allocation94_spill] sm:$0xff] }
 0x31f   : > { %8378 = vmatmul.mubr.msk.bf16.gmra.mrb[120].mxu0 %vm1370_vm5, %v13656_v12 }
 0x320   : > { %8381 = vmatprep.mubr.msk.bf16.mxu0 %vm9169_vm1, %v13398_v32  ;;  %v11576_v27 = vpop.f32.mrb[104].mxu1 }
 0x321   : > { %v2630_v6 = vpop.f32.mrb[16].mxu0  ;;  %v8337_v8 = vpop.f32.mrb[105].mxu1 }
 0x322   : > { %v2695_v1 = vadd.f32 %v2630_v6, %v11354_v42  ;;  %v8147_v19 = vpop.f32.mrb[17].mxu0  ;;  %v11582_v16 = vpop.f32.mrb[106].mxu1  ;;  %v13661_v8 = vld [vmem:[#allocation51_spill] sm:$0xff] }
 0x323   : > { %v2633_v0 = vpop.f32.mrb[18].mxu0  ;;  %v8338_v20 = vpop.f32.mrb[107].mxu1  ;;  %v13659_v19 = vld [vmem:[#allocation20_spill] sm:$0xff] }
 0x324   : > { %v2696_v33 = vadd.f32 %v2633_v0, %v11359_v24  ;;  %v11580_v44 = vadd.f32 %v13657_v23, %v2695_v1  ;;  %v8148_v60 = vpop.f32.mrb[19].mxu0  ;;  %v13660_v23 = vld [vmem:[#allocation30_spill] sm:$0xff] }
 0x326   : > { %v11585_v42 = vadd.f32 %v11333_v28, %v2696_v33 }
 0x327   : > { %8382 = vmatmul.mubr.msk.bf16.gmra.mrb[124].mxu0 %vm1370_vm5, %v13658_v47 }
 0x328   : > { %8385 = vmatprep.mubr.msk.bf16.mxu0 %vm9169_vm1, %v13398_v32  ;;  %v11592_v6 = vpop.f32.mrb[108].mxu1 }
 0x329   : > { %v2638_v24 = vpop.f32.mrb[20].mxu0  ;;  %v8341_v0 = vpop.f32.mrb[109].mxu1 }
 0x32a   : > { %v2697_v31 = vadd.f32 %v2638_v24, %v11368_v34  ;;  %v8151_v12 = vpop.f32.mrb[21].mxu0  ;;  %v11598_v33 = vpop.f32.mrb[110].mxu1 }
 0x32b   : > { %v2641_v62 = vpop.f32.mrb[22].mxu0  ;;  %v8342_v34 = vpop.f32.mrb[111].mxu1 }
 0x32c   : > { %v2698_v1 = vadd.f32 %v2641_v62, %v11373_v29  ;;  %v11596_v54 = vadd.f32 %v13659_v19, %v2697_v31  ;;  %v8152_v28 = vpop.f32.mrb[23].mxu0  ;;  %v13663_v62 = vld [vmem:[#allocation80_spill] sm:$0xff]  ;;  %v13666_v34 = vld [vmem:[#allocation98_spill] sm:$0xff] }
 0x32e   : > { %v11601_v60 = vadd.f32 %v13660_v23, %v2698_v1  ;;  %v13665_v23 = vld [vmem:[#allocation44_spill] sm:$0xff] }
 0x32f   : > { %8386 = vmatmul.mubr.msk.bf16.gmra.mrb[128].mxu0 %vm1370_vm5, %v13661_v8 }
 0x330   : > { %8389 = vmatprep.mubr.msk.bf16.mxu0 %vm9169_vm1, %v13398_v32  ;;  %v11608_v31 = vpop.f32.mrb[112].mxu1 }
 0x331   : > { %v2646_v47 = vpop.f32.mrb[24].mxu0  ;;  %13662 = vst [vmem:[#allocation96_spill] sm:$0xff] %v11608_v31  ;;  %v8345_v28 = vpop.f32.mrb[113].mxu1 }
 0x332   : > { %v2699_v29 = vadd.f32 %v2646_v47, %v11382_v59  ;;  %v8155_v20 = vpop.f32.mrb[25].mxu0  ;;  %v11614_v0 = vpop.f32.mrb[114].mxu1 }
 0x333   : > { %v2649_v24 = vpop.f32.mrb[26].mxu0  ;;  %13664 = vst [vmem:[#allocation55_spill] sm:$0xff] %v11614_v0  ;;  %v8346_v59 = vpop.f32.mrb[115].mxu1 }
 0x334   : > { %v2700_v12 = vadd.f32 %v2649_v24, %v11387_v3  ;;  %v11612_v19 = vadd.f32 %v13663_v62, %v2699_v29  ;;  %v8156_v1 = vpop.f32.mrb[27].mxu0  ;;  %v13670_v59 = vld [vmem:[#allocation57_spill] sm:$0xff] }
 0x335   : > { %v13668_v1 = vld [vmem:[#allocation33_spill] sm:$0xff] }
 0x336   : > { %v11617_v8 = vadd.f32 %v13665_v23, %v2700_v12 }
 0x337   : > { %8390 = vmatmul.mubr.msk.bf16.gmra.mrb[132].mxu0 %vm1370_vm5, %v13666_v34 }
 0x338   : > { %8393 = vmatprep.mubr.msk.bf16.mxu0 %vm9169_vm1, %v13398_v32 }
 0x33a   : > { %v2654_v47 = vpop.f32.mrb[28].mxu0  ;;  %v11624_v24 = vpop.f32.mrb[116].mxu1 }
 0x33b   : > { %v2701_v3 = vadd.f32 %v2654_v47, %v11396_v53  ;;  %v8159_v20 = vpop.f32.mrb[29].mxu0  ;;  %13667 = vst [vmem:[#allocation83_spill] sm:$0xff] %v11624_v24  ;;  %v8349_v23 = vpop.f32.mrb[117].mxu1  ;;  %v13677_v24 = vld [vmem:[#allocation101_spill] sm:$0xff] }
 0x33c   : > { %v2657_v29 = vpop.f32.mrb[30].mxu0  ;;  %v11630_v0 = vpop.f32.mrb[118].mxu1 }
 0x33d   : > { %v2702_v62 = vadd.f32 %v2657_v29, %v11401_v56  ;;  %v11628_v28 = vadd.f32 %v13668_v1, %v2701_v3  ;;  %v8160_v12 = vpop.f32.mrb[31].mxu0  ;;  %13669 = vst [vmem:[#allocation84_spill] sm:$0xff] %v11630_v0  ;;  %v8350_v53 = vpop.f32.mrb[119].mxu1 }
 0x33e   : > { %v13672_v12 = vld [vmem:[#allocation93_spill] sm:$0xff] }
 0x33f   : > { %v11633_v34 = vadd.f32 %v11375_v2, %v2702_v62  ;;  %8394 = vmatmul.mubr.msk.bf16.gmra.mrb[136].mxu0 %vm1370_vm5, %v13670_v59  ;;  %v13675_v59 = vld [vmem:[#allocation41_spill] sm:$0xff] }
 0x340   : > { %8397 = vmatprep.mubr.msk.bf16.mxu0 %vm9169_vm1, %v13398_v32 }
 0x342   : > { %v2662_v47 = vpop.f32.mrb[32].mxu0  ;;  %v11640_v29 = vpop.f32.mrb[120].mxu1 }
 0x343   : > { %v2703_v56 = vadd.f32 %v2662_v47, %v11410_v39  ;;  %v8163_v20 = vpop.f32.mrb[33].mxu0  ;;  %13671 = vst [vmem:[#allocation97_spill] sm:$0xff] %v11640_v29  ;;  %v8353_v62 = vpop.f32.mrb[121].mxu1 }
 0x344   : > { %v2665_v3 = vpop.f32.mrb[34].mxu0  ;;  %v11646_v0 = vpop.f32.mrb[122].mxu1  ;;  %v13678_v20 = vld [vmem:[#allocation32_spill] sm:$0xff]  ;;  %v13680_v62 = vld [vmem:[#allocation95_spill] sm:$0xff] }
 0x345   : > { %v2704_v1 = vadd.f32 %v2665_v3, %v11415_v4  ;;  %v11644_v23 = vadd.f32 %v13672_v12, %v2703_v56  ;;  %v8164_v2 = vpop.f32.mrb[35].mxu0  ;;  %13674 = vst [vmem:[#allocation100_spill] sm:$0xff] %v11646_v0  ;;  %v8354_v39 = vpop.f32.mrb[123].mxu1  ;;  %v13679_v12 = vld [vmem:[#allocation37_spill] sm:$0xff] }
 0x347   : > { %13673 = vst [vmem:[#allocation99_spill] sm:$0xff] %v11644_v23  ;;  %v11649_v53 = vadd.f32 %v13675_v59, %v2704_v1  ;;  %8398 = vmatmul.mubr.msk.bf16.gmra.mrb[140].mxu0 %vm1370_vm5, %v13677_v24  ;;  %v13682_v1 = vld [vmem:[#allocation70_spill] sm:$0xff]  ;;  %v13691_v23 = vld [vmem:[#allocation28_spill] sm:$0xff] }
 0x348   : > { %8401 = vmatprep.mubr.msk.bf16.mxu0 %vm9169_vm1, %v13398_v32 }
 0x349   : > { %13676 = vst [vmem:[#allocation72_spill] sm:$0xff] %v11649_v53  ;;  %v13684_v53 = vld [vmem:[#allocation102_spill] sm:$0xff] }
 0x34a   : > { %v2670_v47 = vpop.f32.mrb[36].mxu0 }
 0x34b   : > { %v2705_v4 = vadd.f32 %v2670_v47, %v13678_v20  ;;  %v8167_v3 = vpop.f32.mrb[37].mxu0  ;;  %v13685_v20 = vld [vmem:[#allocation21_spill] sm:$0xff] }
 0x34c   : > { %v2673_v56 = vpop.f32.mrb[38].mxu0  ;;  %v7262_v3 = vrot.slane %v13685_v20, 9 }
 0x34d   : > { %v2706_v2 = vadd.f32 %v2673_v56, %v13679_v12  ;;  %v11658_v29 = vadd.f32 %v13680_v62, %v2705_v4  ;;  %v8168_v0 = vpop.f32.mrb[39].mxu0  ;;  %v13686_v56 = vld [vmem:[#allocation69_spill] sm:$0xff]  ;;  %v13687_v62 = vld [vmem:[#allocation50_spill] sm:$0xff] }
 0x34e   : > { %v3411_v12 = vrot.slane %v13686_v56, 5 }
 0x34f   : > { %13681 = vst [vmem:[#allocation64_spill] sm:$0xff] %v11658_v29  ;;  %v11661_v59 = vadd.f32 %v13682_v1, %v2706_v2  ;;  %8402 = vmatmul.mubr.msk.bf16.gmra.mrb[144].mxu0 %vm1370_vm5, %v13684_v53  ;;  %v13690_v29 = vld [vmem:[#allocation13_spill] sm:$0xff] }
 0x350   : > { %8405 = vmatprep.mubr.msk.bf16.mxu0 %vm9169_vm1, %v13398_v32  ;;  %v13692_v31 = vcombine.low %v13690_v29, %v13691_v23 }
 0x351   : > { %13683 = vst [vmem:[#allocation16_spill] sm:$0xff] %v11661_v59  ;;  %v13688_v59 = vld [vmem:[#allocation54_spill] sm:$0xff] }
 0x352   : > { %v3020_v24 = vpop.f32.mrb[40].mxu0 }
 0x353   : > { %v3139_v39 = vadd.f32 %v3020_v24, %v11428_v37  ;;  %v8235_v47 = vpop.f32.mrb[41].mxu0  ;;  %v3412_v24 = vsel %vm10099_vm8, %v7262_v3, %v3411_v12 }
 0x354   : > { %v3023_v4 = vpop.f32.mrb[42].mxu0  ;;  %v13694_v47 = vld [vmem:[#allocation39_spill] sm:$0xff] }
 0x355   : > { %v3140_v0 = vadd.f32 %v3023_v4, %v11433_v48  ;;  %v11672_v2 = vadd.f32 %v13687_v62, %v3139_v39  ;;  %v8236_v1 = vpop.f32.mrb[43].mxu0  ;;  %v3414_v20 = vrot.slane %v13694_v47, 5  ;;  %v13695_v39 = vld [vmem:[#allocation14_spill] sm:$0xff] }
 0x356   : > { %v7264_v56 = vcombine.low %v13695_v39, %v3412_v24  ;;  %v13698_v39 = vld [vmem:[#allocation92_spill] sm:$0xff] }
 0x357   : > { %v11675_v53 = vadd.f32 %v13688_v59, %v3140_v0  ;;  %8406 = vmatmul.mubr.msk.bf16.gmra.mrb[148].mxu0 %vm1370_vm5, %v13692_v31  ;;  %v3413_v0 = vrot.slane %v3411_v12, 4  ;;  %v3416_v62 = vrot.slane %v3414_v20, 4  ;;  %v13696_v31 = vld [vmem:[#allocation56_spill] sm:$0xff] }
 0x358   : > { %8409 = vmatprep.mubr.msk.bf16.mxu0 %vm9169_vm1, %v13398_v32 }
 0x359   : > { %13689 = vst [vmem:[#allocation6_spill] sm:$0xff] %v11675_v53  ;;  %v13697_v53 = vld [vmem:[#allocation45_spill] sm:$0xff]  ;;  %v3415_v24 = vsel %vm10099_vm8, %v3413_v0, %v3414_v20 }
 0x35a   : > { %v3028_v48 = vpop.f32.mrb[44].mxu0 }
 0x35b   : > { %v3141_v4 = vadd.f32 %v3028_v48, %v11448_v13  ;;  %v8239_v59 = vpop.f32.mrb[45].mxu0  ;;  %v3418_v13 = vsel %vm10099_vm8, %v3416_v62, %v13698_v39 }
 0x35c   : > { %v3031_v1 = vpop.f32.mrb[46].mxu0  ;;  %v7265_v12 = vcombine.low %v3415_v24, %v3418_v13 }
 0x35d   : > { %v3142_v29 = vadd.f32 %v3031_v1, %v11453_v55  ;;  %v11690_v23 = vadd.f32 %v13696_v31, %v3141_v4  ;;  %v8240_v3 = vpop.f32.mrb[47].mxu0 }
 0x35f   : > { %v11693_v47 = vadd.f32 %v13697_v53, %v3142_v29  ;;  %8410 = vmatmul.mubr.msk.bf16.gmra.mrb[152].mxu0 %vm1370_vm5, %v7264_v56 }
 0x360   : > { %8413 = vmatprep.mubr.msk.bf16.mxu0 %vm9169_vm1, %v13398_v32 }
 0x362   : > { %v3036_v55 = vpop.f32.mrb[48].mxu0 }
 0x363   : > { %v3143_v48 = vadd.f32 %v3036_v55, %v11466_v22  ;;  %v8243_v4 = vpop.f32.mrb[49].mxu0 }
 0x364   : > { %v3039_v59 = vpop.f32.mrb[50].mxu0 }
 0x365   : > { %v3144_v53 = vadd.f32 %v3039_v59, %v11471_v17  ;;  %v11706_v56 = vadd.f32 %v11444_v46, %v3143_v48  ;;  %v8244_v1 = vpop.f32.mrb[51].mxu0 }
 0x367   : > { %v11709_v20 = vadd.f32 %v11450_v63, %v3144_v53  ;;  %8414 = vmatmul.mubr.msk.bf16.gmra.mrb[156].mxu0 %vm1370_vm5, %v7265_v12 }
 0x36a   : > { %v3044_v0 = vpop.f32.mrb[52].mxu0 }
 0x36b   : > { %v3145_v32 = vadd.f32 %v3044_v0, %v11481_v50  ;;  %v8247_v62 = vpop.f32.mrb[53].mxu0 }
 0x36c   : > { %v3047_v29 = vpop.f32.mrb[54].mxu0 }
 0x36d   : > { %v3146_v22 = vadd.f32 %v3047_v29, %v11486_v18  ;;  %v11715_v31 = vadd.f32 %v11462_v21, %v3145_v32  ;;  %v8248_v17 = vpop.f32.mrb[55].mxu0 }
 0x36f   : > { %v11718_v46 = vadd.f32 %v11468_v14, %v3146_v22 }
 0x372   : > { %v3052_v3 = vpop.f32.mrb[56].mxu0 }
 0x373   : > { %v3147_v63 = vadd.f32 %v3052_v3, %v11497_v7  ;;  %v8251_v24 = vpop.f32.mrb[57].mxu0 }
 0x374   : > { %v3055_v39 = vpop.f32.mrb[58].mxu0 }
 0x375   : > { %v3148_v13 = vadd.f32 %v3055_v39, %v11502_v35  ;;  %v11723_v50 = vadd.f32 %v11477_v43, %v3147_v63  ;;  %v8252_v55 = vpop.f32.mrb[59].mxu0 }
 0x377   : > { %v11726_v18 = vadd.f32 %v11483_v36, %v3148_v13 }
 0x37a   : > { %v3060_v21 = vpop.f32.mrb[60].mxu0 }
 0x37b   : > { %v3149_v12 = vadd.f32 %v3060_v21, %v11513_v26  ;;  %v8255_v48 = vpop.f32.mrb[61].mxu0 }
 0x37c   : > { %v3063_v14 = vpop.f32.mrb[62].mxu0 }
 0x37d   : > { %v3150_v4 = vadd.f32 %v3063_v14, %v11518_v5  ;;  %v11731_v7 = vadd.f32 %v11493_v51, %v3149_v12  ;;  %v8256_v59 = vpop.f32.mrb[63].mxu0 }
 0x37f   : > { %v11734_v35 = vadd.f32 %v11499_v52, %v3150_v4 }
 0x382   : > { %v3068_v43 = vpop.f32.mrb[64].mxu0 }
 0x383   : > { %v3151_v53 = vadd.f32 %v3068_v43, %v11529_v11  ;;  %v8259_v1 = vpop.f32.mrb[65].mxu0 }
 0x384   : > { %v3071_v36 = vpop.f32.mrb[66].mxu0 }
 0x385   : > { %v3152_v0 = vadd.f32 %v3071_v36, %v11534_v38  ;;  %v11739_v26 = vadd.f32 %v11509_v58, %v3151_v53  ;;  %v8260_v32 = vpop.f32.mrb[67].mxu0 }
 0x387   : > { %v11742_v5 = vadd.f32 %v11515_v45, %v3152_v0 }
 0x38a   : > { %v3076_v51 = vpop.f32.mrb[68].mxu0 }
 0x38b   : > { %v3153_v62 = vadd.f32 %v3076_v51, %v11545_v9  ;;  %v8263_v29 = vpop.f32.mrb[69].mxu0 }
 0x38c   : > { %v3079_v52 = vpop.f32.mrb[70].mxu0  ;;  %v13699_v29 = vld [vmem:[#allocation96_spill] sm:$0xff] }
 0x38d   : > { %v3154_v22 = vadd.f32 %v3079_v52, %v11550_v57  ;;  %v11747_v11 = vadd.f32 %v11525_v10, %v3153_v62  ;;  %v8264_v17 = vpop.f32.mrb[71].mxu0 }
 0x38e   : > { %v13701_v17 = vld [vmem:[#allocation99_spill] sm:$0xff] }
 0x38f   : > { %v11750_v38 = vadd.f32 %v11531_v49, %v3154_v22 }
 0x392   : > { %v3084_v58 = vpop.f32.mrb[72].mxu0 }
 0x393   : > { %v3155_v3 = vadd.f32 %v3084_v58, %v11561_v15  ;;  %v8267_v63 = vpop.f32.mrb[73].mxu0 }
 0x394   : > { %v3087_v45 = vpop.f32.mrb[74].mxu0  ;;  %v13702_v63 = vld [vmem:[#allocation72_spill] sm:$0xff] }
 0x395   : > { %v3156_v24 = vadd.f32 %v3087_v45, %v11566_v41  ;;  %v11755_v9 = vadd.f32 %v11541_v25, %v3155_v3  ;;  %v8268_v39 = vpop.f32.mrb[75].mxu0 }
 0x397   : > { %v11758_v57 = vadd.f32 %v11547_v40, %v3156_v24 }
 0x39a   : > { %v3092_v10 = vpop.f32.mrb[76].mxu0 }
 0x39b   : > { %v3157_v13 = vadd.f32 %v3092_v10, %v11580_v44  ;;  %v8271_v55 = vpop.f32.mrb[77].mxu0 }
 0x39c   : > { %v3095_v49 = vpop.f32.mrb[78].mxu0  ;;  %v13705_v55 = vld [vmem:[#allocation64_spill] sm:$0xff] }
 0x39d   : > { %v3158_v21 = vadd.f32 %v3095_v49, %v11585_v42  ;;  %v11763_v15 = vadd.f32 %v11557_v30, %v3157_v13  ;;  %v8272_v12 = vpop.f32.mrb[79].mxu0  ;;  %v11776_v30 = vld [vmem:[%s13167_s3] sm:$0xff]  }
 0x39e   : > { %8435 = vmatprep.subr.bf16.mxu1 %v11776_v30 }
 0x39f   : > { %v11766_v41 = vadd.f32 %v11563_v61, %v3158_v21 }
 0x3a2   : > { %v3100_v25 = vpop.f32.mrb[80].mxu0 }
 0x3a3   : > { %v3159_v48 = vadd.f32 %v3100_v25, %v11596_v54  ;;  %v8275_v14 = vpop.f32.mrb[81].mxu0  ;;  %v13706_v25 = vld [vmem:[#allocation16_spill] sm:$0xff] }
 0x3a4   : > { %v3103_v40 = vpop.f32.mrb[82].mxu0  ;;  %v13707_v14 = vld [vmem:[#allocation97_spill] sm:$0xff] }
 0x3a5   : > { %v3160_v4 = vadd.f32 %v3103_v40, %v11601_v60  ;;  %v11771_v44 = vadd.f32 %v11576_v27, %v3159_v48  ;;  %v8276_v59 = vpop.f32.mrb[83].mxu0 }
 0x3a6   : > { %v13708_v59 = vld [vmem:[#allocation100_spill] sm:$0xff] }
 0x3a7   : > { %v11779_v42 = vadd.f32 %v11582_v16, %v3160_v4 }
 0x3aa   : > { %v3108_v61 = vpop.f32.mrb[84].mxu0 }
 0x3ab   : > { %v3161_v54 = vadd.f32 %v3108_v61, %v11612_v19  ;;  %v8279_v43 = vpop.f32.mrb[85].mxu0 }
 0x3ac   : > { %v3111_v53 = vpop.f32.mrb[86].mxu0  ;;  %v13709_v43 = vld [vmem:[#allocation2_spill] sm:$0xff] }
 0x3ad   : > { %v3162_v60 = vadd.f32 %v3111_v53, %v11617_v8  ;;  %v11785_v27 = vadd.f32 %v11592_v6, %v3161_v54  ;;  %v8280_v1 = vpop.f32.mrb[87].mxu0  ;;  %v13700_v8 = vld [vmem:[#allocation55_spill] sm:$0xff]  ;;  %v11815_v54 = vstv %s7282_s16  ;;  %v11818_v53 = vadd.s32 4294967295, %v13709_v43  ;;  %s7003_s16 = sshll.u32 %s354_s27, 3 }
 0x3ae   : > { %v11823_v1 = vld [vmem:[%s13170_s6] ss:$0 sm:$0xff]  ;;  %vm3701_vm1 = vcmp.ge.s32.totalorder %v11815_v54, 0  ;;  %vm3711_vm7 = vcmp.lt.s32.totalorder %v11815_v54, 16 }
 0x3af   : > { %v11788_v36 = vadd.f32 %v11598_v33, %v3162_v60  ;;  %vm11829_vm9 = vmand %vm3701_vm1, %vm3711_vm7  ;;  %vm3731_vm10 = vcmp.ge.s32.totalorder %v11818_v53, 0  ;;  %vm3950_vm1 = vcmask 130048  }
 0x3b0   : > { %vm3734_vm11 = vmand %vm11829_vm9, %vm3731_vm10 }
 0x3b2   : > { %v3116_v0 = vpop.f32.mrb[88].mxu0 }
 0x3b3   : > { %v3163_v16 = vadd.f32 %v3116_v0, %v11628_v28  ;;  %v8283_v32 = vpop.f32.mrb[89].mxu0  ;;  %v13703_v28 = vld [vmem:[#allocation83_spill] sm:$0xff] }
 0x3b4   : > { %v3119_v51 = vpop.f32.mrb[90].mxu0 }
 0x3b5   : > { %v3164_v62 = vadd.f32 %v3119_v51, %v11633_v34  ;;  %v11793_v19 = vadd.f32 %v13699_v29, %v3163_v16  ;;  %v8284_v52 = vpop.f32.mrb[91].mxu0  ;;  %v13704_v34 = vld [vmem:[#allocation84_spill] sm:$0xff]  ;;  %v13712_v29 = vld [vmem:[#allocation6_spill] sm:$0xff] }
 0x3b7   : > { %v11796_v22 = vadd.f32 %v13700_v8, %v3164_v62 }
 0x3ba   : > { %v3124_v6 = vpop.f32.mrb[92].mxu0 }
 0x3bb   : > { %v3165_v58 = vadd.f32 %v3124_v6, %v13701_v17  ;;  %v8287_v33 = vpop.f32.mrb[93].mxu0 }
 0x3bc   : > { %v3127_v3 = vpop.f32.mrb[94].mxu0 }
 0x3bd   : > { %v3166_v45 = vadd.f32 %v3127_v3, %v13702_v63  ;;  %v11801_v24 = vadd.f32 %v13703_v28, %v3165_v58  ;;  %v8288_v39 = vpop.f32.mrb[95].mxu0  ;;  %v13713_v58 = vld [vmem:[#allocation3_spill] sm:$0xff] }
 0x3be   : > { %v11837_v33 = vadd.s32 4294967295, %v13713_v58 }
 0x3bf   : > { %v11804_v10 = vadd.f32 %v13704_v34, %v3166_v45 }
 0x3c0   : > { %vm3766_vm12 = vcmp.lt.s32.totalorder %v11837_v33, 16 }
 0x3c1   : > { %vm3769_vm13 = vmand %vm11829_vm9, %vm3766_vm12 }
 0x3c2   : > { %v3132_v13 = vpop.f32.mrb[96].mxu0 }
 0x3c3   : > { %v3167_v49 = vadd.f32 %v3132_v13, %v13705_v55  ;;  %v8291_v21 = vpop.f32.mrb[97].mxu0  ;;  %v3689_v55 = vadd.s32 1, %v11815_v54 }
 0x3c4   : > { %v3135_v12 = vpop.f32.mrb[98].mxu0 }
 0x3c5   : > { %v3168_v48 = vadd.f32 %v3135_v12, %v13706_v25  ;;  %v11810_v40 = vadd.f32 %v13707_v14, %v3167_v49  ;;  %v8292_v4 = vpop.f32.mrb[99].mxu0  ;;  %vm3702_vm14 = vcmp.ge.s32.totalorder %v3689_v55, 0  ;;  %vm3712_vm15 = vcmp.lt.s32.totalorder %v3689_v55, 16 }
 0x3c6   : > { %vm11860_vm2 = vmand %vm3702_vm14, %vm3712_vm15 }
 0x3c7   : > { %v11813_v61 = vadd.f32 %v13708_v59, %v3168_v48  ;;  %vm3737_vm4 = vmand %vm11860_vm2, %vm3731_vm10 }
 0x3c8   : > { %vm3772_vm7 = vmand %vm11860_vm2, %vm3766_vm12 }
 0x3ca   : > { %v3471_v60 = vpop.f32.mrb[100].mxu0 }
 0x3cb   : > { %v3590_v0 = vadd.f32 %v3471_v60, %v11672_v2  ;;  %v8359_v16 = vpop.f32.mrb[101].mxu0 }
 0x3cc   : > { %v3474_v32 = vpop.f32.mrb[102].mxu0 }
 0x3cd   : > { %v3627_v51 = vadd.f32 %v11823_v1, %v3590_v0  ;;  %v3591_v52 = vadd.f32 %v3474_v32, %v13712_v29  ;;  %v8360_v8 = vpop.f32.mrb[103].mxu0 }
 0x3cf   : > { %v3657_v6 = vmax.f32 %v3627_v51, 0.0  ;;  %v3628_v17 = vadd.f32 %v11823_v1, %v3591_v52 }
 0x3d1   : > { %v3658_v2 = vmax.f32 %v3628_v17, 0.0  ;;  %v3797_v63 = vsel %vm3734_vm11, %v3657_v6, 0.0  ;;  %v3690_v17 = vadd.s32 2, %v11815_v54 }
 0x3d2   : > { %v3479_v3 = vpop.f32.mrb[104].mxu0 }
 0x3d3   : > { %v3798_v45 = vsel %vm11829_vm9, %v3658_v2, 0.0  ;;  %v3592_v28 = vadd.f32 %v3479_v3, %v11690_v23  ;;  %v8363_v39 = vpop.f32.mrb[105].mxu0  ;;  %vm3703_vm9 = vcmp.ge.s32.totalorder %v3690_v17, 0  ;;  %vm3713_vm11 = vcmp.lt.s32.totalorder %v3690_v17, 16 }
 0x3d4   : > { %v11847_v34 = vpack.c.bf16 %v3798_v45, %v3797_v63  ;;  %v3482_v13 = vpop.f32.mrb[106].mxu0 }
 0x3d5   : > { %v3629_v49 = vadd.f32 %v11823_v1, %v3592_v28  ;;  %v3593_v21 = vadd.f32 %v3482_v13, %v11693_v47  ;;  %v8364_v12 = vpop.f32.mrb[107].mxu0 }
 0x3d6   : > { %v3851_v23 = vshll.u32 %v11847_v34, 16  ;;  %v3849_v51 = vshrl.u32 %v11847_v34, 16 }
 0x3d7   : > { %v3659_v25 = vmax.f32 %v3629_v49, 0.0  ;;  %v3630_v14 = vadd.f32 %v11823_v1, %v3593_v21 }
 0x3d8   : > { %v3853_v43 = vrot.slane %v3851_v23, 1 }
 0x3d9   : > { %v3799_v48 = vsel %vm3769_vm13, %v3659_v25, 0.0  ;;  %v3660_v62 = vmax.f32 %v3630_v14, 0.0  ;;  %vm11890_vm13 = vmand %vm3703_vm9, %vm3713_vm11 }
 0x3da   : > { %v11858_v4 = vpack.c.bf16 %v3799_v48, %v3799_v48  ;;  %v3487_v59 = vpop.f32.mrb[108].mxu0  ;;  %vm3740_vm14 = vmand %vm11890_vm13, %vm3731_vm10 }
 0x3db   : > { %v3594_v60 = vadd.f32 %v3487_v59, %v11706_v56  ;;  %v8367_v0 = vpop.f32.mrb[109].mxu0  ;;  %v3854_v56 = vor.u32 %v3853_v43, %v3849_v51  ;;  %v3800_v3 = vsel %vm3737_vm4, %v3660_v62, 0.0  ;;  %vm3775_vm15 = vmand %vm11890_vm13, %vm3766_vm12 }
 0x3dc   : > { %v3856_v16 = vshll.u32 %v11858_v4, 16  ;;  %v3490_v32 = vpop.f32.mrb[110].mxu0 }
 0x3dd   : > { %v3631_v29 = vadd.f32 %v11823_v1, %v3594_v60  ;;  %v3595_v52 = vadd.f32 %v3490_v32, %v11709_v20  ;;  %v8368_v8 = vpop.f32.mrb[111].mxu0 }
 0x3de   : > { %v3858_v6 = vrot.slane %v3856_v16, 1 }
 0x3df   : > { %v3661_v58 = vmax.f32 %v3631_v29, 0.0  ;;  %v3632_v2 = vadd.f32 %v11823_v1, %v3595_v52 }
 0x3e0   : > { %v3859_v20 = vsel %vm3847_vm3, %v3854_v56, %v3858_v6 }
 0x3e1   : > { %v3801_v63 = vsel %vm11860_vm2, %v3661_v58, 0.0  ;;  %v3662_v45 = vmax.f32 %v3632_v2, 0.0  ;;  %8419 = vmatprep.mubr.msk.bf16.mxu1 %vm3950_vm1, %v3859_v20  ;;  %v3691_v2 = vadd.s32 3, %v11815_v54 }
 0x3e2   : > { %v11883_v28 = vpack.c.bf16 %v3801_v63, %v3800_v3  ;;  %v3495_v39 = vpop.f32.mrb[112].mxu0 }
 0x3e3   : > { %v3802_v13 = vsel %vm3772_vm7, %v3662_v45, 0.0  ;;  %v3596_v55 = vadd.f32 %v3495_v39, %v11715_v31  ;;  %v8371_v49 = vpop.f32.mrb[113].mxu0  ;;  %vm3704_vm2 = vcmp.ge.s32.totalorder %v3691_v2, 0  ;;  %vm3714_vm4 = vcmp.lt.s32.totalorder %v3691_v2, 16 }
 0x3e4   : > { %v11886_v21 = vpack.c.bf16 %v3802_v13, %v3802_v13  ;;  %v3498_v12 = vpop.f32.mrb[114].mxu0  ;;  %v3863_v23 = vshll.u32 %v11883_v28, 16  ;;  %v3861_v47 = vshrl.u32 %v11883_v28, 16  ;;  %vm11930_vm7 = vmand %vm3704_vm2, %vm3714_vm4 }
 0x3e5   : > { %v3633_v25 = vadd.f32 %v11823_v1, %v3596_v55  ;;  %v3597_v14 = vadd.f32 %v3498_v12, %v11718_v46  ;;  %v8372_v59 = vpop.f32.mrb[115].mxu0  ;;  %v11905_v46 = vld [vmem:[%s13167_s3 + $0x10] sm:$0xff]   ;;  %vm3743_vm9 = vmand %vm11930_vm7, %vm3731_vm10 }
 0x3e6   : > { %v3868_v43 = vshll.u32 %v11886_v21, 16  ;;  %v3865_v31 = vrot.slane %v3863_v23, 1  ;;  %vm3778_vm11 = vmand %vm11930_vm7, %vm3766_vm12 }
 0x3e7   : > { %v3663_v60 = vmax.f32 %v3633_v25, 0.0  ;;  %v3634_v0 = vadd.f32 %v11823_v1, %v3597_v14 }
 0x3e8   : > { %v3870_v16 = vrot.slane %v3868_v43, 1  ;;  %v3866_v32 = vor.u32 %v3865_v31, %v3861_v47 }
 0x3e9   : > { %v3664_v51 = vmax.f32 %v3634_v0, 0.0  ;;  %v3803_v52 = vsel %vm3740_vm14, %v3663_v60, 0.0 }
 0x3ea   : > { %v3503_v62 = vpop.f32.mrb[116].mxu0  ;;  %v11908_v29 = vsel %vm3847_vm3, %v3866_v32, %v3870_v16 }
 0x3eb   : > { %v3804_v8 = vsel %vm11890_vm13, %v3664_v51, 0.0  ;;  %v3598_v6 = vadd.f32 %v3503_v62, %v11723_v50  ;;  %v8375_v56 = vpop.f32.mrb[117].mxu0  ;;  %8420 = vmatmul.mubr.msk.bf16.vlgmr.msra.gmra.mrb[124].mxu1 %vm3950_vm1, %v11908_v29 }
 0x3ec   : > { %v11915_v17 = vpack.c.bf16 %v3804_v8, %v3803_v52  ;;  %v3506_v58 = vpop.f32.mrb[118].mxu0  ;;  %8436 = vmatpush3.bf16.msra.mxu1 %v11776_v30 }
 0x3ed   : > { %v3635_v20 = vadd.f32 %v11823_v1, %v3598_v6  ;;  %v3599_v3 = vadd.f32 %v3506_v58, %v11726_v18  ;;  %v8376_v63 = vpop.f32.mrb[119].mxu0  ;;  %8453 = vmatprep.subr.bf16.mxu1 %v11905_v46 }
 0x3ee   : > { %v3875_v50 = vshll.u32 %v11915_v17, 16  ;;  %v3873_v14 = vshrl.u32 %v11915_v17, 16 }
 0x3ef   : > { %v3665_v45 = vmax.f32 %v3635_v20, 0.0  ;;  %v3636_v30 = vadd.f32 %v11823_v1, %v3599_v3 }
 0x3f0   : > { %v3877_v18 = vrot.slane %v3875_v50, 1 }
 0x3f1   : > { %v3805_v39 = vsel %vm3775_vm15, %v3665_v45, 0.0  ;;  %v3666_v59 = vmax.f32 %v3636_v30, 0.0 }
 0x3f2   : > { %v11928_v13 = vpack.c.bf16 %v3805_v39, %v3805_v39  ;;  %v3511_v55 = vpop.f32.mrb[120].mxu0  ;;  %v3878_v0 = vor.u32 %v3877_v18, %v3873_v14 }
 0x3f3   : > { %v3600_v12 = vadd.f32 %v3511_v55, %v11731_v7  ;;  %v8379_v23 = vpop.f32.mrb[121].mxu0  ;;  %v3692_v7 = vadd.s32 4, %v11815_v54  ;;  %v3806_v51 = vsel %vm3743_vm9, %v3666_v59, 0.0 }
 0x3f4   : > { %v3880_v25 = vshll.u32 %v11928_v13, 16  ;;  %v3514_v48 = vpop.f32.mrb[122].mxu0 }
 0x3f5   : > { %v3637_v43 = vadd.f32 %v11823_v1, %v3600_v12  ;;  %v3601_v47 = vadd.f32 %v3514_v48, %v11734_v35  ;;  %v8380_v31 = vpop.f32.mrb[123].mxu0  ;;  %vm3705_vm13 = vcmp.ge.s32.totalorder %v3692_v7, 0  ;;  %vm3715_vm14 = vcmp.lt.s32.totalorder %v3692_v7, 16 }
 0x3f6   : > { %v3882_v60 = vrot.slane %v3880_v25, 1  ;;  %vm11963_vm15 = vmand %vm3705_vm13, %vm3715_vm14  ;;  %v3693_v7 = vadd.s32 5, %v11815_v54 }
 0x3f7   : > { %v3667_v16 = vmax.f32 %v3637_v43, 0.0  ;;  %v3638_v32 = vadd.f32 %v11823_v1, %v3601_v47  ;;  %vm3746_vm2 = vmand %vm11963_vm15, %vm3731_vm10 }
 0x3f8   : > { %v11950_v35 = vsel %vm3847_vm3, %v3878_v0, %v3882_v60  ;;  %vm3781_vm4 = vmand %vm11963_vm15, %vm3766_vm12  ;;  %vm3716_vm9 = vcmp.lt.s32.totalorder %v3693_v7, 16 }
 0x3f9   : > { %v3807_v62 = vsel %vm11930_vm7, %v3667_v16, 0.0  ;;  %v3668_v52 = vmax.f32 %v3638_v32, 0.0  ;;  %8423 = vmatprep.mubr.msk.bf16.mxu1 %vm3950_vm1, %v11950_v35  ;;  %vm3706_vm7 = vcmp.ge.s32.totalorder %v3693_v7, 0 }
 0x3fa   : > { %v11956_v8 = vpack.c.bf16 %v3807_v62, %v3806_v51  ;;  %v3519_v6 = vpop.f32.mrb[124].mxu0 }
 0x3fb   : > { %v3808_v56 = vsel %vm3778_vm11, %v3668_v52, 0.0  ;;  %v3602_v58 = vadd.f32 %v3519_v6, %v11739_v26  ;;  %v8383_v2 = vpop.f32.mrb[125].mxu0  ;;  %vm11996_vm11 = vmand %vm3706_vm7, %vm3716_vm9 }
 0x3fc   : > { %v11959_v20 = vpack.c.bf16 %v3808_v56, %v3808_v56  ;;  %v3522_v3 = vpop.f32.mrb[126].mxu0  ;;  %v3887_v63 = vshll.u32 %v11956_v8, 16  ;;  %v3885_v18 = vshrl.u32 %v11956_v8, 16  ;;  %vm3749_vm13 = vmand %vm11996_vm11, %vm3731_vm10 }
 0x3fd   : > { %v3639_v50 = vadd.f32 %v11823_v1, %v3602_v58  ;;  %v3603_v39 = vadd.f32 %v3522_v3, %v11742_v5  ;;  %v8384_v30 = vpop.f32.mrb[127].mxu0  ;;  %vm3784_vm14 = vmand %vm11996_vm11, %vm3766_vm12 }
 0x3fe   : > { %v3892_v55 = vshll.u32 %v11959_v20, 16  ;;  %v3889_v26 = vrot.slane %v3887_v63, 1 }
 0x3ff   : > { %v3669_v49 = vmax.f32 %v3639_v50, 0.0  ;;  %v3640_v12 = vadd.f32 %v11823_v1, %v3603_v39 }
 0x400   : > { %v3894_v23 = vrot.slane %v3892_v55, 1  ;;  %v3890_v25 = vor.u32 %v3889_v26, %v3885_v18 }
 0x401   : > { %v3670_v48 = vmax.f32 %v3640_v12, 0.0  ;;  %v3809_v59 = vsel %vm3746_vm2, %v3669_v49, 0.0 }
 0x402   : > { %v3527_v14 = vpop.f32.mrb[128].mxu0  ;;  %v11976_v5 = vsel %vm3847_vm3, %v3890_v25, %v3894_v23 }
 0x403   : > { %v3810_v43 = vsel %vm11963_vm15, %v3670_v48, 0.0  ;;  %v3604_v47 = vadd.f32 %v3527_v14, %v11747_v11  ;;  %v8387_v31 = vpop.f32.mrb[129].mxu0  ;;  %8424 = vmatmul.mubr.msk.bf16.gmra.mrb[128].mxu1 %vm3950_vm1, %v11976_v5 }
 0x404   : > { %v11983_v60 = vpack.c.bf16 %v3810_v43, %v3809_v59  ;;  %v3530_v0 = vpop.f32.mrb[130].mxu0 }
 0x405   : > { %v3641_v16 = vadd.f32 %v11823_v1, %v3604_v47  ;;  %v3605_v32 = vadd.f32 %v3530_v0, %v11750_v38  ;;  %v8388_v51 = vpop.f32.mrb[131].mxu0 }
 0x406   : > { %v3899_v11 = vshll.u32 %v11983_v60, 16  ;;  %v3897_v39 = vshrl.u32 %v11983_v60, 16 }
 0x407   : > { %v3671_v62 = vmax.f32 %v3641_v16, 0.0  ;;  %v3642_v6 = vadd.f32 %v11823_v1, %v3605_v32 }
 0x408   : > { %v3901_v2 = vrot.slane %v3899_v11, 1 }
 0x409   : > { %v3811_v52 = vsel %vm3781_vm4, %v3671_v62, 0.0  ;;  %v3672_v30 = vmax.f32 %v3642_v6, 0.0 }
 0x40a   : > { %v11994_v56 = vpack.c.bf16 %v3811_v52, %v3811_v52  ;;  %v3535_v58 = vpop.f32.mrb[132].mxu0  ;;  %v3902_v12 = vor.u32 %v3901_v2, %v3897_v39 }
 0x40b   : > { %v3606_v3 = vadd.f32 %v3535_v58, %v11755_v9  ;;  %v8391_v63 = vpop.f32.mrb[133].mxu0  ;;  %v3694_v9 = vadd.s32 6, %v11815_v54  ;;  %v3812_v48 = vsel %vm3749_vm13, %v3672_v30, 0.0 }
 0x40c   : > { %v3904_v50 = vshll.u32 %v11994_v56, 16  ;;  %v3538_v45 = vpop.f32.mrb[134].mxu0 }
 0x40d   : > { %v3643_v55 = vadd.f32 %v11823_v1, %v3606_v3  ;;  %v3607_v18 = vadd.f32 %v3538_v45, %v11758_v57  ;;  %v8392_v26 = vpop.f32.mrb[135].mxu0  ;;  %vm3707_vm15 = vcmp.ge.s32.totalorder %v3694_v9, 0  ;;  %vm3717_vm2 = vcmp.lt.s32.totalorder %v3694_v9, 16 }
 0x40e   : > { %v3906_v49 = vrot.slane %v3904_v50, 1  ;;  %vm12029_vm4 = vmand %vm3707_vm15, %vm3717_vm2  ;;  %v3695_v9 = vadd.s32 7, %v11815_v54 }
 0x40f   : > { %v3673_v23 = vmax.f32 %v3643_v55, 0.0  ;;  %v3644_v25 = vadd.f32 %v11823_v1, %v3607_v18  ;;  %vm3752_vm7 = vmand %vm12029_vm4, %vm3731_vm10 }
 0x410   : > { %v12016_v57 = vsel %vm3847_vm3, %v3902_v12, %v3906_v49  ;;  %vm3787_vm9 = vmand %vm12029_vm4, %vm3766_vm12  ;;  %vm3718_vm13 = vcmp.lt.s32.totalorder %v3695_v9, 16 }
 0x411   : > { %v3813_v14 = vsel %vm11996_vm11, %v3673_v23, 0.0  ;;  %v3674_v59 = vmax.f32 %v3644_v25, 0.0  ;;  %8427 = vmatprep.mubr.msk.bf16.mxu1 %vm3950_vm1, %v12016_v57  ;;  %vm3708_vm11 = vcmp.ge.s32.totalorder %v3695_v9, 0 }
 0x412   : > { %v12022_v43 = vpack.c.bf16 %v3813_v14, %v3812_v48  ;;  %v3543_v47 = vpop.f32.mrb[136].mxu0 }
 0x413   : > { %v3814_v31 = vsel %vm3784_vm14, %v3674_v59, 0.0  ;;  %v3608_v0 = vadd.f32 %v3543_v47, %v11763_v15  ;;  %v8395_v7 = vpop.f32.mrb[137].mxu0  ;;  %vm12062_vm14 = vmand %vm3708_vm11, %vm3718_vm13 }
 0x414   : > { %v12025_v16 = vpack.c.bf16 %v3814_v31, %v3814_v31  ;;  %v3546_v32 = vpop.f32.mrb[138].mxu0  ;;  %v3911_v51 = vshll.u32 %v12022_v43, 16  ;;  %v3909_v2 = vshrl.u32 %v12022_v43, 16  ;;  %vm3755_vm15 = vmand %vm12062_vm14, %vm3731_vm10 }
 0x415   : > { %v3645_v11 = vadd.f32 %v11823_v1, %v3608_v0  ;;  %v3609_v52 = vadd.f32 %v3546_v32, %v11766_v41  ;;  %v8396_v6 = vpop.f32.mrb[139].mxu0  ;;  %vm3790_vm2 = vmand %vm12062_vm14, %vm3766_vm12 }
 0x416   : > { %v3916_v58 = vshll.u32 %v12025_v16, 16  ;;  %v3913_v15 = vrot.slane %v3911_v51, 1 }
 0x417   : > { %v3675_v38 = vmax.f32 %v3645_v11, 0.0  ;;  %v3646_v3 = vadd.f32 %v11823_v1, %v3609_v52 }
 0x418   : > { %v3918_v63 = vrot.slane %v3916_v58, 1  ;;  %v3914_v50 = vor.u32 %v3913_v15, %v3909_v2 }
 0x419   : > { %v3676_v45 = vmax.f32 %v3646_v3, 0.0  ;;  %v3815_v30 = vsel %vm3752_vm7, %v3675_v38, 0.0 }
 0x41a   : > { %v3551_v39 = vpop.f32.mrb[140].mxu0  ;;  %v12042_v41 = vsel %vm3847_vm3, %v3914_v50, %v3918_v63 }
 0x41b   : > { %v3816_v55 = vsel %vm12029_vm4, %v3676_v45, 0.0  ;;  %v3610_v18 = vadd.f32 %v3551_v39, %v11771_v44  ;;  %v8399_v26 = vpop.f32.mrb[141].mxu0  ;;  %8428 = vmatmul.mubr.msk.bf16.gmra.mrb[132].mxu1 %vm3950_vm1, %v12042_v41 }
 0x41c   : > { %v12049_v49 = vpack.c.bf16 %v3816_v55, %v3815_v30  ;;  %v3554_v12 = vpop.f32.mrb[142].mxu0 }
 0x41d   : > { %v3647_v23 = vadd.f32 %v11823_v1, %v3610_v18  ;;  %v3611_v25 = vadd.f32 %v3554_v12, %v11779_v42  ;;  %v8400_v48 = vpop.f32.mrb[143].mxu0 }
 0x41e   : > { %v3923_v44 = vshll.u32 %v12049_v49, 16  ;;  %v3921_v52 = vshrl.u32 %v12049_v49, 16 }
 0x41f   : > { %v3677_v14 = vmax.f32 %v3647_v23, 0.0  ;;  %v3648_v47 = vadd.f32 %v11823_v1, %v3611_v25 }
 0x420   : > { %v3925_v7 = vrot.slane %v3923_v44, 1 }
 0x421   : > { %v3817_v59 = vsel %vm3787_vm9, %v3677_v14, 0.0  ;;  %v3678_v6 = vmax.f32 %v3648_v47, 0.0 }
 0x422   : > { %v12060_v31 = vpack.c.bf16 %v3817_v59, %v3817_v59  ;;  %v3559_v0 = vpop.f32.mrb[144].mxu0  ;;  %v3926_v3 = vor.u32 %v3925_v7, %v3921_v52 }
 0x423   : > { %v3612_v32 = vadd.f32 %v3559_v0, %v11785_v27  ;;  %v8403_v51 = vpop.f32.mrb[145].mxu0  ;;  %v3696_v27 = vadd.s32 8, %v11815_v54  ;;  %v3818_v45 = vsel %vm3755_vm15, %v3678_v6, 0.0 }
 0x424   : > { %v3928_v11 = vshll.u32 %v12060_v31, 16  ;;  %v3562_v62 = vpop.f32.mrb[146].mxu0 }
 0x425   : > { %v3649_v58 = vadd.f32 %v11823_v1, %v3612_v32  ;;  %v3613_v2 = vadd.f32 %v3562_v62, %v11788_v36  ;;  %v8404_v15 = vpop.f32.mrb[147].mxu0  ;;  %vm3709_vm4 = vcmp.ge.s32.totalorder %v3696_v27, 0  ;;  %vm3719_vm7 = vcmp.lt.s32.totalorder %v3696_v27, 16 }
 0x426   : > { %v3930_v38 = vrot.slane %v3928_v11, 1  ;;  %vm12095_vm9 = vmand %vm3709_vm4, %vm3719_vm7  ;;  %v3697_v27 = vadd.s32 9, %v11815_v54 }
 0x427   : > { %v3679_v63 = vmax.f32 %v3649_v58, 0.0  ;;  %v3650_v50 = vadd.f32 %v11823_v1, %v3613_v2  ;;  %vm3758_vm11 = vmand %vm12095_vm9, %vm3731_vm10 }
 0x428   : > { %v12082_v36 = vsel %vm3847_vm3, %v3926_v3, %v3930_v38  ;;  %vm3710_vm13 = vcmp.ge.s32.totalorder %v3697_v27, 0  ;;  %vm3793_vm7 = vmand %vm12095_vm9, %vm3766_vm12 }
 0x429   : > { %v3819_v39 = vsel %vm12062_vm14, %v3679_v63, 0.0  ;;  %v3680_v30 = vmax.f32 %v3650_v50, 0.0  ;;  %8431 = vmatprep.mubr.msk.bf16.mxu1 %vm3950_vm1, %v12082_v36  ;;  %vm3720_vm14 = vcmp.lt.s32.totalorder %v3697_v27, 16  ;;  %v4212_v27 = vrot.slane %v11886_v21, 1 }
 0x42a   : > { %v12088_v55 = vpack.c.bf16 %v3819_v39, %v3818_v45  ;;  %v3567_v18 = vpop.f32.mrb[148].mxu0  ;;  %v9088_v45 = vld [vmem:[%s13167_s3 + $0x18] sm:$0xff]   ;;  %vm12127_vm15 = vmand %vm3710_vm13, %vm3720_vm14  ;;  %v4218_v21 = vrot.slane %v11959_v20, 1  ;;  %v4224_v20 = vrot.slane %v12025_v16, 1 }
 0x42b   : > { %v3820_v26 = vsel %vm3790_vm2, %v3680_v30, 0.0  ;;  %v3614_v12 = vadd.f32 %v3567_v18, %v11793_v19  ;;  %v8407_v9 = vpop.f32.mrb[149].mxu0  ;;  %vm3761_vm2 = vmand %vm12127_vm15, %vm3731_vm10  ;;  %vm4207_vm10 = vcmask 1046528   ;;  %v4217_v30 = vrot.slane %v11956_v8, 1 }
 0x42c   : > { %v12091_v23 = vpack.c.bf16 %v3820_v26, %v3820_v26  ;;  %v3570_v25 = vpop.f32.mrb[150].mxu0  ;;  %v3935_v48 = vshll.u32 %v12088_v55, 16  ;;  %v3933_v7 = vshrl.u32 %v12088_v55, 16  ;;  %vm3796_vm4 = vmand %vm12127_vm15, %vm3766_vm12  ;;  %vm5707_vm12 = vsmask.f32 2304 }
 0x42d   : > { %v3651_v44 = vadd.f32 %v11823_v1, %v3614_v12  ;;  %v3615_v59 = vadd.f32 %v3570_v25, %v11796_v22  ;;  %v8408_v47 = vpop.f32.mrb[151].mxu0 }
 0x42e   : > { %v3940_v0 = vshll.u32 %v12091_v23, 16  ;;  %v3937_v19 = vrot.slane %v3935_v48, 1  ;;  %v4230_v16 = vrot.slane %v12091_v23, 1 }
 0x42f   : > { %v3681_v42 = vmax.f32 %v3651_v44, 0.0  ;;  %v3652_v32 = vadd.f32 %v11823_v1, %v3615_v59 }
 0x430   : > { %v3942_v51 = vrot.slane %v3940_v0, 1  ;;  %v3938_v11 = vor.u32 %v3937_v19, %v3933_v7 }
 0x431   : > { %v3682_v62 = vmax.f32 %v3652_v32, 0.0  ;;  %v3821_v6 = vsel %vm3758_vm11, %v3681_v42, 0.0 }
 0x432   : > { %v3575_v52 = vpop.f32.mrb[152].mxu0  ;;  %v12108_v22 = vsel %vm3847_vm3, %v3938_v11, %v3942_v51 }
 0x433   : > { %v3822_v58 = vsel %vm12095_vm9, %v3682_v62, 0.0  ;;  %v12113_v2 = vadd.f32 %v3575_v52, %v11801_v24  ;;  %v8411_v15 = vpop.f32.mrb[153].mxu0  ;;  %8432 = vmatmul.mubr.msk.bf16.gmra.mrb[136].mxu1 %vm3950_vm1, %v12108_v22 }
 0x434   : > { %v12117_v38 = vpack.c.bf16 %v3822_v58, %v3821_v6  ;;  %v3578_v3 = vpop.f32.mrb[154].mxu0  ;;  %8437 = vmatprep.mubr.msk.bf16.mxu1 %vm3950_vm1, %v11847_v34  ;;  %v4209_v58 = vrot.slane %v11858_v4, 1  ;;  %v4208_v15 = vrot.slane %v11847_v34, 1  ;;  %v9089_v4 = vld [vmem:[%s13167_s3 + $0x20] sm:$0xff]  }
 0x435   : > { %v3617_v63 = vadd.f32 %v3578_v3, %v11804_v10  ;;  %v8412_v50 = vpop.f32.mrb[155].mxu0  ;;  %v3653_v23 = vadd.f32 %v11823_v1, %v12113_v2 }
 0x436   : > { %v4210_v3 = vsel %vm4207_vm10, %v4208_v15, %v4209_v58  ;;  %v4211_v50 = vrot.slane %v11883_v28, 1  ;;  %v4499_v2 = vshll.u32 %v12117_v38, 16 }
 0x437   : > { %v3654_v24 = vadd.f32 %v11823_v1, %v3617_v63  ;;  %v4215_v63 = vrot.slane %v11928_v13, 1  ;;  %v4221_v13 = vrot.slane %v11994_v56, 1  ;;  %v4227_v56 = vrot.slane %v12060_v31, 1 }
 0x438   : > { %v4213_v34 = vsel %vm4207_vm10, %v4211_v50, %v4212_v27  ;;  %v4229_v31 = vrot.slane %v12088_v55, 1  ;;  %v4501_v33 = vrot.slane %v4499_v2, 1  ;;  %v12385_v50 = vld [vmem:[%s9298_s28 + $0x30] sm:$0xf] }
 0x439   : > { %v3684_v26 = vmax.f32 %v3654_v24, 0.0  ;;  %v4214_v24 = vrot.slane %v11915_v17, 1 }
 0x43a   : > { %v3583_v39 = vpop.f32.mrb[156].mxu0 }
 0x43b   : > { %v3618_v54 = vadd.f32 %v3583_v39, %v11810_v40  ;;  %v8415_v18 = vpop.f32.mrb[157].mxu0  ;;  %8438 = vmatmul.mubr.msk.bf16.vlgmr.msra.gmra.mrb[124].mxu1 %vm3950_vm1, %v11883_v28  ;;  %v12185_v39 = vsel %vm4207_vm10, %v4214_v24, %v4215_v63  ;;  %v7369_v24 = vrot.slane %v12385_v50, 9 }
 0x43c   : > { %8454 = vmatpush3.bf16.msra.mxu1 %v11905_v46  ;;  %v3586_v10 = vpop.f32.mrb[158].mxu0  ;;  %8441 = vmatprep.mubr.msk.bf16.mxu1 %vm3950_vm1, %v11915_v17  ;;  %v3824_v46 = vsel %vm3761_vm2, %v3684_v26, 0.0  ;;  %v12194_v18 = vsel %vm4207_vm10, %v4217_v30, %v4218_v21  ;;  %v4226_v26 = vrot.slane %v12049_v49, 1  ;;  %v12393_v21 = vld [vmem:[%s9298_s28 + $0x40] sm:$0xf] }
 0x43d   : > { %v3655_v12 = vadd.f32 %v11823_v1, %v3618_v54  ;;  %v3619_v9 = vadd.f32 %v3586_v10, %v11813_v61  ;;  %8471 = vmatprep.subr.bf16.mxu1 %v9088_v45  ;;  %v8416_v25 = vpop.f32.mrb[159].mxu0  ;;  %v4220_v54 = vrot.slane %v11983_v60, 1  ;;  %v4223_v10 = vrot.slane %v12022_v43, 1 }
 0x43e   : > { %v12220_v25 = vsel %vm4207_vm10, %v4229_v31, %v4230_v16 }
 0x43f   : > { %v3685_v40 = vmax.f32 %v3655_v12, 0.0  ;;  %v3656_v48 = vadd.f32 %v11823_v1, %v3619_v9  ;;  %v12208_v12 = vsel %vm4207_vm10, %v4223_v10, %v4224_v20  ;;  %v12213_v9 = vsel %vm4207_vm10, %v4226_v26, %v4227_v56  ;;  %v12405_v56 = vld [vmem:[%s9298_s28 + $0x54] sm:$0xf]  ;;  %v12409_v26 = vld [vmem:[%s9298_s28 + $0x64] sm:$0xf] }
 0x440   : > { %v5385_v10 = vrot.slane %v12405_v56, 5 }
 0x441   : > { %v3825_v44 = vsel %vm12127_vm15, %v3685_v40, 0.0  ;;  %v3686_v61 = vmax.f32 %v3656_v48, 0.0  ;;  %v9090_v40 = vld [vmem:[%s13167_s3 + $0x28] sm:$0xff]   ;;  %v3683_v48 = vmax.f32 %v3653_v23, 0.0 }
 0x442   : > { %v12150_v59 = vpack.c.bf16 %v3825_v44, %v3824_v46  ;;  %v4497_v44 = vshrl.u32 %v12117_v38, 16 }
 0x443   : > { %v3826_v47 = vsel %vm3796_vm4, %v3686_v61, 0.0  ;;  %8442 = vmatmul.mubr.msk.bf16.gmra.mrb[128].mxu1 %vm3950_vm1, %v11956_v8 }
 0x444   : > { %v3846_v53 = vpack.c.bf16 %v3826_v47, %v3826_v47  ;;  %8445 = vmatprep.mubr.msk.bf16.mxu1 %vm3950_vm1, %v11983_v60  ;;  %v4881_v0 = vshll.u32 %v12150_v59, 16  ;;  %v4879_v7 = vshrl.u32 %v12150_v59, 16  ;;  %v5014_v51 = vrot.slane %v12150_v59, 1 }
 0x445   : > { %v4502_v61 = vor.u32 %v4501_v33, %v4497_v44  ;;  %v12438_v33 = vld [vmem:[%s9298_s28 + $0x68] sm:$0xf] }
 0x446   : > { %v4886_v19 = vshll.u32 %v3846_v53, 16  ;;  %v5015_v42 = vrot.slane %v3846_v53, 1  ;;  %v4883_v32 = vrot.slane %v4881_v0, 1  ;;  %v9092_v53 = vld [vmem:[%s13167_s3 + $0x38] sm:$0xff]  }
 0x448   : > { %v4888_v11 = vrot.slane %v4886_v19, 1  ;;  %v4884_v62 = vor.u32 %v4883_v32, %v4879_v7  ;;  %v12160_v52 = vsel %vm4207_vm10, %v5014_v51, %v5015_v42  ;;  %v4632_v7 = vrot.slane %v12117_v38, 1  ;;  %v9093_v42 = vld [vmem:[%s13167_s3 + $0x40] sm:$0xff]   ;;  %v12369_v32 = vld [vmem:[%s9298_s28 + $0x34] sm:$0xf] }
 0x449   : > { %v5371_v51 = vrot.slane %v12369_v32, 5 }
 0x44a   : > { %v12163_v6 = vsel %vm3847_vm3, %v4884_v62, %v4888_v11  ;;  %v12373_v11 = vld [vmem:[%s9298_s28 + $0x44] sm:$0xf] }
 0x44b   : > { %8446 = vmatmul.mubr.msk.bf16.gmra.mrb[132].mxu1 %vm3950_vm1, %v12022_v43  ;;  %v5378_v62 = vrot.slane %v12373_v11, 5  ;;  %v5372_v31 = vsel %vm10099_vm8, %v7369_v24, %v5371_v51 }
 0x44c   : > { %8449 = vmatprep.mubr.msk.bf16.mxu1 %vm3950_vm1, %v12049_v49 }
 0x44d   : > { %v5380_v30 = vrot.slane %v5378_v62, 4 }
 0x453   : > { %8450 = vmatmul.mubr.msk.bf16.gmra.mrb[136].mxu1 %vm3950_vm1, %v12088_v55 }
 0x454   : > { %8455 = vmatprep.mubr.msk.bf16.mxu1 %vm3950_vm1, %v4210_v3  ;;  %v12381_v3 = vld [vmem:[%s9298_s28 + $0x28] sm:$0xf] }
 0x455   : > { %v5367_v27 = vrot.slane %v12381_v3, 5 }
 0x45b   : > { %8456 = vmatmul.mubr.msk.bf16.vlgmr.msra.gmra.mrb[124].mxu1 %vm3950_vm1, %v4213_v34 }
 0x45c   : > { %8472 = vmatpush3.bf16.msra.mxu1 %v9088_v45  ;;  %8459 = vmatprep.mubr.msk.bf16.mxu1 %vm3950_vm1, %v12185_v39  ;;  %v12199_v45 = vsel %vm4207_vm10, %v4220_v54, %v4221_v13  ;;  %v7370_v13 = vrot.slane %v12393_v21, 9  ;;  %v12397_v54 = vld [vmem:[%s9298_s28 + $0x48] sm:$0xf] }
 0x45d   : > { %8489 = vmatprep.subr.bf16.mxu1 %v9089_v4 }
 0x463   : > { %8460 = vmatmul.mubr.msk.bf16.gmra.mrb[128].mxu1 %vm3950_vm1, %v12194_v18 }
 0x464   : > { %8463 = vmatprep.mubr.msk.bf16.mxu1 %vm3950_vm1, %v12199_v45 }
 0x46b   : > { %8464 = vmatmul.mubr.msk.bf16.gmra.mrb[132].mxu1 %vm3950_vm1, %v12208_v12 }
 0x46c   : > { %8467 = vmatprep.mubr.msk.bf16.mxu1 %vm3950_vm1, %v12213_v9 }
 0x473   : > { %8468 = vmatmul.mubr.msk.bf16.gmra.mrb[136].mxu1 %vm3950_vm1, %v12220_v25 }
 0x474   : > { %8473 = vmatprep.mubr.msk.bf16.mxu1 %vm3950_vm1, %v11883_v28  ;;  %v9091_v28 = vld [vmem:[%s13167_s3 + $0x30] sm:$0xff]  }
 0x47b   : > { %8474 = vmatmul.mubr.msk.bf16.vlgmr.msra.gmra.mrb[124].mxu1 %vm3950_vm1, %v11915_v17 }
 0x47c   : > { %8490 = vmatpush3.bf16.msra.mxu1 %v9089_v4  ;;  %8477 = vmatprep.mubr.msk.bf16.mxu1 %vm3950_vm1, %v11956_v8  ;;  %v12389_v4 = vld [vmem:[%s9298_s28 + $0x38] sm:$0xf] }
 0x47d   : > { %8507 = vmatprep.subr.bf16.mxu1 %v9090_v40 }
 0x483   : > { %8478 = vmatmul.mubr.msk.bf16.gmra.mrb[128].mxu1 %vm3950_vm1, %v11983_v60 }
 0x484   : > { %8481 = vmatprep.mubr.msk.bf16.mxu1 %vm3950_vm1, %v12022_v43 }
 0x48b   : > { %8482 = vmatmul.mubr.msk.bf16.gmra.mrb[132].mxu1 %vm3950_vm1, %v12049_v49 }
 0x48c   : > { %8485 = vmatprep.mubr.msk.bf16.mxu1 %vm3950_vm1, %v12088_v55 }
 0x493   : > { %8486 = vmatmul.mubr.msk.bf16.gmra.mrb[136].mxu1 %vm3950_vm1, %v12117_v38 }
 0x494   : > { %8491 = vmatprep.mubr.msk.bf16.mxu1 %vm3950_vm1, %v11908_v29  ;;  %v3823_v29 = vsel %vm3793_vm7, %v3683_v48, 0.0 }
 0x495   : > { %v3844_v1 = vpack.c.bf16 %v3823_v29, %v3823_v29  ;;  %v5387_v29 = vrot.slane %v5385_v10, 4 }
 0x497   : > { %v4504_v46 = vshll.u32 %v3844_v1, 16  ;;  %v4633_v0 = vrot.slane %v3844_v1, 1  ;;  %v12434_v1 = vld [vmem:[%s9298_s28 + $0x60] sm:$0xf] }
 0x498   : > { %v7372_v2 = vrot.slane %v12434_v1, 9 }
 0x499   : > { %v4506_v14 = vrot.slane %v4504_v46, 1  ;;  %v4634_v19 = vsel %vm4207_vm10, %v4632_v7, %v4633_v0 }
 0x49b   : > { %8492 = vmatmul.mubr.msk.bf16.vlgmr.msra.gmra.mrb[124].mxu1 %vm3950_vm1, %v11950_v35  ;;  %v4507_v47 = vsel %vm3847_vm3, %v4502_v61, %v4506_v14  ;;  %v5395_v14 = vrot.slane %v12438_v33, 5  ;;  %vm5708_vm3 = vsmask.f32 6416 }
 0x49c   : > { %8508 = vmatpush3.bf16.msra.mxu1 %v9090_v40  ;;  %8495 = vmatprep.mubr.msk.bf16.mxu1 %vm3950_vm1, %v11976_v5  ;;  %v5379_v40 = vsel %vm10099_vm8, %v7370_v13, %v5378_v62  ;;  %v13304_v62 = vshll.u32 %v12385_v50, 16  ;;  %vm12738_vm9 = vmor %vm5707_vm12, %vm5708_vm3 }
 0x49d   : > { %8525 = vmatprep.subr.bf16.mxu1 %v9091_v28 }
 0x4a3   : > { %8496 = vmatmul.mubr.msk.bf16.gmra.mrb[128].mxu1 %vm3950_vm1, %v12016_v57 }
 0x4a4   : > { %8499 = vmatprep.mubr.msk.bf16.mxu1 %vm3950_vm1, %v12042_v41 }
 0x4ab   : > { %8500 = vmatmul.mubr.msk.bf16.gmra.mrb[132].mxu1 %vm3950_vm1, %v12082_v36 }
 0x4ac   : > { %8503 = vmatprep.mubr.msk.bf16.mxu1 %vm3950_vm1, %v12108_v22 }
 0x4b3   : > { %8504 = vmatmul.mubr.msk.bf16.gmra.mrb[136].mxu1 %vm3950_vm1, %v4507_v47 }
 0x4b4   : > { %8509 = vmatprep.mubr.msk.bf16.mxu1 %vm3950_vm1, %v4213_v34  ;;  %v5374_v34 = vrot.slane %v12389_v4, 5 }
 0x4bb   : > { %8510 = vmatmul.mubr.msk.bf16.vlgmr.msra.gmra.mrb[124].mxu1 %vm3950_vm1, %v12185_v39 }
 0x4bc   : > { %8526 = vmatpush3.bf16.msra.mxu1 %v9091_v28  ;;  %8513 = vmatprep.mubr.msk.bf16.mxu1 %vm3950_vm1, %v12194_v18 }
 0x4bd   : > { %8543 = vmatprep.subr.bf16.mxu1 %v9092_v53 }
 0x4c3   : > { %8514 = vmatmul.mubr.msk.bf16.gmra.mrb[128].mxu1 %vm3950_vm1, %v12199_v45 }
 0x4c4   : > { %8517 = vmatprep.mubr.msk.bf16.mxu1 %vm3950_vm1, %v12208_v12 }
 0x4cb   : > { %8518 = vmatmul.mubr.msk.bf16.gmra.mrb[132].mxu1 %vm3950_vm1, %v12213_v9 }
 0x4cc   : > { %8521 = vmatprep.mubr.msk.bf16.mxu1 %vm3950_vm1, %v12220_v25 }
 0x4d3   : > { %8522 = vmatmul.mubr.msk.bf16.gmra.mrb[136].mxu1 %vm3950_vm1, %v4634_v19 }
 0x4d4   : > { %8527 = vmatprep.mubr.msk.bf16.mxu1 %vm3950_vm1, %v11915_v17  ;;  %v421_v17 = vld [vmem:[%s13166_s2 + $0x4] sm:$0xf] }
 0x4db   : > { %8528 = vmatmul.mubr.msk.bf16.vlgmr.msra.gmra.mrb[124].mxu1 %vm3950_vm1, %v11956_v8  ;;  %v12333_v8 = vld [vmem:[%s13166_s2] sm:$0xf] }
 0x4dc   : > { %8544 = vmatpush3.bf16.msra.mxu1 %v9092_v53  ;;  %8531 = vmatprep.mubr.msk.bf16.mxu1 %vm3950_vm1, %v11983_v60  ;;  %v5608_v44 = vsel %vm1416_vm0, %v12333_v8, 0 }
 0x4dd   : > { %8561 = vmatprep.subr.bf16.mxu1 %v9093_v42 }
 0x4e3   : > { %8532 = vmatmul.mubr.msk.bf16.gmra.mrb[128].mxu1 %vm3950_vm1, %v12022_v43 }
 0x4e4   : > { %8535 = vmatprep.mubr.msk.bf16.mxu1 %vm3950_vm1, %v12049_v49  ;;  %v12354_v49 = vld [vmem:[%s9298_s28 + $0x18] sm:$0xf] }
 0x4eb   : > { %8536 = vmatmul.mubr.msk.bf16.gmra.mrb[132].mxu1 %vm3950_vm1, %v12088_v55  ;;  %v12358_v55 = vld [vmem:[%s9298_s28 + $0x24] sm:$0xf] }
 0x4ec   : > { %8539 = vmatprep.mubr.msk.bf16.mxu1 %vm3950_vm1, %v12117_v38 }
 0x4f3   : > { %8540 = vmatmul.mubr.msk.bf16.gmra.mrb[136].mxu1 %vm3950_vm1, %v12150_v59 }
 0x4f4   : > { %8545 = vmatprep.mubr.msk.bf16.mxu1 %vm3950_vm1, %v11950_v35  ;;  %v5460_v35 = vsel %vm1416_vm0, %v421_v17, 0 }
 0x4fb   : > { %8546 = vmatmul.mubr.msk.bf16.vlgmr.msra.gmra.mrb[124].mxu1 %vm3950_vm1, %v11976_v5  ;;  %v12346_v5 = vld [vmem:[%s9298_s28 + $0x14] sm:$0xf] }
 0x4fc   : > { %8562 = vmatpush3.bf16.msra.mxu1 %v9093_v42  ;;  %8549 = vmatprep.mubr.msk.bf16.mxu1 %vm3950_vm1, %v12016_v57  ;;  %v5357_v60 = vrot.slane %v12346_v5, 5  ;;  %v12350_v57 = vld [vmem:[%s9298_s28 + $0x10] sm:$0xf]  ;;  %v13312_v42 = vshrl.u32 %v12346_v5, 16 }
 0x4fd   : > { %9031 = vmatprep.subr.msk.bf16.mxu1 %vm1416_vm0, %v421_v17  ;;  %v7367_v43 = vrot.slane %v12350_v57, 9  ;;  %v13328_v0 = vshrl.u32 %v12350_v57, 16  ;;  %v13313_v7 = vshll.u32 %v12350_v57, 16 }
 0x4ff   : > { %v5358_v38 = vsel %vm10099_vm8, %v7367_v43, %v5357_v60 }
 0x503   : > { %8550 = vmatmul.mubr.msk.bf16.gmra.mrb[128].mxu1 %vm3950_vm1, %v12042_v41  ;;  %v5359_v41 = vrot.slane %v5357_v60, 4  ;;  %v13308_v60 = vshrl.u32 %v12358_v55, 16 }
 0x504   : > { %8553 = vmatprep.mubr.msk.bf16.mxu1 %vm3950_vm1, %v12082_v36  ;;  %v5360_v36 = vrot.slane %v12354_v49, 5 }
 0x506   : > { %v5361_v59 = vsel %vm10099_vm8, %v5359_v41, %v5360_v36 }
 0x507   : > { %v7375_v63 = vcombine.low %v5358_v38, %v5361_v59  ;;  %v12470_v59 = vld [vmem:[%s13166_s2 + $0x8] sm:$0xf] }
 0x50b   : > { %8554 = vmatmul.mubr.msk.bf16.gmra.mrb[132].mxu1 %vm3950_vm1, %v12108_v22  ;;  %v5364_v22 = vrot.slane %v12358_v55, 5 }
 0x50c   : > { %8557 = vmatprep.mubr.msk.bf16.mxu1 %vm3950_vm1, %v4507_v47 }
 0x50d   : > { %v5366_v15 = vrot.slane %v5364_v22, 4 }
 0x50f   : > { %v5368_v20 = vsel %vm10099_vm8, %v5366_v15, %v5367_v27  ;;  %v13305_v15 = vshrl.u32 %v12369_v32, 16  ;;  %v5142_v27 = vrot.slane %v13328_v0, 4 }
 0x513   : > { %8558 = vmatmul.mubr.msk.bf16.gmra.mrb[136].mxu1 %vm3950_vm1, %v12163_v6  ;;  %v12377_v6 = vld [vmem:[%s9298_s28 + $0x20] sm:$0xf] }
 0x514   : > { %8563 = vmatprep.mubr.msk.bf16.mxu1 %vm3950_vm1, %v12185_v39  ;;  %v7368_v58 = vrot.slane %v12377_v6, 9  ;;  %v5373_v39 = vrot.slane %v5371_v51, 4  ;;  %v13310_v17 = vshrl.u32 %v12377_v6, 16  ;;  %v13306_v51 = vshrl.u32 %v12385_v50, 16 }
 0x51b   : > { %8564 = vmatmul.mubr.msk.bf16.vlgmr.msra.gmra.mrb[124].mxu1 %vm3950_vm1, %v12194_v18  ;;  %v5381_v18 = vrot.slane %v12397_v54, 5 }
 0x51c   : > { %8580 = vmatpush3.bf16.msra.mxu1 %v5460_v35  ;;  %8567 = vmatprep.mubr.msk.bf16.mxu1 %vm3950_vm1, %v12199_v45  ;;  %v5365_v45 = vsel %vm10099_vm8, %v7368_v58, %v5364_v22  ;;  %v13309_v35 = vshll.u32 %v12377_v6, 16  ;;  %v12464_v22 = vld [vmem:[%s9298_s28 + $0x74] sm:$0xf]  ;;  %v13303_v58 = vshll.u32 %v12369_v32, 16 }
 0x51d   : > { %9032 = vmatprep.subr.msk.bf16.mxu1 %vm1416_vm0, %v12333_v8  ;;  %v5382_v28 = vsel %vm10099_vm8, %v5380_v30, %v5381_v18  ;;  %v12427_v23 = vcombine.low %v5365_v45, %v5368_v20  ;;  %v13307_v8 = vshll.u32 %v12358_v55, 16  ;;  %v5399_v38 = vrot.slane %v12464_v22, 5 }
 0x51e   : > { %v12445_v47 = vcombine.low %v5379_v40, %v5382_v28  ;;  %v5169_v13 = vrot.slane %v13309_v35, 5  ;;  %v5179_v18 = vrot.slane %v13308_v60, 4  ;;  %v5193_v40 = vrot.slane %v13304_v62, 5 }
 0x51f   : > { %v12498_v30 = vrot.slane %v13307_v8, 5  ;;  %v12520_v28 = vrot.slane %v13303_v58, 5  ;;  %v12533_v58 = vld [vmem:[%s9298_s28 + $0x80] sm:$0xf]  ;;  %v13314_v8 = vshrl.u32 %v12393_v21, 16 }
 0x520   : > { %v7374_v62 = vrot.slane %v12533_v58, 9 }
 0x523   : > { %8568 = vmatmul.mubr.msk.bf16.gmra.mrb[128].mxu1 %vm3950_vm1, %v12208_v12  ;;  %v5392_v12 = vrot.slane %v12409_v26, 5 }
 0x524   : > { %8571 = vmatprep.mubr.msk.bf16.mxu1 %vm3950_vm1, %v12213_v9  ;;  %v12415_v9 = vld [vmem:[%s9298_s28 + $0x50] sm:$0xf] }
 0x525   : > { %v7371_v16 = vrot.slane %v12415_v9, 9  ;;  %v5394_v46 = vrot.slane %v5392_v12, 4  ;;  %v5393_v41 = vsel %vm10099_vm8, %v7372_v2, %v5392_v12  ;;  %v12525_v2 = vld [vmem:[%s9298_s28 + $0x84] sm:$0xf] }
 0x527   : > { %v5386_v53 = vsel %vm10099_vm8, %v7371_v16, %v5385_v10  ;;  %v5396_v36 = vsel %vm10099_vm8, %v5394_v46, %v5395_v14  ;;  %v12507_v10 = vld [vmem:[%s9298_s28 + $0x70] sm:$0xf]  ;;  %v12511_v16 = vld [vmem:[%s9298_s28 + $0x78] sm:$0xf]  ;;  %v5406_v46 = vrot.slane %v12525_v2, 5 }
 0x528   : > { %v12504_v20 = vcombine.low %v5393_v41, %v5396_v36  ;;  %v7373_v12 = vrot.slane %v12507_v10, 9  ;;  %v5180_v41 = vor.u32 %v5179_v18, %v12498_v30  ;;  %v13316_v36 = vshll.u32 %v12381_v3, 16 }
 0x529   : > { %v5408_v60 = vrot.slane %v5406_v46, 4 }
 0x52b   : > { %8572 = vmatmul.mubr.msk.bf16.gmra.mrb[132].mxu1 %vm3950_vm1, %v12220_v25  ;;  %v5375_v25 = vsel %vm10099_vm8, %v5373_v39, %v5374_v34  ;;  %v5155_v34 = vrot.slane %v13312_v42, 4  ;;  %v5166_v39 = vrot.slane %v13310_v17, 4 }
 0x52c   : > { %8575 = vmatprep.mubr.msk.bf16.mxu1 %vm3950_vm1, %v4634_v19  ;;  %v12443_v61 = vcombine.low %v5372_v31, %v5375_v25  ;;  %v13311_v19 = vshll.u32 %v12346_v5, 16  ;;  %v5402_v31 = vrot.slane %v12511_v16, 5  ;;  %v5190_v25 = vrot.slane %v13306_v51, 4 }
 0x52e   : > { %v12486_v24 = vrot.slane %v13311_v19, 5 }
 0x533   : > { %8576 = vmatmul.mubr.msk.bf16.gmra.mrb[136].mxu1 %vm3950_vm1, %v12160_v52  ;;  %v12430_v52 = vld [vmem:[%s9298_s28 + $0x58] sm:$0xf] }
 0x534   : > { %8581 = vmatprep.mubr.msk.bf16.mxu1 %vm1370_vm5, %v7375_v63  ;;  %v5388_v48 = vrot.slane %v12430_v52, 5  ;;  %v5145_v63 = vrot.slane %v13313_v7, 5  ;;  %v5181_v7 = vrot.slane %v5180_v41, 4 }
 0x536   : > { %v5389_v43 = vsel %vm10099_vm8, %v5387_v29, %v5388_v48  ;;  %v5203_v48 = vrot.slane %v13305_v15, 4  ;;  %v5401_v29 = vrot.slane %v5399_v38, 4  ;;  %v5146_v14 = vor.u32 %v5145_v63, %v5142_v27  ;;  %v12537_v15 = vld [vmem:[%s9298_s28 + $0x88] sm:$0xf] }
 0x537   : > { %v12502_v45 = vcombine.low %v5386_v53, %v5389_v43  ;;  %v5156_v53 = vor.u32 %v5155_v34, %v12486_v24  ;;  %v5170_v43 = vor.u32 %v5169_v13, %v5166_v39  ;;  %v5409_v51 = vrot.slane %v12537_v15, 5 }
 0x538   : > { %v13315_v27 = vshll.u32 %v12393_v21, 16  ;;  %v5400_v63 = vsel %vm10099_vm8, %v7373_v12, %v5399_v38  ;;  %v5194_v34 = vor.u32 %v5193_v40, %v5190_v25  ;;  %v5204_v39 = vor.u32 %v5203_v48, %v12520_v28 }
 0x539   : > { %v13327_v13 = vshll.u32 %v12389_v4, 16  ;;  %v5403_v18 = vsel %vm10099_vm8, %v5401_v29, %v5402_v31  ;;  %v5147_v35 = vrot.slane %v5146_v14, 4  ;;  %v5157_v19 = vrot.slane %v5156_v53, 4 }
 0x53a   : > { %v5171_v42 = vrot.slane %v5170_v43, 4  ;;  %v5185_v38 = vrot.slane %v13316_v36, 5  ;;  %v5214_v12 = vrot.slane %v13314_v8, 4  ;;  %v5217_v25 = vrot.slane %v13315_v27, 5 }
 0x53b   : > { %8582 = vmatmul.mubr.msk.bf16.vlgmr.msra.gmra.mrb[124].mxu1 %vm1370_vm5, %v12427_v23  ;;  %v13325_v40 = vshll.u32 %v12373_v11, 16  ;;  %v13326_v31 = vshrl.u32 %v12373_v11, 16  ;;  %v5407_v48 = vsel %vm10099_vm8, %v7374_v62, %v5406_v46  ;;  %v5195_v29 = vrot.slane %v5194_v34, 4 }
 0x53c   : > { %8598 = vmatpush3.bf16.msra.mxu1 %v5608_v44  ;;  %8585 = vmatprep.mubr.msk.bf16.mxu1 %vm1370_vm5, %v12443_v61  ;;  %v13317_v44 = vshll.u32 %v12354_v49, 16  ;;  %v5205_v14 = vrot.slane %v5204_v39, 4  ;;  %v5209_v53 = vrot.slane %v13327_v13, 5  ;;  %v12566_v43 = vcombine.low %v5400_v63, %v5403_v18 }
 0x53d   : > { %9033 = vmatprep.subr.msk.bf16.mxu1 %vm1416_vm0, %v12470_v59  ;;  %v5410_v41 = vsel %vm10099_vm8, %v5408_v60, %v5409_v51  ;;  %v13324_v8 = vshrl.u32 %v12415_v9, 16  ;;  %v13318_v27 = vshll.u32 %v12415_v9, 16  ;;  %v5176_v46 = vsel %vm9451_vm6, %v5171_v42, %v12498_v30 }
 0x53e   : > { %v5161_v17 = vrot.slane %v13317_v44, 5  ;;  %13732 = vst [vmem:[#allocation7_spill] sm:$0xff] %v12566_v43  ;;  %v5152_v44 = vsel %vm9451_vm6, %v5147_v35, %v12486_v24  ;;  %v5186_v63 = vsel %vm9451_vm6, %v5181_v7, %v5185_v38  ;;  %v5218_v34 = vor.u32 %v5217_v25, %v5214_v12 }
 0x53f   : > { %v12584_v60 = vrot.slane %v13325_v40, 5  ;;  %v5227_v51 = vrot.slane %v13326_v31, 4  ;;  %v13319_v35 = vshll.u32 %v12397_v54, 16  ;;  %v5210_v7 = vsel %vm9451_vm6, %v5205_v14, %v5209_v53 }
 0x540   : > { %v5162_v62 = vsel %vm9451_vm6, %v5157_v19, %v5161_v17  ;;  %v5200_v19 = vsel %vm9451_vm6, %v5195_v29, %v12520_v28  ;;  %v13320_v42 = vshll.u32 %v12405_v56, 16  ;;  %v13321_v17 = vshrl.u32 %v12405_v56, 16 }
 0x541   : > { %v5238_v24 = vrot.slane %v13324_v8, 4  ;;  %v5241_v30 = vrot.slane %v13318_v27, 5  ;;  %v13323_v39 = vshrl.u32 %v12434_v1, 16  ;;  %v13322_v28 = vshll.u32 %v12434_v1, 16 }
 0x542   : > { %v12606_v18 = vcombine.low %v5407_v48, %v5410_v41  ;;  %v7391_v38 = vcombine.low %v5152_v44, %v5162_v62  ;;  %v12608_v12 = vcombine.low %v5176_v46, %v5186_v63  ;;  %v5879_v25 = vsel %vm1416_vm0, %v12470_v59, 0 }
 0x543   : > { %8586 = vmatmul.mubr.msk.bf16.gmra.mrb[128].mxu1 %vm1370_vm5, %v12445_v47  ;;  %v12612_v29 = vcombine.low %v5200_v19, %v5210_v7  ;;  %v12614_v14 = vrot.slane %v5218_v34, 4  ;;  %v5228_v53 = vor.u32 %v5227_v51, %v12584_v60  ;;  %v12619_v27 = vrot.slane %v13319_v35, 5 }
 0x544   : > { %8589 = vmatprep.mubr.msk.bf16.mxu1 %vm1370_vm5, %v12502_v45  ;;  %13734 = vst [vmem:[#allocation22_spill] sm:$0xff] %v12606_v18  ;;  %v12623_v48 = vrot.slane %v13320_v42, 5  ;;  %v5251_v44 = vrot.slane %v13321_v17, 4  ;;  %v13329_v41 = vshll.u32 %v12409_v26, 16  ;;  %v13330_v59 = vshrl.u32 %v12409_v26, 16 }
 0x545   : > { %v5242_v62 = vor.u32 %v5241_v30, %v5238_v24  ;;  %v13336_v46 = vshll.u32 %v12430_v52, 16  ;;  %v5262_v63 = vrot.slane %v13323_v39, 4  ;;  %v5265_v34 = vrot.slane %v13322_v28, 5 }
 0x546   : > { %v13334_v51 = vshrl.u32 %v12507_v10, 16  ;;  %v13332_v19 = vshll.u32 %v12507_v10, 16  ;;  %v13331_v7 = vshll.u32 %v12464_v22, 16  ;;  %v13333_v35 = vshrl.u32 %v12464_v22, 16 }
 0x547   : > { %v13335_v42 = vshrl.u32 %v12533_v58, 16  ;;  %v13337_v24 = vshll.u32 %v12533_v58, 16  ;;  %v13340_v30 = vshll.u32 %v12525_v2, 16  ;;  %v13344_v17 = vshrl.u32 %v12525_v2, 16 }
 0x548   : > { %v5229_v28 = vrot.slane %v5228_v53, 4  ;;  %v5252_v39 = vor.u32 %v5251_v44, %v12623_v48  ;;  %v12647_v8 = vrot.slane %v13329_v41, 5  ;;  %v5275_v40 = vrot.slane %v13330_v59, 4 }
 0x549   : > { %v5224_v31 = vsel %vm9451_vm6, %v12614_v14, %v12584_v60  ;;  %v5243_v13 = vrot.slane %v5242_v62, 4  ;;  %v5257_v53 = vrot.slane %v13336_v46, 5  ;;  %v5266_v0 = vor.u32 %v5265_v34, %v5262_v63 }
 0x54a   : > { %v5286_v44 = vrot.slane %v13334_v51, 4  ;;  %v5289_v41 = vrot.slane %v13332_v19, 5  ;;  %v12664_v59 = vrot.slane %v13331_v7, 5  ;;  %v5310_v60 = vrot.slane %v13335_v42, 4 }
 0x54b   : > { %8590 = vmatmul.mubr.msk.bf16.gmra.mrb[132].mxu1 %vm1370_vm5, %v12504_v20  ;;  %v5313_v14 = vrot.slane %v13337_v24, 5  ;;  %v12674_v62 = vrot.slane %v13340_v30, 5  ;;  %v5323_v63 = vrot.slane %v13344_v17, 4  ;;  %v5253_v34 = vrot.slane %v5252_v39, 4 }
 0x54c   : > { %8593 = vmatprep.mubr.msk.bf16.mxu1 %vm1370_vm5, %v12566_v43  ;;  %v5276_v7 = vor.u32 %v5275_v40, %v12647_v8  ;;  %v13736_v42 = vshll.u32 %v12350_v57, 16  ;;  %v13737_v24 = vshrl.u32 %v12346_v5, 16  ;;  %v13738_v30 = vshll.u32 %v12346_v5, 16 }
 0x54d   : > { %v5719_v43 = vshrl.u32 %v12354_v49, 16  ;;  %v5290_v17 = vor.u32 %v5289_v41, %v5286_v44  ;;  %v13349_v40 = vshll.u32 %v12511_v16, 16  ;;  %v5324_v5 = vor.u32 %v5323_v63, %v12674_v62  ;;  %v12702_v41 = vld [vmem:[%s13166_s2 + $0xc] sm:$0xf] }
 0x54e   : > { %v5711_v46 = vrot.slane %v13736_v42, 6  ;;  %v5715_v37 = vrot.slane %v13738_v30, 6  ;;  %v5314_v42 = vor.u32 %v5313_v14, %v5310_v60  ;;  %v5267_v30 = vrot.slane %v5266_v0, 4 }
 0x54f   : > { %v13740_v60 = vshll.u32 %v12354_v49, 16  ;;  %v5291_v63 = vrot.slane %v5290_v17, 4  ;;  %v13741_v0 = vshll.u32 %v12537_v15, 16  ;;  %v13742_v49 = vshrl.u32 %v12377_v6, 16 }
 0x550   : > { %v13743_v17 = vshll.u32 %v12377_v6, 16 }
 0x551   : > { %v5722_v14 = vrot.slane %v13740_v60, 6 }
 0x553   : > { %8594 = vmatmul.mubr.msk.bf16.gmra.mrb[136].mxu1 %vm1370_vm5, %v12606_v18  ;;  %v5714_v18 = vrot.slane %v13737_v24, 5  ;;  %v5258_v24 = vsel %vm9451_vm6, %v5253_v34, %v5257_v53  ;;  %v5305_v53 = vrot.slane %v13349_v40, 5  ;;  %v5325_v34 = vrot.slane %v5324_v5, 4 }
 0x554   : > { %8599 = vmatprep.mubr.msk.bf16.mxu1 %vm1370_vm5, %v7391_v38  ;;  %v5299_v38 = vrot.slane %v13333_v35, 4  ;;  %v13735_v35 = vshrl.u32 %v12350_v57, 16  ;;  %v5234_v57 = vsel %vm9451_vm6, %v5229_v28, %v12619_v27  ;;  %v5277_v27 = vrot.slane %v5276_v7, 4 }
 0x555   : > { %v13739_v28 = vshll.u32 %v12438_v33, 16  ;;  %v5329_v7 = vrot.slane %v13741_v0, 5 }
 0x556   : > { %v5710_v51 = vrot.slane %v13735_v35, 5  ;;  %v5300_v39 = vor.u32 %v5299_v38, %v12664_v59  ;;  %v5248_v35 = vsel %vm9451_vm6, %v5243_v13, %v12623_v48  ;;  %v5716_v48 = vor.u32 %v5715_v37, %v5714_v18 }
 0x557   : > { %v5281_v44 = vrot.slane %v13739_v28, 5  ;;  %v5721_v38 = vrot.slane %v5719_v43, 5  ;;  %v12720_v37 = vcombine.low %v5224_v31, %v5234_v57  ;;  %v5725_v43 = vrot.slane %v13742_v49, 5 }
 0x558   : > { %v5712_v13 = vor.u32 %v5711_v46, %v5710_v51  ;;  %v5301_v19 = vrot.slane %v5300_v39, 4  ;;  %v5726_v18 = vrot.slane %v13743_v17, 6  ;;  %v12726_v46 = vcombine.low %v5248_v35, %v5258_v24 }
 0x559   : > { %v5718_v39 = vrot.slane %v5716_v48, 4  ;;  %v5723_v28 = vor.u32 %v5722_v14, %v5721_v38  ;;  %v5282_v5 = vsel %vm9451_vm6, %v5277_v27, %v5281_v44  ;;  %v5296_v31 = vsel %vm9451_vm6, %v5291_v63, %v12664_v59 }
 0x55a   : > { %v5713_v51 = vrot.slane %v5712_v13, 4  ;;  %v5306_v6 = vsel %vm9451_vm6, %v5301_v19, %v5305_v53  ;;  %v13746_v24 = vshrl.u32 %v12358_v55, 16  ;;  %v13747_v27 = vshll.u32 %v12358_v55, 16 }
 0x55b   : > { %8600 = vmatmul.mubr.msk.bf16.vlgmr.msra.gmra.mrb[124].mxu1 %vm1370_vm5, %v12608_v12  ;;  %v5727_v19 = vor.u32 %v5726_v18, %v5725_v43  ;;  %v5734_v44 = vshrl.u32 %v12381_v3, 16  ;;  %v13748_v13 = vshrl.u32 %v12385_v50, 16  ;;  %v5724_v14 = vsel %vm12738_vm9, %v5718_v39, %v5723_v28 }
 0x55c   : > { %8616 = vmatpush3.bf16.msra.mxu1 %v5879_v25  ;;  %8603 = vmatprep.mubr.msk.bf16.mxu1 %vm1370_vm5, %v12612_v29  ;;  %v5315_v25 = vrot.slane %v5314_v42, 4  ;;  %v5272_v42 = vsel %vm9451_vm6, %v5267_v30, %v12647_v8  ;;  %v5330_v8 = vsel %vm9451_vm6, %v5325_v34, %v5329_v7  ;;  %v5729_v30 = vrot.slane %v13746_v24, 5 }
 0x55d   : > { %9034 = vmatprep.subr.msk.bf16.mxu1 %vm1416_vm0, %v12702_v41  ;;  %v5730_v59 = vrot.slane %v13747_v27, 6  ;;  %v5740_v38 = vrot.slane %v13748_v13, 5  ;;  %v5717_v55 = vsel %vm12738_vm9, %v5713_v51, %v5716_v48  ;;  %v12764_v63 = vcombine.low %v5272_v42, %v5282_v5  ;;  %v12780_v42 = vld [vmem:[%s9298_s28 + $0x90] sm:$0xf]  ;;  %v12792_v27 = vld [vmem:[%s9298_s28 + $0x98] sm:$0xf] }
 0x55e   : > { %v5320_v35 = vsel %vm9451_vm6, %v5315_v25, %v12674_v62  ;;  %v13749_v62 = vshll.u32 %v12385_v50, 16  ;;  %v13750_v53 = vshrl.u32 %v12369_v32, 16  ;;  %v13751_v7 = vshll.u32 %v12369_v32, 16 }
 0x55f   : > { %v5749_v25 = vshrl.u32 %v12389_v4, 16  ;;  %v12771_v34 = vcombine.low %v5296_v31, %v5306_v6  ;;  %v12773_v49 = vcombine.low %v5320_v35, %v5330_v8  ;;  %v12775_v48 = vor.u32 %v5730_v59, %v5729_v30  ;;  %v12785_v31 = vld [vmem:[%s9298_s28 + $0x94] sm:$0xf] }
 0x560   : > { %v5741_v60 = vrot.slane %v13749_v62, 6  ;;  %v5744_v0 = vrot.slane %v13750_v53, 5  ;;  %v5745_v50 = vrot.slane %v13751_v7, 6  ;;  %v13752_v43 = vshll.u32 %v12381_v3, 16 }
 0x561   : > { %v7407_v18 = vcombine.low %v5717_v55, %v5724_v14  ;;  %v5728_v51 = vrot.slane %v5727_v19, 4  ;;  %v5736_v39 = vrot.slane %v5734_v44, 5  ;;  %v13348_v32 = vshrl.u32 %v12780_v42, 16 }
 0x562   : > { %v5737_v17 = vrot.slane %v13752_v43, 6  ;;  %v5742_v28 = vor.u32 %v5741_v60, %v5740_v38  ;;  %v13347_v5 = vshll.u32 %v12780_v42, 16  ;;  %v13346_v6 = vshll.u32 %v12785_v31, 16 }
 0x563   : > { %8604 = vmatmul.mubr.msk.bf16.gmra.mrb[128].mxu1 %vm1370_vm5, %v12720_v37  ;;  %v13345_v35 = vshrl.u32 %v12785_v31, 16  ;;  %v5746_v8 = vor.u32 %v5745_v50, %v5744_v0  ;;  %v5751_v24 = vrot.slane %v5749_v25, 5  ;;  %v13753_v3 = vshll.u32 %v12389_v4, 16 }
 0x564   : > { %8607 = vmatprep.mubr.msk.bf16.mxu1 %vm1370_vm5, %v12726_v46  ;;  %v13350_v59 = vshll.u32 %v12792_v27, 16  ;;  %v6272_v19 = vrot.slane %v13348_v32, 5  ;;  %v6273_v44 = vrot.slane %v13347_v5, 6  ;;  %v6277_v38 = vrot.slane %v13346_v6, 6 }
 0x565   : > { %v5752_v30 = vrot.slane %v13753_v3, 6  ;;  %v6276_v13 = vrot.slane %v13345_v35, 5  ;;  %v5733_v4 = vrot.slane %v12775_v48, 4  ;;  %v5738_v62 = vor.u32 %v5737_v17, %v5736_v39 }
 0x566   : > { %v13754_v60 = vshrl.u32 %v12393_v21, 16  ;;  %v6281_v14 = vshrl.u32 %v12792_v27, 16  ;;  %v5743_v53 = vrot.slane %v5742_v28, 4  ;;  %v6274_v0 = vor.u32 %v6273_v44, %v6272_v19 }
 0x567   : > { %v6278_v7 = vor.u32 %v6277_v38, %v6276_v13  ;;  %v6284_v50 = vrot.slane %v13350_v59, 6  ;;  %v5748_v25 = vrot.slane %v5746_v8, 4  ;;  %v13755_v43 = vshll.u32 %v12393_v21, 16 }
 0x568   : > { %v5755_v55 = vrot.slane %v13754_v60, 5  ;;  %v13756_v17 = vshrl.u32 %v12373_v11, 16  ;;  %v6283_v35 = vrot.slane %v6281_v14, 5  ;;  %v5753_v60 = vor.u32 %v5752_v30, %v5751_v24 }
 0x569   : > { %v5756_v3 = vrot.slane %v13755_v43, 6  ;;  %v13757_v6 = vshll.u32 %v12373_v11, 16  ;;  %v6275_v32 = vrot.slane %v6274_v0, 4  ;;  %v6280_v40 = vrot.slane %v6278_v7, 4 }
 0x56a   : > { %v5759_v39 = vrot.slane %v13756_v17, 5  ;;  %v5764_v28 = vshrl.u32 %v12397_v54, 16  ;;  %v13758_v19 = vshrl.u32 %v12415_v9, 16  ;;  %v13759_v13 = vshll.u32 %v12415_v9, 16 }
 0x56b   : > { %8608 = vmatmul.mubr.msk.bf16.gmra.mrb[132].mxu1 %vm1370_vm5, %v12764_v63  ;;  %v5760_v5 = vrot.slane %v13757_v6, 6  ;;  %v6285_v21 = vor.u32 %v6284_v50, %v6283_v35  ;;  %v13760_v43 = vshrl.u32 %v12405_v56, 16  ;;  %v13761_v14 = vshll.u32 %v12405_v56, 16 }
 0x56c   : > { %8611 = vmatprep.mubr.msk.bf16.mxu1 %vm1370_vm5, %v12771_v34  ;;  %v5770_v44 = vrot.slane %v13758_v19, 5  ;;  %v5771_v38 = vrot.slane %v13759_v13, 6  ;;  %v5779_v11 = vshrl.u32 %v12430_v52, 16  ;;  %v6279_v6 = vsel %vm12738_vm9, %v6275_v32, %v6278_v7 }
 0x56d   : > { %v5774_v59 = vrot.slane %v13760_v43, 5  ;;  %v5775_v24 = vrot.slane %v13761_v14, 6  ;;  %v5732_v30 = vsel %vm12738_vm9, %v5728_v51, %v12775_v48  ;;  %v5739_v9 = vsel %vm12738_vm9, %v5733_v4, %v5738_v62 }
 0x56e   : > { %v5747_v35 = vsel %vm12738_vm9, %v5743_v53, %v5746_v8  ;;  %v6286_v0 = vsel %vm12738_vm9, %v6280_v40, %v6285_v21  ;;  %v5754_v56 = vsel %vm12738_vm9, %v5748_v25, %v5753_v60  ;;  %v5757_v50 = vor.u32 %v5756_v3, %v5755_v55 }
 0x56f   : > { %v5761_v17 = vor.u32 %v5760_v5, %v5759_v39  ;;  %v12842_v19 = vcombine.low %v6279_v6, %v6286_v0  ;;  %v5766_v48 = vrot.slane %v5764_v28, 5  ;;  %v13762_v51 = vshll.u32 %v12397_v54, 16 }
 0x570   : > { %v5772_v8 = vor.u32 %v5771_v38, %v5770_v44  ;;  %v5776_v4 = vor.u32 %v5775_v24, %v5774_v59  ;;  %v5781_v62 = vrot.slane %v5779_v11, 5  ;;  %v13763_v40 = vshll.u32 %v12430_v52, 16 }
 0x571   : > { %v5767_v32 = vrot.slane %v13762_v51, 6  ;;  %v12851_v7 = vcombine.low %v5732_v30, %v5739_v9  ;;  %v6025_v5 = vsel %vm1416_vm0, %v12702_v41, 0  ;;  %v12855_v55 = vcombine.low %v5747_v35, %v5754_v56 }
 0x572   : > { %v5782_v53 = vrot.slane %v13763_v40, 6  ;;  %v5758_v25 = vrot.slane %v5757_v50, 4  ;;  %v5763_v3 = vrot.slane %v5761_v17, 4  ;;  %v13764_v54 = vshrl.u32 %v12434_v1, 16  ;;  %v424_v50 = vld [vmem:[%s13166_s2 + $0x10] sm:$0xf] }
 0x573   : > { %8612 = vmatmul.mubr.msk.bf16.gmra.mrb[136].mxu1 %vm1370_vm5, %v12773_v49  ;;  %v5768_v59 = vor.u32 %v5767_v32, %v5766_v48  ;;  %v13766_v28 = vshrl.u32 %v12409_v26, 16  ;;  %v13767_v44 = vshll.u32 %v12409_v26, 16  ;;  %v5794_v38 = vshrl.u32 %v12438_v33, 16 }
 0x574   : > { %8617 = vmatprep.mubr.msk.bf16.mxu1 %vm1370_vm5, %v7407_v18  ;;  %v5785_v39 = vrot.slane %v13764_v54, 5  ;;  %v13765_v18 = vshll.u32 %v12434_v1, 16  ;;  %v5773_v41 = vrot.slane %v5772_v8, 4  ;;  %v5778_v21 = vrot.slane %v5776_v4, 4 }
 0x575   : > { %v5789_v52 = vrot.slane %v13766_v28, 5  ;;  %v5790_v13 = vrot.slane %v13767_v44, 6  ;;  %v5783_v43 = vor.u32 %v5782_v53, %v5781_v62  ;;  %v13768_v14 = vshrl.u32 %v12507_v10, 16 }
 0x576   : > { %v5786_v60 = vrot.slane %v13765_v18, 6  ;;  %v13769_v11 = vshll.u32 %v12507_v10, 16  ;;  %v13770_v1 = vshrl.u32 %v12464_v22, 16  ;;  %v13771_v9 = vshll.u32 %v12464_v22, 16 }
 0x577   : > { %v5800_v24 = vrot.slane %v13768_v14, 5  ;;  %v5809_v26 = vshrl.u32 %v12511_v16, 16  ;;  %v5762_v0 = vsel %vm12738_vm9, %v5758_v25, %v5761_v17  ;;  %v5769_v10 = vsel %vm12738_vm9, %v5763_v3, %v5768_v59 }
 0x578   : > { %v5801_v6 = vrot.slane %v13769_v11, 6  ;;  %v5804_v30 = vrot.slane %v13770_v1, 5  ;;  %v5805_v35 = vrot.slane %v13771_v9, 6  ;;  %v5787_v56 = vor.u32 %v5786_v60, %v5785_v39 }
 0x579   : > { %v5791_v48 = vor.u32 %v5790_v13, %v5789_v52  ;;  %v5796_v51 = vrot.slane %v5794_v38, 5  ;;  %v13772_v22 = vshll.u32 %v12438_v33, 16  ;;  %v5777_v17 = vsel %vm12738_vm9, %v5773_v41, %v5776_v4 }
 0x57a   : > { %v5784_v8 = vsel %vm12738_vm9, %v5778_v21, %v5783_v43  ;;  %v5802_v62 = vor.u32 %v5801_v6, %v5800_v24  ;;  %v5806_v40 = vor.u32 %v5805_v35, %v5804_v30  ;;  %v5811_v53 = vrot.slane %v5809_v26, 5 }
 0x57b   : > { %8618 = vmatmul.mubr.msk.bf16.vlgmr.msra.gmra.mrb[124].mxu1 %vm1370_vm5, %v12851_v7  ;;  %v5797_v32 = vrot.slane %v13772_v22, 6  ;;  %v13773_v25 = vshll.u32 %v12511_v16, 16  ;;  %v12895_v33 = vcombine.low %v5762_v0, %v5769_v10  ;;  %v12897_v54 = vcombine.low %v5777_v17, %v5784_v8 }
 0x57c   : > { %8634 = vmatpush3.bf16.msra.mxu1 %v6025_v5  ;;  %8621 = vmatprep.mubr.msk.bf16.mxu1 %vm1370_vm5, %v12855_v55  ;;  %v5788_v5 = vrot.slane %v5787_v56, 4  ;;  %v5793_v39 = vrot.slane %v5791_v48, 4  ;;  %v13774_v4 = vshrl.u32 %v12533_v58, 16  ;;  %v13775_v59 = vshll.u32 %v12533_v58, 16 }
 0x57d   : > { %v5812_v3 = vrot.slane %v13773_v25, 6  ;;  %9035 = vmatprep.subr.msk.bf16.mxu1 %vm1416_vm0, %v424_v50  ;;  %v5798_v18 = vor.u32 %v5797_v32, %v5796_v51  ;;  %v13776_v52 = vshrl.u32 %v12525_v2, 16  ;;  %v13777_v16 = vshll.u32 %v12525_v2, 16  ;;  %v425_v32 = vld [vmem:[%s13166_s2 + $0x14] sm:$0xf] }
 0x57e   : > { %v5815_v60 = vrot.slane %v13774_v4, 5  ;;  %v5816_v28 = vrot.slane %v13775_v59, 6  ;;  %v5824_v38 = vshrl.u32 %v12537_v15, 16  ;;  %v5803_v41 = vrot.slane %v5802_v62, 4 }
 0x57f   : > { %v5819_v44 = vrot.slane %v13776_v52, 5  ;;  %v5820_v13 = vrot.slane %v13777_v16, 6  ;;  %v5808_v21 = vrot.slane %v5806_v40, 4  ;;  %v5813_v43 = vor.u32 %v5812_v3, %v5811_v53  ;;  %v426_v16 = vld [vmem:[%s13166_s2 + $0x18] sm:$0xf] }
 0x580   : > { %v5792_v14 = vsel %vm12738_vm9, %v5788_v5, %v5791_v48  ;;  %v5799_v58 = vsel %vm12738_vm9, %v5793_v39, %v5798_v18  ;;  %v5817_v24 = vor.u32 %v5816_v28, %v5815_v60  ;;  %v5826_v11 = vrot.slane %v5824_v38, 5 }
 0x581   : > { %v5821_v2 = vor.u32 %v5820_v13, %v5819_v44  ;;  %v13778_v6 = vshll.u32 %v12537_v15, 16  ;;  %v5807_v30 = vsel %vm12738_vm9, %v5803_v41, %v5806_v40  ;;  %v5814_v9 = vsel %vm12738_vm9, %v5808_v21, %v5813_v43  ;;  %v12994_v21 = vld [vmem:[%s9298_s28 + $0xa0] sm:$0xf] }
 0x582   : > { %v12922_v35 = vcombine.low %v5792_v14, %v5799_v58  ;;  %v12924_v26 = vcombine.low %v5807_v30, %v5814_v9  ;;  %v5818_v0 = vrot.slane %v5817_v24, 4  ;;  %v6157_v22 = vsel %vm1416_vm0, %v424_v50, 0  ;;  %v12999_v58 = vld [vmem:[%s9298_s28 + $0xa4] sm:$0xf]  ;;  %v13784_v30 = vld [vmem:[#allocation7_spill] sm:$0xff] }
 0x583   : > { %8622 = vmatmul.mubr.msk.bf16.gmra.mrb[128].mxu1 %vm1370_vm5, %v12895_v33  ;;  %v5827_v1 = vrot.slane %v13778_v6, 6  ;;  %v5823_v56 = vrot.slane %v5821_v2, 4  ;;  %v13779_v17 = vshrl.u32 %v12780_v42, 16  ;;  %v13781_v50 = vshll.u32 %v12785_v31, 16 }
 0x584   : > { %8625 = vmatprep.mubr.msk.bf16.mxu1 %vm1370_vm5, %v12897_v54  ;;  %v5822_v15 = vsel %vm12738_vm9, %v5818_v0, %v5821_v2  ;;  %v13782_v53 = vshrl.u32 %v12785_v31, 16  ;;  %v13783_v4 = vshll.u32 %v12792_v27, 16  ;;  %v6294_v44 = vsel %vm1416_vm0, %v425_v32, 0  ;;  %v13004_v2 = vld [vmem:[%s9298_s28 + $0xa8] sm:$0xf]  ;;  %s13115_s28 = scalar_lea.vmem %s13173_s9, %s7003_s16 }
 0x585   : > { %v5828_v10 = vor.u32 %v5827_v1, %v5826_v11  ;;  %v5997_v8 = vrot.slane %v13779_v17, 4  ;;  %v6006_v40 = vrot.slane %v13781_v50, 5  ;;  %v7432_v13 = vrot.slane %v12780_v42, 9 }
 0x586   : > { %v6010_v25 = vrot.slane %v13782_v53, 4  ;;  %v6016_v60 = vrot.slane %v13783_v4, 5  ;;  %v6148_v41 = vrot.slane %v12792_v27, 5  ;;  %v6410_v43 = vshrl.u32 %v12994_v21, 16 }
 0x587   : > { %v5829_v48 = vsel %vm12738_vm9, %v5823_v56, %v5828_v10  ;;  %v6413_v14 = vshll.u32 %v12994_v21, 16  ;;  %v6419_v24 = vshll.u32 %v12999_v58, 16  ;;  %v6429_v11 = vshll.u32 %v13004_v2, 16  ;;  %v13786_v10 = vld [vmem:[#allocation22_spill] sm:$0xff] }
 0x588   : > { %v12934_v51 = vcombine.low %v5822_v15, %v5829_v48  ;;  %v6011_v5 = vor.u32 %v6010_v25, %v6006_v40  ;;  %v6696_v56 = vshrl.u32 %v13004_v2, 16  ;;  %v6560_v36 = vrot.slane %v12999_v58, 5 }
 0x589   : > { %v6688_v6 = vrot.slane %v6413_v14, 6  ;;  %v6692_v27 = vrot.slane %v6419_v24, 6  ;;  %v6421_v4 = vrot.slane %v6419_v24, 5 }
 0x58a   : > { %v6012_v18 = vrot.slane %v6011_v5, 4  ;;  %v6698_v17 = vrot.slane %v6696_v56, 5  ;;  %v427_v5 = vld [vmem:[%s13166_s2 + $0x1c] sm:$0xf] }
 0x58b   : > { %8626 = vmatmul.mubr.msk.bf16.gmra.mrb[132].mxu1 %vm1370_vm5, %v12922_v35  ;;  %v6572_v57 = vsel %vm1416_vm0, %v427_v5, 0 }
 0x58c   : > { %8629 = vmatprep.mubr.msk.bf16.mxu1 %vm1370_vm5, %v12924_v26  ;;  %v6017_v28 = vsel %vm9451_vm6, %v6012_v18, %v6016_v60  ;;  %v6415_v18 = vrot.slane %v6413_v14, 5 }
 0x593   : > { %8630 = vmatmul.mubr.msk.bf16.gmra.mrb[136].mxu1 %vm1370_vm5, %v12934_v51 }
 0x594   : > { %8635 = vmatprep.mubr.msk.bf16.mxu1 %vm1370_vm5, %v12608_v12  ;;  %v13780_v12 = vshll.u32 %v12780_v42, 16  ;;  %v6687_v42 = vrot.slane %v6410_v43, 5 }
 0x596   : > { %v6000_v62 = vrot.slane %v13780_v12, 5  ;;  %v6689_v48 = vor.u32 %v6688_v6, %v6687_v42 }
 0x598   : > { %v6001_v3 = vor.u32 %v6000_v62, %v5997_v8  ;;  %v6690_v8 = vrot.slane %v6689_v48, 4 }
 0x59a   : > { %v6002_v39 = vrot.slane %v6001_v3, 4  ;;  %v6440_v3 = vsel %vm1416_vm0, %v426_v16, 0 }
 0x59b   : > { %8636 = vmatmul.mubr.msk.bf16.vlgmr.msra.gmra.mrb[124].mxu1 %vm1370_vm5, %v12612_v29 }
 0x59c   : > { %8652 = vmatpush3.bf16.msra.mxu1 %v6157_v22  ;;  %8639 = vmatprep.mubr.msk.bf16.mxu1 %vm1370_vm5, %v12720_v37  ;;  %v6007_v59 = vsel %vm9451_vm6, %v6002_v39, %v6006_v40  ;;  %v6412_v39 = vrot.slane %v6410_v43, 4 }
 0x59d   : > { %9036 = vmatprep.subr.msk.bf16.mxu1 %vm1416_vm0, %v425_v32  ;;  %v12971_v52 = vcombine.low %v6007_v59, %v6017_v28  ;;  %v6699_v32 = vrot.slane %v6429_v11, 6 }
 0x59f   : > { %v6700_v50 = vor.u32 %v6699_v32, %v6698_v17 }
 0x5a3   : > { %8640 = vmatmul.mubr.msk.bf16.gmra.mrb[128].mxu1 %vm1370_vm5, %v12726_v46 }
 0x5a4   : > { %8643 = vmatprep.mubr.msk.bf16.mxu1 %vm1370_vm5, %v12764_v63 }
 0x5ab   : > { %8644 = vmatmul.mubr.msk.bf16.gmra.mrb[132].mxu1 %vm1370_vm5, %v12771_v34 }
 0x5ac   : > { %8647 = vmatprep.mubr.msk.bf16.mxu1 %vm1370_vm5, %v12773_v49 }
 0x5b3   : > { %8648 = vmatmul.mubr.msk.bf16.gmra.mrb[136].mxu1 %vm1370_vm5, %v12971_v52 }
 0x5b4   : > { %8653 = vmatprep.mubr.msk.bf16.mxu1 %vm1370_vm5, %v12427_v23  ;;  %v6145_v23 = vrot.slane %v12785_v31, 5  ;;  %v6423_v31 = vshrl.u32 %v12999_v58, 16 }
 0x5b6   : > { %v6147_v38 = vrot.slane %v6145_v23, 4  ;;  %v6691_v1 = vrot.slane %v6423_v31, 5  ;;  %v6146_v0 = vsel %vm10099_vm8, %v7432_v13, %v6145_v23  ;;  %v6425_v60 = vrot.slane %v6423_v31, 4 }
 0x5b8   : > { %v6149_v15 = vsel %vm10099_vm8, %v6147_v38, %v6148_v41  ;;  %v6693_v22 = vor.u32 %v6692_v27, %v6691_v1  ;;  %v6426_v59 = vor.u32 %v6425_v60, %v6421_v4 }
 0x5b9   : > { %v7433_v62 = vcombine.low %v6146_v0, %v6149_v15 }
 0x5ba   : > { %v6695_v12 = vrot.slane %v6693_v22, 4  ;;  %v6694_v40 = vsel %vm12738_vm9, %v6690_v8, %v6693_v22 }
 0x5bb   : > { %8654 = vmatmul.mubr.msk.bf16.vlgmr.msra.gmra.mrb[124].mxu1 %vm1370_vm5, %v12443_v61 }
 0x5bc   : > { %8670 = vmatpush3.bf16.msra.mxu1 %v6294_v44  ;;  %8657 = vmatprep.mubr.msk.bf16.mxu1 %vm1370_vm5, %v12445_v47  ;;  %v6701_v53 = vsel %vm12738_vm9, %v6695_v12, %v6700_v50  ;;  %v6431_v44 = vrot.slane %v6429_v11, 5 }
 0x5bd   : > { %9037 = vmatprep.subr.msk.bf16.mxu1 %vm1416_vm0, %v426_v16  ;;  %v7470_v25 = vcombine.low %v6694_v40, %v6701_v53 }
 0x5c3   : > { %8658 = vmatmul.mubr.msk.bf16.gmra.mrb[128].mxu1 %vm1370_vm5, %v12502_v45 }
 0x5c4   : > { %8661 = vmatprep.mubr.msk.bf16.mxu1 %vm1370_vm5, %v12504_v20 }
 0x5cb   : > { %8662 = vmatmul.mubr.msk.bf16.gmra.mrb[132].mxu1 %vm1370_vm5, %v13784_v30 }
 0x5cc   : > { %8665 = vmatprep.mubr.msk.bf16.mxu1 %vm1370_vm5, %v13786_v10 }
 0x5d3   : > { %8666 = vmatmul.mubr.msk.bf16.gmra.mrb[136].mxu1 %vm1370_vm5, %v7433_v62 }
 0x5d4   : > { %8671 = vmatprep.mubr.msk.bf16.mxu1 %vm1370_vm5, %v12851_v7  ;;  %v428_v7 = vld [vmem:[%s13166_s2 + $0x20] sm:$0xf] }
 0x5db   : > { %8672 = vmatmul.mubr.msk.bf16.vlgmr.msra.gmra.mrb[124].mxu1 %vm1370_vm5, %v12855_v55 }
 0x5dc   : > { %8688 = vmatpush3.bf16.msra.mxu1 %v6440_v3  ;;  %8675 = vmatprep.mubr.msk.bf16.mxu1 %vm1370_vm5, %v12895_v33 }
 0x5dd   : > { %9038 = vmatprep.subr.msk.bf16.mxu1 %vm1416_vm0, %v427_v5 }
 0x5e3   : > { %8676 = vmatmul.mubr.msk.bf16.gmra.mrb[128].mxu1 %vm1370_vm5, %v12897_v54 }
 0x5e4   : > { %8679 = vmatprep.mubr.msk.bf16.mxu1 %vm1370_vm5, %v12922_v35 }
 0x5eb   : > { %8680 = vmatmul.mubr.msk.bf16.gmra.mrb[132].mxu1 %vm1370_vm5, %v12924_v26 }
 0x5ec   : > { %8683 = vmatprep.mubr.msk.bf16.mxu1 %vm1370_vm5, %v12934_v51 }
 0x5f3   : > { %8684 = vmatmul.mubr.msk.bf16.gmra.mrb[136].mxu1 %vm1370_vm5, %v12842_v19 }
 0x5f4   : > { %8689 = vmatprep.mubr.msk.bf16.mxu1 %vm1370_vm5, %v12612_v29  ;;  %v6416_v29 = vor.u32 %v6415_v18, %v6412_v39 }
 0x5f6   : > { %v6417_v28 = vrot.slane %v6416_v29, 4 }
 0x5fb   : > { %8690 = vmatmul.mubr.msk.bf16.vlgmr.msra.gmra.mrb[124].mxu1 %vm1370_vm5, %v12720_v37  ;;  %v6427_v37 = vrot.slane %v6426_v59, 4 }
 0x5fc   : > { %8706 = vmatpush3.bf16.msra.mxu1 %v6572_v57  ;;  %8693 = vmatprep.mubr.msk.bf16.mxu1 %vm1370_vm5, %v12726_v46  ;;  %v6422_v46 = vsel %vm9451_vm6, %v6417_v28, %v6421_v4 }
 0x5fd   : > { %9039 = vmatprep.subr.msk.bf16.mxu1 %vm1416_vm0, %v428_v7 }
 0x603   : > { %8694 = vmatmul.mubr.msk.bf16.gmra.mrb[128].mxu1 %vm1370_vm5, %v12764_v63  ;;  %v6432_v63 = vsel %vm9451_vm6, %v6427_v37, %v6431_v44 }
 0x604   : > { %8697 = vmatprep.mubr.msk.bf16.mxu1 %vm1370_vm5, %v12771_v34  ;;  %v7451_v16 = vcombine.low %v6422_v46, %v6432_v63  ;;  %v6709_v34 = vsel %vm1416_vm0, %v428_v7, 0 }
 0x60b   : > { %8698 = vmatmul.mubr.msk.bf16.gmra.mrb[132].mxu1 %vm1370_vm5, %v12773_v49  ;;  %v7460_v49 = vrot.slane %v12994_v21, 9 }
 0x60c   : > { %8701 = vmatprep.mubr.msk.bf16.mxu1 %vm1370_vm5, %v12971_v52  ;;  %v6563_v52 = vrot.slane %v13004_v2, 5 }
 0x613   : > { %8702 = vmatmul.mubr.msk.bf16.gmra.mrb[136].mxu1 %vm1370_vm5, %v7451_v16 }
 0x614   : > { %8707 = vmatprep.mubr.msk.bf16.mxu1 %vm1370_vm5, %v12443_v61  ;;  %v6562_v61 = vrot.slane %v6560_v36, 4 }
 0x61b   : > { %8708 = vmatmul.mubr.msk.bf16.vlgmr.msra.gmra.mrb[124].mxu1 %vm1370_vm5, %v12445_v47  ;;  %v6561_v47 = vsel %vm10099_vm8, %v7460_v49, %v6560_v36 }
 0x61c   : > { %8724 = vmatpush3.bf16.msra.mxu1 %v6709_v34  ;;  %8711 = vmatprep.mubr.msk.bf16.mxu1 %vm1370_vm5, %v12502_v45  ;;  %v6564_v45 = vsel %vm10099_vm8, %v6562_v61, %v6563_v52 }
 0x623   : > { %8712 = vmatmul.mubr.msk.bf16.gmra.mrb[128].mxu1 %vm1370_vm5, %v12504_v20  ;;  %v7461_v20 = vcombine.low %v6561_v47, %v6564_v45 }
 0x624   : > { %8715 = vmatprep.mubr.msk.bf16.mxu1 %vm1370_vm5, %v13784_v30 }
 0x62b   : > { %8716 = vmatmul.mubr.msk.bf16.gmra.mrb[132].mxu1 %vm1370_vm5, %v13786_v10 }
 0x62c   : > { %8719 = vmatprep.mubr.msk.bf16.mxu1 %vm1370_vm5, %v7433_v62 }
 0x633   : > { %8720 = vmatmul.mubr.msk.bf16.gmra.mrb[136].mxu1 %vm1370_vm5, %v7461_v20 }
 0x634   : > { %8725 = vmatprep.mubr.msk.bf16.mxu1 %vm1370_vm5, %v12855_v55  ;;  %v7479_v55 = vld [vmem:[%s13172_s8] ss:$0 sm:$0xff] }
 0x63b   : > { %8726 = vmatmul.mubr.msk.bf16.vlgmr.msra.gmra.mrb[124].mxu1 %vm1370_vm5, %v12895_v33 }
 0x63c   : > { %8729 = vmatprep.mubr.msk.bf16.mxu1 %vm1370_vm5, %v12897_v54  ;;  %v7480_v54 = vld [vmem:[%s13171_s7] ss:$0 sm:$0xff] }
 0x643   : > { %8730 = vmatmul.mubr.msk.bf16.gmra.mrb[128].mxu1 %vm1370_vm5, %v12922_v35 }
 0x644   : > { %8733 = vmatprep.mubr.msk.bf16.mxu1 %vm1370_vm5, %v12924_v26 }
 0x64b   : > { %8734 = vmatmul.mubr.msk.bf16.gmra.mrb[132].mxu1 %vm1370_vm5, %v12934_v51 }
 0x64c   : > { %8737 = vmatprep.mubr.msk.bf16.mxu1 %vm1370_vm5, %v12842_v19 }
 0x653   : > { %8738 = vmatmul.mubr.msk.bf16.gmra.mrb[136].mxu1 %vm1370_vm5, %v7470_v25 }
 0x70e   : > { %v8727_v33 = vpop.f32.mrb[124].mxu1 }
 0x70f   : > { %v8743_v35 = vadd.f32 %v8727_v33, %v7479_v55  ;;  %v6745_v26 = vpop.f32.mrb[125].mxu1 }
 0x710   : > { %v8744_v19 = vadd.f32 %v7479_v55, %v6745_v26  ;;  %v8728_v51 = vpop.f32.mrb[126].mxu1 }
 0x711   : > { %v6872_v23 = vadd.f32 %v8743_v35, %v7480_v54  ;;  %v8745_v13 = vadd.f32 %v8728_v51, %v7479_v55  ;;  %v6748_v38 = vpop.f32.mrb[127].mxu1 }
 0x712   : > { %v6870_v41 = vadd.f32 %v8744_v19, %v7480_v54  ;;  %v8746_v21 = vadd.f32 %v7479_v55, %v6748_v38 }
 0x713   : > { %6888 = vst.msk [vmem:[%s13115_s28 + $0x10] sm:$0xff] %vm3950_vm1, %v6872_v23  ;;  %v6873_v43 = vadd.f32 %v8745_v13, %v7480_v54 }
 0x714   : > { %6886 = vst.msk [vmem:[%s13115_s28] sm:$0xff] %vm3950_vm1, %v6870_v41  ;;  %v6871_v14 = vadd.f32 %v8746_v21, %v7480_v54 }
 0x715   : > { %6889 = vst.msk [vmem:[%s13115_s28 + $0x18] sm:$0xff] %vm3950_vm1, %v6873_v43 }
 0x716   : > { %6887 = vst.msk [vmem:[%s13115_s28 + $0x8] sm:$0xff] %vm3950_vm1, %v6871_v14  ;;  %v8731_v58 = vpop.f32.mrb[128].mxu1 }
 0x717   : > { %v8747_v24 = vadd.f32 %v8731_v58, %v7479_v55  ;;  %v6761_v31 = vpop.f32.mrb[129].mxu1 }
 0x718   : > { %v8748_v2 = vadd.f32 %v7479_v55, %v6761_v31  ;;  %v8732_v11 = vpop.f32.mrb[130].mxu1 }
 0x719   : > { %v6876_v42 = vadd.f32 %v8747_v24, %v7480_v54  ;;  %v8749_v6 = vadd.f32 %v8732_v11, %v7479_v55  ;;  %v6764_v1 = vpop.f32.mrb[131].mxu1 }
 0x71a   : > { %v6874_v27 = vadd.f32 %v8748_v2, %v7480_v54  ;;  %v8750_v30 = vadd.f32 %v7479_v55, %v6764_v1 }
 0x71b   : > { %6892 = vst.msk [vmem:[%s13115_s28 + $0x30] sm:$0xff] %vm3950_vm1, %v6876_v42  ;;  %v6877_v9 = vadd.f32 %v8749_v6, %v7480_v54 }
 0x71c   : > { %6890 = vst.msk [vmem:[%s13115_s28 + $0x20] sm:$0xff] %vm3950_vm1, %v6874_v27  ;;  %v6875_v0 = vadd.f32 %v8750_v30, %v7480_v54 }
 0x71d   : > { %6893 = vst.msk [vmem:[%s13115_s28 + $0x38] sm:$0xff] %vm3950_vm1, %v6877_v9 }
 0x71e   : > { %6891 = vst.msk [vmem:[%s13115_s28 + $0x28] sm:$0xff] %vm3950_vm1, %v6875_v0  ;;  %v8735_v56 = vpop.f32.mrb[132].mxu1 }
 0x71f   : > { %v8751_v10 = vadd.f32 %v8735_v56, %v7479_v55  ;;  %v6777_v15 = vpop.f32.mrb[133].mxu1 }
 0x720   : > { %v8752_v48 = vadd.f32 %v7479_v55, %v6777_v15  ;;  %v8736_v22 = vpop.f32.mrb[134].mxu1 }
 0x721   : > { %v6880_v32 = vadd.f32 %v8751_v10, %v7480_v54  ;;  %v8753_v17 = vadd.f32 %v8736_v22, %v7479_v55  ;;  %v6780_v8 = vpop.f32.mrb[135].mxu1 }
 0x722   : > { %v6878_v12 = vadd.f32 %v8752_v48, %v7480_v54  ;;  %v8754_v62 = vadd.f32 %v7479_v55, %v6780_v8 }
 0x723   : > { %6896 = vst.msk [vmem:[%s13115_s28 + $0x50] sm:$0xff] %vm3950_vm1, %v6880_v32  ;;  %v6881_v50 = vadd.f32 %v8753_v17, %v7480_v54 }
 0x724   : > { %6894 = vst.msk [vmem:[%s13115_s28 + $0x40] sm:$0xff] %vm3950_vm1, %v6878_v12  ;;  %v6879_v40 = vadd.f32 %v8754_v62, %v7480_v54 }
 0x725   : > { %6897 = vst.msk [vmem:[%s13115_s28 + $0x58] sm:$0xff] %vm3950_vm1, %v6881_v50 }
 0x726   : > { %6895 = vst.msk [vmem:[%s13115_s28 + $0x48] sm:$0xff] %vm3950_vm1, %v6879_v40  ;;  %v8739_v53 = vpop.f32.mrb[136].mxu1 }
 0x727   : > { %v8755_v25 = vadd.f32 %v8739_v53, %v7479_v55  ;;  %v6793_v3 = vpop.f32.mrb[137].mxu1 }
 0x728   : > { %v8756_v5 = vadd.f32 %v7479_v55, %v6793_v3  ;;  %v8740_v57 = vpop.f32.mrb[138].mxu1 }
 0x729   : > { %v6884_v7 = vadd.f32 %v8755_v25, %v7480_v54  ;;  %v8757_v39 = vadd.f32 %v8740_v57, %v7479_v55  ;;  %v6796_v18 = vpop.f32.mrb[139].mxu1 }
 0x72a   : > { %v6882_v4 = vadd.f32 %v8756_v5, %v7480_v54  ;;  %v8758_v60 = vadd.f32 %v7479_v55, %v6796_v18 }
 0x72b   : > { %6900 = vst.msk [vmem:[%s13115_s28 + $0x70] sm:$0xff] %vm3950_vm1, %v6884_v7  ;;  %v6885_v29 = vadd.f32 %v8757_v39, %v7480_v54 }
 0x72c   : > { %6898 = vst.msk [vmem:[%s13115_s28 + $0x60] sm:$0xff] %vm3950_vm1, %v6882_v4  ;;  %v6883_v59 = vadd.f32 %v8758_v60, %v7480_v54 }
 0x72d   : > { %6901 = vst.msk [vmem:[%s13115_s28 + $0x78] sm:$0xff] %vm3950_vm1, %v6885_v29 }
 0x72e   : > { %6899 = vst.msk [vmem:[%s13115_s28 + $0x68] sm:$0xff] %vm3950_vm1, %v6883_v59 }
 0x72f PF: > { %s19_s13 = sadd.s32 1, %s9166_s13   ;;  %s13787_s30 = smov %s9158_s11 }
 0x730   : > { %p16_p7 = scmp.ge.s32.totalorder %s19_s13, 6   ;;  %s13788_s10 = smov %s9162_s12 }
 0x731   : > { %s13789_s11 = smov %s13792_s14  ;;  %s13790_s12 = smov %s13796_s15 }
 0x732   :  { %18 = sbr.rel (!%p16_p7) target bundleno = 3 (0x3), region = 87 }

</bundles_post_ra>
